<compile_context>
chip_gen: v7x
topology: tpu7x:2x2x1
jax: 0.10.0
libtpu: 0.0.40
codegen_flags: <defaults>
</compile_context>

<pallas_src>
import jax
import jax.numpy as jnp
from jax.experimental import pallas as pl
from jax.experimental.pallas import tpu as pltpu


# ---------------------------------------------------------------------------
# Fused conv tower: 3 x (conv 3x3 pad=1 + bias + ReLU + maxpool 2x2/2) per image.
# ---------------------------------------------------------------------------

def fused_conv_tower(x_flat, prep, H, W):
    """x_flat: (N, R1, C1) f32 -- per image, the zero-padded (H+2)x(W+2) grid flattened
    row-major to (H+2)*(W+2) rows x C1 channels, with (W+3) extra zero margin rows on each
    side (so every conv tap is a constant, in-bounds row shift).
    Returns (N, Ho3*Wo3, 128) f32: pooled conv3 activations in NHWC-flatten order."""
    N, R1, C1 = x_flat.shape

    # Static per-stage geometry (floor pooling, like nn.MaxPool2d).
    couts = (prep["conv1_w"].shape[1], prep["conv2_w"].shape[1], prep["conv3_w"].shape[1])
    stages = []
    h, w, c = H, W, C1
    for co in couts:
        stages.append((h, w, c, co))
        h, w, c = h // 2, w // 2, co
    (H1, W1, Ci1, Co1), (H2, W2, Ci2, Co2), (H3, W3, Ci3, Co3) = stages
    Ho3, Wo3 = H3 // 2, W3 // 2
    P3 = Ho3 * Wo3

    npad = lambda hh, ww: (hh + 2) * (ww + 2)
    bufrows = lambda hh, ww: npad(hh, ww) + 2 * (ww + 2) + 2
    Np1, Np2, Np3 = npad(H1, W1), npad(H2, W2), npad(H3, W3)
    R2, R3 = bufrows(H2, W2), bufrows(H3, W3)
    assert R1 == bufrows(H1, W1), (R1, bufrows(H1, W1))
    assert prep["conv1_w"].shape[0] == 9 * Ci1
    wp2, wp3 = W2 + 2, W3 + 2

    def kernel(x_ref, w1_ref, b1_ref, w2_ref, b2_ref, w3_ref, b3_ref, out_ref,
               pat1, cb1, xb2, pat2, cb2, xb3, pat3, cb3):
        # Padding ring + shift margins of the intermediate grids must be zero.
        xb2[...] = jnp.zeros(xb2.shape, xb2.dtype)
        xb3[...] = jnp.zeros(xb3.shape, xb3.dtype)

        def stage(xb, pat, cb, w_ref, b_ref, hh, ww, cin, write_row):
            wp = ww + 2
            npd = (hh + 2) * wp
            ho_n, wo_n = hh // 2, ww // 2

            # im2col in VMEM: tap (kh, kw) of the flattened padded grid is a constant row
            # shift kh*wp + kw.  Folding the 9 taps onto the lane axis makes the matmul
            # contraction K = 9*cin (lane-dense) instead of 9 tiny K=cin dots.
            for kh in range(3):
                for kw in range(3):
                    t = kh * 3 + kw
                    off = kh * wp + kw
                    pat[:, t * cin:(t + 1) * cin] = xb[off:off + npd, :]

            # One MXU matmul per stage (bf16 operands, f32 accumulator).
            y = jnp.dot(pat[...].astype(jnp.bfloat16), w_ref[...],
                        preferred_element_type=jnp.float32)
            cb[...] = jnp.maximum(y + b_ref[...], 0.0)          # bias + ReLU in f32

            # Fused 2x2/2 max-pool + downsample: only interior conv rows/cols are sampled,
            # so values computed on the padding ring are never read.
            for ho in range(ho_n):
                base = (2 * ho + 1) * wp + 1
                r00 = cb[pl.ds(base,          wo_n, stride=2), :]
                r01 = cb[pl.ds(base + 1,      wo_n, stride=2), :]
                r10 = cb[pl.ds(base + wp,     wo_n, stride=2), :]
                r11 = cb[pl.ds(base + wp + 1, wo_n, stride=2), :]
                dst_ref, dst_start = write_row(ho)
                dst_ref[dst_start:dst_start + wo_n, :] = jnp.maximum(
                    jnp.maximum(r00, r01), jnp.maximum(r10, r11))

        # Pooled rows of stage s land directly in the interior of stage s+1's padded flat
        # grid; the last stage writes the NHWC-flattened feature block.
        stage(x_ref, pat1, cb1, w1_ref, b1_ref, H1, W1, Ci1,
              lambda ho: (xb2, (ho + 2) * wp2 + 2))
        stage(xb2, pat2, cb2, w2_ref, b2_ref, H2, W2, Ci2,
              lambda ho: (xb3, (ho + 2) * wp3 + 2))
        stage(xb3, pat3, cb3, w3_ref, b3_ref, H3, W3, Ci3,
              lambda ho: (out_ref, ho * Wo3))

    grid_spec = pltpu.PrefetchScalarGridSpec(
        num_scalar_prefetch=0,
        grid=(N,),
        in_specs=[
            pl.BlockSpec((None, R1, C1), lambda i: (i, 0, 0)),     # per-image input block
            pl.BlockSpec((9 * Ci1, Co1), lambda i: (0, 0)),        # resident folded weights
            pl.BlockSpec((1, Co1), lambda i: (0, 0)),
            pl.BlockSpec((9 * Ci2, Co2), lambda i: (0, 0)),
            pl.BlockSpec((1, Co2), lambda i: (0, 0)),
            pl.BlockSpec((9 * Ci3, Co3), lambda i: (0, 0)),
            pl.BlockSpec((1, Co3), lambda i: (0, 0)),
        ],
        out_specs=pl.BlockSpec((None, P3, Co3), lambda i: (i, 0, 0)),
        scratch_shapes=[
            pltpu.VMEM((Np1, 9 * Ci1), jnp.float32),   # stage-1 folded patches
            pltpu.VMEM((Np1, Co1), jnp.float32),       # stage-1 conv output
            pltpu.VMEM((R2, Co1), jnp.float32),        # stage-2 padded input grid
            pltpu.VMEM((Np2, 9 * Ci2), jnp.float32),
            pltpu.VMEM((Np2, Co2), jnp.float32),
            pltpu.VMEM((R3, Co2), jnp.float32),        # stage-3 padded input grid
            pltpu.VMEM((Np3, 9 * Ci3), jnp.float32),
            pltpu.VMEM((Np3, Co3), jnp.float32),
        ],
    )
    return pl.pallas_call(
        kernel,
        out_shape=jax.ShapeDtypeStruct((N, P3, Co3), jnp.float32),
        grid_spec=grid_spec,
        compiler_params=pltpu.CompilerParams(
            dimension_semantics=("parallel",),         # batch split across megacore TCs
            vmem_limit_bytes=32 * 1024 * 1024),
    )(x_flat, prep["conv1_w"], prep["conv1_b"], prep["conv2_w"], prep["conv2_b"],
      prep["conv3_w"], prep["conv3_b"])


# ---------------------------------------------------------------------------
# MLP head (fc1 + ReLU + fc2), whole-array VMEM residency.
# ---------------------------------------------------------------------------

def mlp_kernel(x_ref, w1_ref, b1_ref, w2_ref, b2_ref, o_ref):
    h = jnp.dot(x_ref[...].astype(jnp.bfloat16), w1_ref[...],
                preferred_element_type=jnp.float32)
    h = jnp.maximum(h + b1_ref[...], 0.0)
    o_ref[...] = jnp.dot(h.astype(jnp.bfloat16), w2_ref[...],
                         preferred_element_type=jnp.float32) + b2_ref[...]


def mlp(feats, prep):
    # TODO(synk): tile over batch with a grid once the batch outgrows VMEM residency.
    n = feats.shape[0]
    nc = prep["fc2_w"].shape[1]
    n_pad = max(8, ((n + 7) // 8) * 8)     # sublane-align the batch for the MXU
    if n_pad != n:
        feats = jnp.pad(feats, ((0, n_pad - n), (0, 0)))
    out = pl.pallas_call(
        mlp_kernel,
        out_shape=jax.ShapeDtypeStruct((n_pad, nc), jnp.float32),
        in_specs=[pl.BlockSpec(memory_space=pltpu.MemorySpace.VMEM) for _ in range(5)],
        out_specs=pl.BlockSpec(memory_space=pltpu.MemorySpace.VMEM),
    )(feats, prep["fc1_w"], prep["fc1_b"], prep["fc2_w"], prep["fc2_b"])
    return out[:n]


# ---------------------------------------------------------------------------
# Forward pass (matches EmotionClassifier.forward on NCHW input).
# ---------------------------------------------------------------------------

def emotion_classifier_forward(x_nchw, prep):
    N, cin, H, W = x_nchw.shape
    c1 = max(cin, 8)                      # lane-pad the 1-channel input
    wp1 = W + 2
    # NCHW -> NHWC, conv padding=1 zero ring, channel pad, flatten (h, w) to rows, then add
    # the +-(W+3) zero margin rows used by the in-kernel shifted-slice tap extraction.
    x = jnp.transpose(x_nchw, (0, 2, 3, 1))
    x = jnp.pad(x, ((0, 0), (1, 1), (1, 1), (0, c1 - cin)))
    x = x.reshape(N, (H + 2) * wp1, c1)
    x = jnp.pad(x, ((0, 0), (wp1 + 1, wp1 + 1), (0, 0)))
    feats = fused_conv_tower(x, prep, H, W)          # (N, Ho3*Wo3, 128)
    feats = feats.reshape(N, -1)                     # NHWC flatten (fc1 pre-permuted to match)
    return mlp(feats, prep)


# ---------------------------------------------------------------------------
# Parameters: torch-layout init + one-time conversion to the kernel layout.
# ---------------------------------------------------------------------------

def init_params(key, num_classes, max_length, width):
    """Torch-layout parameters (same shapes as EmotionClassifier.__init__)."""
    ks = jax.random.split(key, 10)

    def rnd(k, shape, fan_in):
        return jax.random.normal(k, shape, jnp.float32) * (fan_in ** -0.5)

    flat = 128 * (max_length // 8) * (width // 8)
    return {
        "conv1_w": rnd(ks[0], (32, 1, 3, 3), 1 * 9),
        "conv1_b": rnd(ks[1], (32,), 1 * 9),
        "conv2_w": rnd(ks[2], (64, 32, 3, 3), 32 * 9),
        "conv2_b": rnd(ks[3], (64,), 32 * 9),
        "conv3_w": rnd(ks[4], (128, 64, 3, 3), 64 * 9),
        "conv3_b": rnd(ks[5], (128,), 64 * 9),
        "fc1_w": rnd(ks[6], (128, flat), flat),
        "fc1_b": rnd(ks[7], (128,), flat),
        "fc2_w": rnd(ks[8], (num_classes, 128), 128),
        "fc2_b": rnd(ks[9], (num_classes,), 128),
    }


def prepare_params(p, max_length, width):
    """One-time conversion to the kernel layout: conv weights folded tap-major to
    (9*Cin, Cout) bf16, biases as (1, Cout) f32, fc1 transposed AND column-permuted from
    NCHW-flatten to NHWC-flatten order, fc2 transposed; FC weights in bf16."""
    def fold_conv(w, cin_pad):
        cout, cin = w.shape[0], w.shape[1]
        wt = jnp.transpose(w, (2, 3, 1, 0))                 # (3, 3, Cin, Cout)
        if cin_pad > cin:
            wt = jnp.pad(wt, ((0, 0), (0, 0), (0, cin_pad - cin), (0, 0)))
        return wt.reshape(9 * cin_pad, cout).astype(jnp.bfloat16)

    ho3, wo3 = max_length // 8, width // 8
    cout3 = p["conv3_w"].shape[0]
    nh = p["fc1_w"].shape[0]
    fc1 = p["fc1_w"].reshape(nh, cout3, ho3, wo3)           # (out, c, ho, wo)  NCHW flatten
    fc1 = jnp.transpose(fc1, (2, 3, 1, 0)).reshape(ho3 * wo3 * cout3, nh)   # NHWC flatten

    return {
        "conv1_w": fold_conv(p["conv1_w"], max(p["conv1_w"].shape[1], 8)),
        "conv1_b": p["conv1_b"].reshape(1, -1).astype(jnp.float32),
        "conv2_w": fold_conv(p["conv2_w"], p["conv2_w"].shape[1]),
        "conv2_b": p["conv2_b"].reshape(1, -1).astype(jnp.float32),
        "conv3_w": fold_conv(p["conv3_w"], p["conv3_w"].shape[1]),
        "conv3_b": p["conv3_b"].reshape(1, -1).astype(jnp.float32),
        "fc1_w": fc1.astype(jnp.bfloat16),
        "fc1_b": p["fc1_b"].reshape(1, -1).astype(jnp.float32),
        "fc2_w": p["fc2_w"].T.astype(jnp.bfloat16),
        "fc2_b": p["fc2_b"].reshape(1, -1).astype(jnp.float32),
    }


# ---------------------------------------------------------------------------
# Pure-JAX reference (numerical sanity check against torch semantics).
# ---------------------------------------------------------------------------

def reference_forward(x, p):
    prec = jax.lax.Precision.HIGHEST

    def conv(x, w, b):
        y = jax.lax.conv_general_dilated(
            x, w, window_strides=(1, 1), padding=((1, 1), (1, 1)),
            dimension_numbers=("NCHW", "OIHW", "NCHW"), precision=prec)
        return y + b[None, :, None, None]

    def pool(x):
        return jax.lax.reduce_window(x, -jnp.inf, jax.lax.max,
                                     (1, 1, 2, 2), (1, 1, 2, 2), "VALID")

    x = pool(jax.nn.relu(conv(x, p["conv1_w"], p["conv1_b"])))
    x = pool(jax.nn.relu(conv(x, p["conv2_w"], p["conv2_b"])))
    x = pool(jax.nn.relu(conv(x, p["conv3_w"], p["conv3_b"])))
    x = x.reshape(x.shape[0], -1)
    x = jax.nn.relu(jnp.dot(x, p["fc1_w"].T, precision=prec) + p["fc1_b"])
    return jnp.dot(x, p["fc2_w"].T, precision=prec) + p["fc2_b"]


if __name__ == "__main__":
    # Small shapes consistent with the module: width = 13 (so 13 // 8 == 1 in the fc1
    # sizing) and max_length = 16 (small stand-in for 100); fc1 in_features =
    # 128 * (max_length // 8) * (13 // 8) = 256 matches the flattened conv output.
    max_length, width = 16, 13
    num_classes, batch = 2, 2

    key = jax.random.PRNGKey(0)
    pkey, xkey = jax.random.split(key)
    params = init_params(pkey, num_classes, max_length, width)
    prep = prepare_params(params, max_length, width)
    x = jax.random.normal(xkey, (batch, 1, max_length, width), jnp.float32)

    fwd = jax.jit(emotion_classifier_forward)
    out = jax.block_until_ready(fwd(x, prep))

    ref = reference_forward(x, params)
    assert out.shape == (batch, num_classes), out.shape
    # bf16 MXU operands with f32 accumulation -> slightly looser tolerance than pure f32.
    assert jnp.allclose(out, ref, rtol=5e-2, atol=5e-2), (out, ref)
    print("KERNEL_OK")
</pallas_src>

<mosaic_0001>
module attributes {stable_mosaic.version = 11 : i64} {
  func.func @kernel(%arg0: i32, %arg1: memref<1x302x8xf32, #tpu.memory_space<vmem>>, %arg2: memref<72x32xbf16, #tpu.memory_space<vmem>>, %arg3: memref<1x32xf32, #tpu.memory_space<vmem>>, %arg4: memref<288x64xbf16, #tpu.memory_space<vmem>>, %arg5: memref<1x64xf32, #tpu.memory_space<vmem>>, %arg6: memref<576x128xbf16, #tpu.memory_space<vmem>>, %arg7: memref<1x128xf32, #tpu.memory_space<vmem>>, %arg8: memref<1x2x128xf32, #tpu.memory_space<vmem>>, %arg9: memref<270x72xf32, #tpu.memory_space<vmem>>, %arg10: memref<270x32xf32, #tpu.memory_space<vmem>>, %arg11: memref<98x32xf32, #tpu.memory_space<vmem>>, %arg12: memref<80x288xf32, #tpu.memory_space<vmem>>, %arg13: memref<80x64xf32, #tpu.memory_space<vmem>>, %arg14: memref<42x64xf32, #tpu.memory_space<vmem>>, %arg15: memref<30x576xf32, #tpu.memory_space<vmem>>, %arg16: memref<30x128xf32, #tpu.memory_space<vmem>>) attributes {dimension_semantics = [#tpu.dimension_semantics<parallel>], iteration_bounds = array<i64: 2>, scalar_prefetch = 0 : i64, scratch_operands = 8 : i64, tpu.core_type = #tpu.core_type<tc>, window_params = [{transform_indices = @transform_0, window_bounds = array<i64: 1, 302, 8>}, {pipeline_mode = #tpu.pipeline_mode<synchronous>, transform_indices = @transform_1, window_bounds = array<i64: 72, 32>}, {pipeline_mode = #tpu.pipeline_mode<synchronous>, transform_indices = @transform_2, window_bounds = array<i64: 1, 32>}, {pipeline_mode = #tpu.pipeline_mode<synchronous>, transform_indices = @transform_3, window_bounds = array<i64: 288, 64>}, {pipeline_mode = #tpu.pipeline_mode<synchronous>, transform_indices = @transform_4, window_bounds = array<i64: 1, 64>}, {pipeline_mode = #tpu.pipeline_mode<synchronous>, transform_indices = @transform_5, window_bounds = array<i64: 576, 128>}, {pipeline_mode = #tpu.pipeline_mode<synchronous>, transform_indices = @transform_6, window_bounds = array<i64: 1, 128>}, {transform_indices = @transform_7, window_bounds = array<i64: 1, 2, 128>}]} {
    %cst = arith.constant 0.000000e+00 : f32
    %0 = vector.broadcast %cst : f32 to vector<98x32xf32>
    %c0 = arith.constant 0 : index
    %c0_0 = arith.constant 0 : index
    %1 = vector.load %arg11[%c0, %c0_0] : memref<98x32xf32, #tpu.memory_space<vmem>>, vector<98x32xf32>
    tpu.vector_store %arg11[%c0, %c0_0], %0 {strides = array<i32>} : memref<98x32xf32, #tpu.memory_space<vmem>>, vector<98x32xf32>,
    %cst_1 = arith.constant 0.000000e+00 : f32
    %2 = vector.broadcast %cst_1 : f32 to vector<42x64xf32>
    %c0_2 = arith.constant 0 : index
    %c0_3 = arith.constant 0 : index
    %3 = vector.load %arg14[%c0_2, %c0_3] : memref<42x64xf32, #tpu.memory_space<vmem>>, vector<42x64xf32>
    tpu.vector_store %arg14[%c0_2, %c0_3], %2 {strides = array<i32>} : memref<42x64xf32, #tpu.memory_space<vmem>>, vector<42x64xf32>,
    %c0_4 = arith.constant 0 : index
    %c0_5 = arith.constant 0 : index
    %c0_6 = arith.constant 0 : index
    %4 = vector.load %arg1[%c0_4, %c0_5, %c0_6] : memref<1x302x8xf32, #tpu.memory_space<vmem>>, vector<1x270x8xf32>
    %5 = vector.shape_cast %4 : vector<1x270x8xf32> to vector<270x8xf32>
    %c0_7 = arith.constant 0 : index
    %c0_8 = arith.constant 0 : index
    %6 = vector.load %arg9[%c0_7, %c0_8] : memref<270x72xf32, #tpu.memory_space<vmem>>, vector<270x8xf32>
    tpu.vector_store %arg9[%c0_7, %c0_8], %5 {strides = array<i32>} : memref<270x72xf32, #tpu.memory_space<vmem>>, vector<270x8xf32>,
    %c0_9 = arith.constant 0 : index
    %c1 = arith.constant 1 : index
    %c0_10 = arith.constant 0 : index
    %7 = vector.load %arg1[%c0_9, %c1, %c0_10] : memref<1x302x8xf32, #tpu.memory_space<vmem>>, vector<1x270x8xf32>
    %8 = vector.shape_cast %7 : vector<1x270x8xf32> to vector<270x8xf32>
    %c0_11 = arith.constant 0 : index
    %c8 = arith.constant 8 : index
    %9 = vector.load %arg9[%c0_11, %c8] : memref<270x72xf32, #tpu.memory_space<vmem>>, vector<270x8xf32>
    tpu.vector_store %arg9[%c0_11, %c8], %8 {strides = array<i32>} : memref<270x72xf32, #tpu.memory_space<vmem>>, vector<270x8xf32>,
    %c0_12 = arith.constant 0 : index
    %c2 = arith.constant 2 : index
    %c0_13 = arith.constant 0 : index
    %10 = vector.load %arg1[%c0_12, %c2, %c0_13] : memref<1x302x8xf32, #tpu.memory_space<vmem>>, vector<1x270x8xf32>
    %11 = vector.shape_cast %10 : vector<1x270x8xf32> to vector<270x8xf32>
    %c0_14 = arith.constant 0 : index
    %c16 = arith.constant 16 : index
    %12 = vector.load %arg9[%c0_14, %c16] : memref<270x72xf32, #tpu.memory_space<vmem>>, vector<270x8xf32>
    tpu.vector_store %arg9[%c0_14, %c16], %11 {strides = array<i32>} : memref<270x72xf32, #tpu.memory_space<vmem>>, vector<270x8xf32>,
    %c0_15 = arith.constant 0 : index
    %c15 = arith.constant 15 : index
    %c0_16 = arith.constant 0 : index
    %13 = vector.load %arg1[%c0_15, %c15, %c0_16] : memref<1x302x8xf32, #tpu.memory_space<vmem>>, vector<1x270x8xf32>
    %14 = vector.shape_cast %13 : vector<1x270x8xf32> to vector<270x8xf32>
    %c0_17 = arith.constant 0 : index
    %c24 = arith.constant 24 : index
    %15 = vector.load %arg9[%c0_17, %c24] : memref<270x72xf32, #tpu.memory_space<vmem>>, vector<270x8xf32>
    tpu.vector_store %arg9[%c0_17, %c24], %14 {strides = array<i32>} : memref<270x72xf32, #tpu.memory_space<vmem>>, vector<270x8xf32>,
    %c0_18 = arith.constant 0 : index
    %c16_19 = arith.constant 16 : index
    %c0_20 = arith.constant 0 : index
    %16 = vector.load %arg1[%c0_18, %c16_19, %c0_20] : memref<1x302x8xf32, #tpu.memory_space<vmem>>, vector<1x270x8xf32>
    %17 = vector.shape_cast %16 : vector<1x270x8xf32> to vector<270x8xf32>
    %c0_21 = arith.constant 0 : index
    %c32 = arith.constant 32 : index
    %18 = vector.load %arg9[%c0_21, %c32] : memref<270x72xf32, #tpu.memory_space<vmem>>, vector<270x8xf32>
    tpu.vector_store %arg9[%c0_21, %c32], %17 {strides = array<i32>} : memref<270x72xf32, #tpu.memory_space<vmem>>, vector<270x8xf32>,
    %c0_22 = arith.constant 0 : index
    %c17 = arith.constant 17 : index
    %c0_23 = arith.constant 0 : index
    %19 = vector.load %arg1[%c0_22, %c17, %c0_23] : memref<1x302x8xf32, #tpu.memory_space<vmem>>, vector<1x270x8xf32>
    %20 = vector.shape_cast %19 : vector<1x270x8xf32> to vector<270x8xf32>
    %c0_24 = arith.constant 0 : index
    %c40 = arith.constant 40 : index
    %21 = vector.load %arg9[%c0_24, %c40] : memref<270x72xf32, #tpu.memory_space<vmem>>, vector<270x8xf32>
    tpu.vector_store %arg9[%c0_24, %c40], %20 {strides = array<i32>} : memref<270x72xf32, #tpu.memory_space<vmem>>, vector<270x8xf32>,
    %c0_25 = arith.constant 0 : index
    %c30 = arith.constant 30 : index
    %c0_26 = arith.constant 0 : index
    %22 = vector.load %arg1[%c0_25, %c30, %c0_26] : memref<1x302x8xf32, #tpu.memory_space<vmem>>, vector<1x270x8xf32>
    %23 = vector.shape_cast %22 : vector<1x270x8xf32> to vector<270x8xf32>
    %c0_27 = arith.constant 0 : index
    %c48 = arith.constant 48 : index
    %24 = vector.load %arg9[%c0_27, %c48] : memref<270x72xf32, #tpu.memory_space<vmem>>, vector<270x8xf32>
    tpu.vector_store %arg9[%c0_27, %c48], %23 {strides = array<i32>} : memref<270x72xf32, #tpu.memory_space<vmem>>, vector<270x8xf32>,
    %c0_28 = arith.constant 0 : index
    %c31 = arith.constant 31 : index
    %c0_29 = arith.constant 0 : index
    %25 = vector.load %arg1[%c0_28, %c31, %c0_29] : memref<1x302x8xf32, #tpu.memory_space<vmem>>, vector<1x270x8xf32>
    %26 = vector.shape_cast %25 : vector<1x270x8xf32> to vector<270x8xf32>
    %c0_30 = arith.constant 0 : index
    %c56 = arith.constant 56 : index
    %27 = vector.load %arg9[%c0_30, %c56] : memref<270x72xf32, #tpu.memory_space<vmem>>, vector<270x8xf32>
    tpu.vector_store %arg9[%c0_30, %c56], %26 {strides = array<i32>} : memref<270x72xf32, #tpu.memory_space<vmem>>, vector<270x8xf32>,
    %c0_31 = arith.constant 0 : index
    %c32_32 = arith.constant 32 : index
    %c0_33 = arith.constant 0 : index
    %28 = vector.load %arg1[%c0_31, %c32_32, %c0_33] : memref<1x302x8xf32, #tpu.memory_space<vmem>>, vector<1x270x8xf32>
    %29 = vector.shape_cast %28 : vector<1x270x8xf32> to vector<270x8xf32>
    %c0_34 = arith.constant 0 : index
    %c64 = arith.constant 64 : index
    %30 = vector.load %arg9[%c0_34, %c64] : memref<270x72xf32, #tpu.memory_space<vmem>>, vector<270x8xf32>
    tpu.vector_store %arg9[%c0_34, %c64], %29 {strides = array<i32>} : memref<270x72xf32, #tpu.memory_space<vmem>>, vector<270x8xf32>,
    %c0_35 = arith.constant 0 : index
    %c0_36 = arith.constant 0 : index
    %31 = vector.load %arg9[%c0_35, %c0_36] : memref<270x72xf32, #tpu.memory_space<vmem>>, vector<270x72xf32>
    %32 = arith.truncf %31 : vector<270x72xf32> to vector<270x72xbf16>
    %c0_37 = arith.constant 0 : index
    %c0_38 = arith.constant 0 : index
    %33 = vector.load %arg2[%c0_37, %c0_38] : memref<72x32xbf16, #tpu.memory_space<vmem>>, vector<72x32xbf16>
    %cst_39 = arith.constant dense<0.000000e+00> : vector<270x32xf32>
    %34 = tpu.matmul %32, %33, %cst_39 {dimension_numbers = #tpu.dot_dimension_numbers<[1], [0], [0], [1], [0, 0, 1, 1], [], []>} : vector<270x72xbf16>, vector<72x32xbf16>, vector<270x32xf32> -> vector<270x32xf32>
    %c0_40 = arith.constant 0 : index
    %c0_41 = arith.constant 0 : index
    %35 = vector.load %arg3[%c0_40, %c0_41] : memref<1x32xf32, #tpu.memory_space<vmem>>, vector<1x32xf32>
    %36 = vector.broadcast %35 : vector<1x32xf32> to vector<270x32xf32>
    %37 = arith.addf %34, %36 : vector<270x32xf32>
    %cst_42 = arith.constant 0.000000e+00 : f32
    %38 = vector.broadcast %cst_42 : f32 to vector<270x32xf32>
    %39 = arith.maximumf %37, %38 : vector<270x32xf32>
    %c0_43 = arith.constant 0 : index
    %c0_44 = arith.constant 0 : index
    %40 = vector.load %arg10[%c0_43, %c0_44] : memref<270x32xf32, #tpu.memory_space<vmem>>, vector<270x32xf32>
    tpu.vector_store %arg10[%c0_43, %c0_44], %39 {strides = array<i32>} : memref<270x32xf32, #tpu.memory_space<vmem>>, vector<270x32xf32>,
    %c16_45 = arith.constant 16 : index
    %c0_46 = arith.constant 0 : index
    %41 = tpu.strided_load %arg10[%c16_45, %c0_46] {strides = array<i32: 2, 1>} : memref<270x32xf32, #tpu.memory_space<vmem>>, vector<6x32xf32>
    %c17_47 = arith.constant 17 : index
    %c0_48 = arith.constant 0 : index
    %42 = tpu.strided_load %arg10[%c17_47, %c0_48] {strides = array<i32: 2, 1>} : memref<270x32xf32, #tpu.memory_space<vmem>>, vector<6x32xf32>
    %c31_49 = arith.constant 31 : index
    %c0_50 = arith.constant 0 : index
    %43 = tpu.strided_load %arg10[%c31_49, %c0_50] {strides = array<i32: 2, 1>} : memref<270x32xf32, #tpu.memory_space<vmem>>, vector<6x32xf32>
    %c32_51 = arith.constant 32 : index
    %c0_52 = arith.constant 0 : index
    %44 = tpu.strided_load %arg10[%c32_51, %c0_52] {strides = array<i32: 2, 1>} : memref<270x32xf32, #tpu.memory_space<vmem>>, vector<6x32xf32>
    %45 = arith.maximumf %41, %42 : vector<6x32xf32>
    %46 = arith.maximumf %43, %44 : vector<6x32xf32>
    %47 = arith.maximumf %45, %46 : vector<6x32xf32>
    %c18 = arith.constant 18 : index
    %c0_53 = arith.constant 0 : index
    %48 = vector.load %arg11[%c18, %c0_53] : memref<98x32xf32, #tpu.memory_space<vmem>>, vector<6x32xf32>
    tpu.vector_store %arg11[%c18, %c0_53], %47 {strides = array<i32>} : memref<98x32xf32, #tpu.memory_space<vmem>>, vector<6x32xf32>,
    %c46 = arith.constant 46 : index
    %c0_54 = arith.constant 0 : index
    %49 = tpu.strided_load %arg10[%c46, %c0_54] {strides = array<i32: 2, 1>} : memref<270x32xf32, #tpu.memory_space<vmem>>, vector<6x32xf32>
    %c47 = arith.constant 47 : index
    %c0_55 = arith.constant 0 : index
    %50 = tpu.strided_load %arg10[%c47, %c0_55] {strides = array<i32: 2, 1>} : memref<270x32xf32, #tpu.memory_space<vmem>>, vector<6x32xf32>
    %c61 = arith.constant 61 : index
    %c0_56 = arith.constant 0 : index
    %51 = tpu.strided_load %arg10[%c61, %c0_56] {strides = array<i32: 2, 1>} : memref<270x32xf32, #tpu.memory_space<vmem>>, vector<6x32xf32>
    %c62 = arith.constant 62 : index
    %c0_57 = arith.constant 0 : index
    %52 = tpu.strided_load %arg10[%c62, %c0_57] {strides = array<i32: 2, 1>} : memref<270x32xf32, #tpu.memory_space<vmem>>, vector<6x32xf32>
    %53 = arith.maximumf %49, %50 : vector<6x32xf32>
    %54 = arith.maximumf %51, %52 : vector<6x32xf32>
    %55 = arith.maximumf %53, %54 : vector<6x32xf32>
    %c26 = arith.constant 26 : index
    %c0_58 = arith.constant 0 : index
    %56 = vector.load %arg11[%c26, %c0_58] : memref<98x32xf32, #tpu.memory_space<vmem>>, vector<6x32xf32>
    tpu.vector_store %arg11[%c26, %c0_58], %55 {strides = array<i32>} : memref<98x32xf32, #tpu.memory_space<vmem>>, vector<6x32xf32>,
    %c76 = arith.constant 76 : index
    %c0_59 = arith.constant 0 : index
    %57 = tpu.strided_load %arg10[%c76, %c0_59] {strides = array<i32: 2, 1>} : memref<270x32xf32, #tpu.memory_space<vmem>>, vector<6x32xf32>
    %c77 = arith.constant 77 : index
    %c0_60 = arith.constant 0 : index
    %58 = tpu.strided_load %arg10[%c77, %c0_60] {strides = array<i32: 2, 1>} : memref<270x32xf32, #tpu.memory_space<vmem>>, vector<6x32xf32>
    %c91 = arith.constant 91 : index
    %c0_61 = arith.constant 0 : index
    %59 = tpu.strided_load %arg10[%c91, %c0_61] {strides = array<i32: 2, 1>} : memref<270x32xf32, #tpu.memory_space<vmem>>, vector<6x32xf32>
    %c92 = arith.constant 92 : index
    %c0_62 = arith.constant 0 : index
    %60 = tpu.strided_load %arg10[%c92, %c0_62] {strides = array<i32: 2, 1>} : memref<270x32xf32, #tpu.memory_space<vmem>>, vector<6x32xf32>
    %61 = arith.maximumf %57, %58 : vector<6x32xf32>
    %62 = arith.maximumf %59, %60 : vector<6x32xf32>
    %63 = arith.maximumf %61, %62 : vector<6x32xf32>
    %c34 = arith.constant 34 : index
    %c0_63 = arith.constant 0 : index
    %64 = vector.load %arg11[%c34, %c0_63] : memref<98x32xf32, #tpu.memory_space<vmem>>, vector<6x32xf32>
    tpu.vector_store %arg11[%c34, %c0_63], %63 {strides = array<i32>} : memref<98x32xf32, #tpu.memory_space<vmem>>, vector<6x32xf32>,
    %c106 = arith.constant 106 : index
    %c0_64 = arith.constant 0 : index
    %65 = tpu.strided_load %arg10[%c106, %c0_64] {strides = array<i32: 2, 1>} : memref<270x32xf32, #tpu.memory_space<vmem>>, vector<6x32xf32>
    %c107 = arith.constant 107 : index
    %c0_65 = arith.constant 0 : index
    %66 = tpu.strided_load %arg10[%c107, %c0_65] {strides = array<i32: 2, 1>} : memref<270x32xf32, #tpu.memory_space<vmem>>, vector<6x32xf32>
    %c121 = arith.constant 121 : index
    %c0_66 = arith.constant 0 : index
    %67 = tpu.strided_load %arg10[%c121, %c0_66] {strides = array<i32: 2, 1>} : memref<270x32xf32, #tpu.memory_space<vmem>>, vector<6x32xf32>
    %c122 = arith.constant 122 : index
    %c0_67 = arith.constant 0 : index
    %68 = tpu.strided_load %arg10[%c122, %c0_67] {strides = array<i32: 2, 1>} : memref<270x32xf32, #tpu.memory_space<vmem>>, vector<6x32xf32>
    %69 = arith.maximumf %65, %66 : vector<6x32xf32>
    %70 = arith.maximumf %67, %68 : vector<6x32xf32>
    %71 = arith.maximumf %69, %70 : vector<6x32xf32>
    %c42 = arith.constant 42 : index
    %c0_68 = arith.constant 0 : index
    %72 = vector.load %arg11[%c42, %c0_68] : memref<98x32xf32, #tpu.memory_space<vmem>>, vector<6x32xf32>
    tpu.vector_store %arg11[%c42, %c0_68], %71 {strides = array<i32>} : memref<98x32xf32, #tpu.memory_space<vmem>>, vector<6x32xf32>,
    %c136 = arith.constant 136 : index
    %c0_69 = arith.constant 0 : index
    %73 = tpu.strided_load %arg10[%c136, %c0_69] {strides = array<i32: 2, 1>} : memref<270x32xf32, #tpu.memory_space<vmem>>, vector<6x32xf32>
    %c137 = arith.constant 137 : index
    %c0_70 = arith.constant 0 : index
    %74 = tpu.strided_load %arg10[%c137, %c0_70] {strides = array<i32: 2, 1>} : memref<270x32xf32, #tpu.memory_space<vmem>>, vector<6x32xf32>
    %c151 = arith.constant 151 : index
    %c0_71 = arith.constant 0 : index
    %75 = tpu.strided_load %arg10[%c151, %c0_71] {strides = array<i32: 2, 1>} : memref<270x32xf32, #tpu.memory_space<vmem>>, vector<6x32xf32>
    %c152 = arith.constant 152 : index
    %c0_72 = arith.constant 0 : index
    %76 = tpu.strided_load %arg10[%c152, %c0_72] {strides = array<i32: 2, 1>} : memref<270x32xf32, #tpu.memory_space<vmem>>, vector<6x32xf32>
    %77 = arith.maximumf %73, %74 : vector<6x32xf32>
    %78 = arith.maximumf %75, %76 : vector<6x32xf32>
    %79 = arith.maximumf %77, %78 : vector<6x32xf32>
    %c50 = arith.constant 50 : index
    %c0_73 = arith.constant 0 : index
    %80 = vector.load %arg11[%c50, %c0_73] : memref<98x32xf32, #tpu.memory_space<vmem>>, vector<6x32xf32>
    tpu.vector_store %arg11[%c50, %c0_73], %79 {strides = array<i32>} : memref<98x32xf32, #tpu.memory_space<vmem>>, vector<6x32xf32>,
    %c166 = arith.constant 166 : index
    %c0_74 = arith.constant 0 : index
    %81 = tpu.strided_load %arg10[%c166, %c0_74] {strides = array<i32: 2, 1>} : memref<270x32xf32, #tpu.memory_space<vmem>>, vector<6x32xf32>
    %c167 = arith.constant 167 : index
    %c0_75 = arith.constant 0 : index
    %82 = tpu.strided_load %arg10[%c167, %c0_75] {strides = array<i32: 2, 1>} : memref<270x32xf32, #tpu.memory_space<vmem>>, vector<6x32xf32>
    %c181 = arith.constant 181 : index
    %c0_76 = arith.constant 0 : index
    %83 = tpu.strided_load %arg10[%c181, %c0_76] {strides = array<i32: 2, 1>} : memref<270x32xf32, #tpu.memory_space<vmem>>, vector<6x32xf32>
    %c182 = arith.constant 182 : index
    %c0_77 = arith.constant 0 : index
    %84 = tpu.strided_load %arg10[%c182, %c0_77] {strides = array<i32: 2, 1>} : memref<270x32xf32, #tpu.memory_space<vmem>>, vector<6x32xf32>
    %85 = arith.maximumf %81, %82 : vector<6x32xf32>
    %86 = arith.maximumf %83, %84 : vector<6x32xf32>
    %87 = arith.maximumf %85, %86 : vector<6x32xf32>
    %c58 = arith.constant 58 : index
    %c0_78 = arith.constant 0 : index
    %88 = vector.load %arg11[%c58, %c0_78] : memref<98x32xf32, #tpu.memory_space<vmem>>, vector<6x32xf32>
    tpu.vector_store %arg11[%c58, %c0_78], %87 {strides = array<i32>} : memref<98x32xf32, #tpu.memory_space<vmem>>, vector<6x32xf32>,
    %c196 = arith.constant 196 : index
    %c0_79 = arith.constant 0 : index
    %89 = tpu.strided_load %arg10[%c196, %c0_79] {strides = array<i32: 2, 1>} : memref<270x32xf32, #tpu.memory_space<vmem>>, vector<6x32xf32>
    %c197 = arith.constant 197 : index
    %c0_80 = arith.constant 0 : index
    %90 = tpu.strided_load %arg10[%c197, %c0_80] {strides = array<i32: 2, 1>} : memref<270x32xf32, #tpu.memory_space<vmem>>, vector<6x32xf32>
    %c211 = arith.constant 211 : index
    %c0_81 = arith.constant 0 : index
    %91 = tpu.strided_load %arg10[%c211, %c0_81] {strides = array<i32: 2, 1>} : memref<270x32xf32, #tpu.memory_space<vmem>>, vector<6x32xf32>
    %c212 = arith.constant 212 : index
    %c0_82 = arith.constant 0 : index
    %92 = tpu.strided_load %arg10[%c212, %c0_82] {strides = array<i32: 2, 1>} : memref<270x32xf32, #tpu.memory_space<vmem>>, vector<6x32xf32>
    %93 = arith.maximumf %89, %90 : vector<6x32xf32>
    %94 = arith.maximumf %91, %92 : vector<6x32xf32>
    %95 = arith.maximumf %93, %94 : vector<6x32xf32>
    %c66 = arith.constant 66 : index
    %c0_83 = arith.constant 0 : index
    %96 = vector.load %arg11[%c66, %c0_83] : memref<98x32xf32, #tpu.memory_space<vmem>>, vector<6x32xf32>
    tpu.vector_store %arg11[%c66, %c0_83], %95 {strides = array<i32>} : memref<98x32xf32, #tpu.memory_space<vmem>>, vector<6x32xf32>,
    %c226 = arith.constant 226 : index
    %c0_84 = arith.constant 0 : index
    %97 = tpu.strided_load %arg10[%c226, %c0_84] {strides = array<i32: 2, 1>} : memref<270x32xf32, #tpu.memory_space<vmem>>, vector<6x32xf32>
    %c227 = arith.constant 227 : index
    %c0_85 = arith.constant 0 : index
    %98 = tpu.strided_load %arg10[%c227, %c0_85] {strides = array<i32: 2, 1>} : memref<270x32xf32, #tpu.memory_space<vmem>>, vector<6x32xf32>
    %c241 = arith.constant 241 : index
    %c0_86 = arith.constant 0 : index
    %99 = tpu.strided_load %arg10[%c241, %c0_86] {strides = array<i32: 2, 1>} : memref<270x32xf32, #tpu.memory_space<vmem>>, vector<6x32xf32>
    %c242 = arith.constant 242 : index
    %c0_87 = arith.constant 0 : index
    %100 = tpu.strided_load %arg10[%c242, %c0_87] {strides = array<i32: 2, 1>} : memref<270x32xf32, #tpu.memory_space<vmem>>, vector<6x32xf32>
    %101 = arith.maximumf %97, %98 : vector<6x32xf32>
    %102 = arith.maximumf %99, %100 : vector<6x32xf32>
    %103 = arith.maximumf %101, %102 : vector<6x32xf32>
    %c74 = arith.constant 74 : index
    %c0_88 = arith.constant 0 : index
    %104 = vector.load %arg11[%c74, %c0_88] : memref<98x32xf32, #tpu.memory_space<vmem>>, vector<6x32xf32>
    tpu.vector_store %arg11[%c74, %c0_88], %103 {strides = array<i32>} : memref<98x32xf32, #tpu.memory_space<vmem>>, vector<6x32xf32>,
    %c0_89 = arith.constant 0 : index
    %c0_90 = arith.constant 0 : index
    %105 = vector.load %arg11[%c0_89, %c0_90] : memref<98x32xf32, #tpu.memory_space<vmem>>, vector<80x32xf32>
    %c0_91 = arith.constant 0 : index
    %c0_92 = arith.constant 0 : index
    %106 = vector.load %arg12[%c0_91, %c0_92] : memref<80x288xf32, #tpu.memory_space<vmem>>, vector<80x32xf32>
    tpu.vector_store %arg12[%c0_91, %c0_92], %105 {strides = array<i32>} : memref<80x288xf32, #tpu.memory_space<vmem>>, vector<80x32xf32>,
    %c1_93 = arith.constant 1 : index
    %c0_94 = arith.constant 0 : index
    %107 = vector.load %arg11[%c1_93, %c0_94] : memref<98x32xf32, #tpu.memory_space<vmem>>, vector<80x32xf32>
    %c0_95 = arith.constant 0 : index
    %c32_96 = arith.constant 32 : index
    %108 = vector.load %arg12[%c0_95, %c32_96] : memref<80x288xf32, #tpu.memory_space<vmem>>, vector<80x32xf32>
    tpu.vector_store %arg12[%c0_95, %c32_96], %107 {strides = array<i32>} : memref<80x288xf32, #tpu.memory_space<vmem>>, vector<80x32xf32>,
    %c2_97 = arith.constant 2 : index
    %c0_98 = arith.constant 0 : index
    %109 = vector.load %arg11[%c2_97, %c0_98] : memref<98x32xf32, #tpu.memory_space<vmem>>, vector<80x32xf32>
    %c0_99 = arith.constant 0 : index
    %c64_100 = arith.constant 64 : index
    %110 = vector.load %arg12[%c0_99, %c64_100] : memref<80x288xf32, #tpu.memory_space<vmem>>, vector<80x32xf32>
    tpu.vector_store %arg12[%c0_99, %c64_100], %109 {strides = array<i32>} : memref<80x288xf32, #tpu.memory_space<vmem>>, vector<80x32xf32>,
    %c8_101 = arith.constant 8 : index
    %c0_102 = arith.constant 0 : index
    %111 = vector.load %arg11[%c8_101, %c0_102] : memref<98x32xf32, #tpu.memory_space<vmem>>, vector<80x32xf32>
    %c0_103 = arith.constant 0 : index
    %c96 = arith.constant 96 : index
    %112 = vector.load %arg12[%c0_103, %c96] : memref<80x288xf32, #tpu.memory_space<vmem>>, vector<80x32xf32>
    tpu.vector_store %arg12[%c0_103, %c96], %111 {strides = array<i32>} : memref<80x288xf32, #tpu.memory_space<vmem>>, vector<80x32xf32>,
    %c9 = arith.constant 9 : index
    %c0_104 = arith.constant 0 : index
    %113 = vector.load %arg11[%c9, %c0_104] : memref<98x32xf32, #tpu.memory_space<vmem>>, vector<80x32xf32>
    %c0_105 = arith.constant 0 : index
    %c128 = arith.constant 128 : index
    %114 = vector.load %arg12[%c0_105, %c128] : memref<80x288xf32, #tpu.memory_space<vmem>>, vector<80x32xf32>
    tpu.vector_store %arg12[%c0_105, %c128], %113 {strides = array<i32>} : memref<80x288xf32, #tpu.memory_space<vmem>>, vector<80x32xf32>,
    %c10 = arith.constant 10 : index
    %c0_106 = arith.constant 0 : index
    %115 = vector.load %arg11[%c10, %c0_106] : memref<98x32xf32, #tpu.memory_space<vmem>>, vector<80x32xf32>
    %c0_107 = arith.constant 0 : index
    %c160 = arith.constant 160 : index
    %116 = vector.load %arg12[%c0_107, %c160] : memref<80x288xf32, #tpu.memory_space<vmem>>, vector<80x32xf32>
    tpu.vector_store %arg12[%c0_107, %c160], %115 {strides = array<i32>} : memref<80x288xf32, #tpu.memory_space<vmem>>, vector<80x32xf32>,
    %c16_108 = arith.constant 16 : index
    %c0_109 = arith.constant 0 : index
    %117 = vector.load %arg11[%c16_108, %c0_109] : memref<98x32xf32, #tpu.memory_space<vmem>>, vector<80x32xf32>
    %c0_110 = arith.constant 0 : index
    %c192 = arith.constant 192 : index
    %118 = vector.load %arg12[%c0_110, %c192] : memref<80x288xf32, #tpu.memory_space<vmem>>, vector<80x32xf32>
    tpu.vector_store %arg12[%c0_110, %c192], %117 {strides = array<i32>} : memref<80x288xf32, #tpu.memory_space<vmem>>, vector<80x32xf32>,
    %c17_111 = arith.constant 17 : index
    %c0_112 = arith.constant 0 : index
    %119 = vector.load %arg11[%c17_111, %c0_112] : memref<98x32xf32, #tpu.memory_space<vmem>>, vector<80x32xf32>
    %c0_113 = arith.constant 0 : index
    %c224 = arith.constant 224 : index
    %120 = vector.load %arg12[%c0_113, %c224] : memref<80x288xf32, #tpu.memory_space<vmem>>, vector<80x32xf32>
    tpu.vector_store %arg12[%c0_113, %c224], %119 {strides = array<i32>} : memref<80x288xf32, #tpu.memory_space<vmem>>, vector<80x32xf32>,
    %c18_114 = arith.constant 18 : index
    %c0_115 = arith.constant 0 : index
    %121 = vector.load %arg11[%c18_114, %c0_115] : memref<98x32xf32, #tpu.memory_space<vmem>>, vector<80x32xf32>
    %c0_116 = arith.constant 0 : index
    %c256 = arith.constant 256 : index
    %122 = vector.load %arg12[%c0_116, %c256] : memref<80x288xf32, #tpu.memory_space<vmem>>, vector<80x32xf32>
    tpu.vector_store %arg12[%c0_116, %c256], %121 {strides = array<i32>} : memref<80x288xf32, #tpu.memory_space<vmem>>, vector<80x32xf32>,
    %c0_117 = arith.constant 0 : index
    %c0_118 = arith.constant 0 : index
    %123 = vector.load %arg12[%c0_117, %c0_118] : memref<80x288xf32, #tpu.memory_space<vmem>>, vector<80x288xf32>
    %124 = arith.truncf %123 : vector<80x288xf32> to vector<80x288xbf16>
    %c0_119 = arith.constant 0 : index
    %c0_120 = arith.constant 0 : index
    %125 = vector.load %arg4[%c0_119, %c0_120] : memref<288x64xbf16, #tpu.memory_space<vmem>>, vector<288x64xbf16>
    %cst_121 = arith.constant dense<0.000000e+00> : vector<80x64xf32>
    %126 = tpu.matmul %124, %125, %cst_121 {dimension_numbers = #tpu.dot_dimension_numbers<[1], [0], [0], [1], [0, 0, 1, 1], [], []>} : vector<80x288xbf16>, vector<288x64xbf16>, vector<80x64xf32> -> vector<80x64xf32>
    %c0_122 = arith.constant 0 : index
    %c0_123 = arith.constant 0 : index
    %127 = vector.load %arg5[%c0_122, %c0_123] : memref<1x64xf32, #tpu.memory_space<vmem>>, vector<1x64xf32>
    %128 = vector.broadcast %127 : vector<1x64xf32> to vector<80x64xf32>
    %129 = arith.addf %126, %128 : vector<80x64xf32>
    %cst_124 = arith.constant 0.000000e+00 : f32
    %130 = vector.broadcast %cst_124 : f32 to vector<80x64xf32>
    %131 = arith.maximumf %129, %130 : vector<80x64xf32>
    %c0_125 = arith.constant 0 : index
    %c0_126 = arith.constant 0 : index
    %132 = vector.load %arg13[%c0_125, %c0_126] : memref<80x64xf32, #tpu.memory_space<vmem>>, vector<80x64xf32>
    tpu.vector_store %arg13[%c0_125, %c0_126], %131 {strides = array<i32>} : memref<80x64xf32, #tpu.memory_space<vmem>>, vector<80x64xf32>,
    %c9_127 = arith.constant 9 : index
    %c0_128 = arith.constant 0 : index
    %133 = tpu.strided_load %arg13[%c9_127, %c0_128] {strides = array<i32: 2, 1>} : memref<80x64xf32, #tpu.memory_space<vmem>>, vector<3x64xf32>
    %c10_129 = arith.constant 10 : index
    %c0_130 = arith.constant 0 : index
    %134 = tpu.strided_load %arg13[%c10_129, %c0_130] {strides = array<i32: 2, 1>} : memref<80x64xf32, #tpu.memory_space<vmem>>, vector<3x64xf32>
    %c17_131 = arith.constant 17 : index
    %c0_132 = arith.constant 0 : index
    %135 = tpu.strided_load %arg13[%c17_131, %c0_132] {strides = array<i32: 2, 1>} : memref<80x64xf32, #tpu.memory_space<vmem>>, vector<3x64xf32>
    %c18_133 = arith.constant 18 : index
    %c0_134 = arith.constant 0 : index
    %136 = tpu.strided_load %arg13[%c18_133, %c0_134] {strides = array<i32: 2, 1>} : memref<80x64xf32, #tpu.memory_space<vmem>>, vector<3x64xf32>
    %137 = arith.maximumf %133, %134 : vector<3x64xf32>
    %138 = arith.maximumf %135, %136 : vector<3x64xf32>
    %139 = arith.maximumf %137, %138 : vector<3x64xf32>
    %c12 = arith.constant 12 : index
    %c0_135 = arith.constant 0 : index
    %140 = vector.load %arg14[%c12, %c0_135] : memref<42x64xf32, #tpu.memory_space<vmem>>, vector<3x64xf32>
    tpu.vector_store %arg14[%c12, %c0_135], %139 {strides = array<i32>} : memref<42x64xf32, #tpu.memory_space<vmem>>, vector<3x64xf32>,
    %c25 = arith.constant 25 : index
    %c0_136 = arith.constant 0 : index
    %141 = tpu.strided_load %arg13[%c25, %c0_136] {strides = array<i32: 2, 1>} : memref<80x64xf32, #tpu.memory_space<vmem>>, vector<3x64xf32>
    %c26_137 = arith.constant 26 : index
    %c0_138 = arith.constant 0 : index
    %142 = tpu.strided_load %arg13[%c26_137, %c0_138] {strides = array<i32: 2, 1>} : memref<80x64xf32, #tpu.memory_space<vmem>>, vector<3x64xf32>
    %c33 = arith.constant 33 : index
    %c0_139 = arith.constant 0 : index
    %143 = tpu.strided_load %arg13[%c33, %c0_139] {strides = array<i32: 2, 1>} : memref<80x64xf32, #tpu.memory_space<vmem>>, vector<3x64xf32>
    %c34_140 = arith.constant 34 : index
    %c0_141 = arith.constant 0 : index
    %144 = tpu.strided_load %arg13[%c34_140, %c0_141] {strides = array<i32: 2, 1>} : memref<80x64xf32, #tpu.memory_space<vmem>>, vector<3x64xf32>
    %145 = arith.maximumf %141, %142 : vector<3x64xf32>
    %146 = arith.maximumf %143, %144 : vector<3x64xf32>
    %147 = arith.maximumf %145, %146 : vector<3x64xf32>
    %c17_142 = arith.constant 17 : index
    %c0_143 = arith.constant 0 : index
    %148 = vector.load %arg14[%c17_142, %c0_143] : memref<42x64xf32, #tpu.memory_space<vmem>>, vector<3x64xf32>
    tpu.vector_store %arg14[%c17_142, %c0_143], %147 {strides = array<i32>} : memref<42x64xf32, #tpu.memory_space<vmem>>, vector<3x64xf32>,
    %c41 = arith.constant 41 : index
    %c0_144 = arith.constant 0 : index
    %149 = tpu.strided_load %arg13[%c41, %c0_144] {strides = array<i32: 2, 1>} : memref<80x64xf32, #tpu.memory_space<vmem>>, vector<3x64xf32>
    %c42_145 = arith.constant 42 : index
    %c0_146 = arith.constant 0 : index
    %150 = tpu.strided_load %arg13[%c42_145, %c0_146] {strides = array<i32: 2, 1>} : memref<80x64xf32, #tpu.memory_space<vmem>>, vector<3x64xf32>
    %c49 = arith.constant 49 : index
    %c0_147 = arith.constant 0 : index
    %151 = tpu.strided_load %arg13[%c49, %c0_147] {strides = array<i32: 2, 1>} : memref<80x64xf32, #tpu.memory_space<vmem>>, vector<3x64xf32>
    %c50_148 = arith.constant 50 : index
    %c0_149 = arith.constant 0 : index
    %152 = tpu.strided_load %arg13[%c50_148, %c0_149] {strides = array<i32: 2, 1>} : memref<80x64xf32, #tpu.memory_space<vmem>>, vector<3x64xf32>
    %153 = arith.maximumf %149, %150 : vector<3x64xf32>
    %154 = arith.maximumf %151, %152 : vector<3x64xf32>
    %155 = arith.maximumf %153, %154 : vector<3x64xf32>
    %c22 = arith.constant 22 : index
    %c0_150 = arith.constant 0 : index
    %156 = vector.load %arg14[%c22, %c0_150] : memref<42x64xf32, #tpu.memory_space<vmem>>, vector<3x64xf32>
    tpu.vector_store %arg14[%c22, %c0_150], %155 {strides = array<i32>} : memref<42x64xf32, #tpu.memory_space<vmem>>, vector<3x64xf32>,
    %c57 = arith.constant 57 : index
    %c0_151 = arith.constant 0 : index
    %157 = tpu.strided_load %arg13[%c57, %c0_151] {strides = array<i32: 2, 1>} : memref<80x64xf32, #tpu.memory_space<vmem>>, vector<3x64xf32>
    %c58_152 = arith.constant 58 : index
    %c0_153 = arith.constant 0 : index
    %158 = tpu.strided_load %arg13[%c58_152, %c0_153] {strides = array<i32: 2, 1>} : memref<80x64xf32, #tpu.memory_space<vmem>>, vector<3x64xf32>
    %c65 = arith.constant 65 : index
    %c0_154 = arith.constant 0 : index
    %159 = tpu.strided_load %arg13[%c65, %c0_154] {strides = array<i32: 2, 1>} : memref<80x64xf32, #tpu.memory_space<vmem>>, vector<3x64xf32>
    %c66_155 = arith.constant 66 : index
    %c0_156 = arith.constant 0 : index
    %160 = tpu.strided_load %arg13[%c66_155, %c0_156] {strides = array<i32: 2, 1>} : memref<80x64xf32, #tpu.memory_space<vmem>>, vector<3x64xf32>
    %161 = arith.maximumf %157, %158 : vector<3x64xf32>
    %162 = arith.maximumf %159, %160 : vector<3x64xf32>
    %163 = arith.maximumf %161, %162 : vector<3x64xf32>
    %c27 = arith.constant 27 : index
    %c0_157 = arith.constant 0 : index
    %164 = vector.load %arg14[%c27, %c0_157] : memref<42x64xf32, #tpu.memory_space<vmem>>, vector<3x64xf32>
    tpu.vector_store %arg14[%c27, %c0_157], %163 {strides = array<i32>} : memref<42x64xf32, #tpu.memory_space<vmem>>, vector<3x64xf32>,
    %c0_158 = arith.constant 0 : index
    %c0_159 = arith.constant 0 : index
    %165 = vector.load %arg14[%c0_158, %c0_159] : memref<42x64xf32, #tpu.memory_space<vmem>>, vector<30x64xf32>
    %c0_160 = arith.constant 0 : index
    %c0_161 = arith.constant 0 : index
    %166 = vector.load %arg15[%c0_160, %c0_161] : memref<30x576xf32, #tpu.memory_space<vmem>>, vector<30x64xf32>
    tpu.vector_store %arg15[%c0_160, %c0_161], %165 {strides = array<i32>} : memref<30x576xf32, #tpu.memory_space<vmem>>, vector<30x64xf32>,
    %c1_162 = arith.constant 1 : index
    %c0_163 = arith.constant 0 : index
    %167 = vector.load %arg14[%c1_162, %c0_163] : memref<42x64xf32, #tpu.memory_space<vmem>>, vector<30x64xf32>
    %c0_164 = arith.constant 0 : index
    %c64_165 = arith.constant 64 : index
    %168 = vector.load %arg15[%c0_164, %c64_165] : memref<30x576xf32, #tpu.memory_space<vmem>>, vector<30x64xf32>
    tpu.vector_store %arg15[%c0_164, %c64_165], %167 {strides = array<i32>} : memref<30x576xf32, #tpu.memory_space<vmem>>, vector<30x64xf32>,
    %c2_166 = arith.constant 2 : index
    %c0_167 = arith.constant 0 : index
    %169 = vector.load %arg14[%c2_166, %c0_167] : memref<42x64xf32, #tpu.memory_space<vmem>>, vector<30x64xf32>
    %c0_168 = arith.constant 0 : index
    %c128_169 = arith.constant 128 : index
    %170 = vector.load %arg15[%c0_168, %c128_169] : memref<30x576xf32, #tpu.memory_space<vmem>>, vector<30x64xf32>
    tpu.vector_store %arg15[%c0_168, %c128_169], %169 {strides = array<i32>} : memref<30x576xf32, #tpu.memory_space<vmem>>, vector<30x64xf32>,
    %c5 = arith.constant 5 : index
    %c0_170 = arith.constant 0 : index
    %171 = vector.load %arg14[%c5, %c0_170] : memref<42x64xf32, #tpu.memory_space<vmem>>, vector<30x64xf32>
    %c0_171 = arith.constant 0 : index
    %c192_172 = arith.constant 192 : index
    %172 = vector.load %arg15[%c0_171, %c192_172] : memref<30x576xf32, #tpu.memory_space<vmem>>, vector<30x64xf32>
    tpu.vector_store %arg15[%c0_171, %c192_172], %171 {strides = array<i32>} : memref<30x576xf32, #tpu.memory_space<vmem>>, vector<30x64xf32>,
    %c6 = arith.constant 6 : index
    %c0_173 = arith.constant 0 : index
    %173 = vector.load %arg14[%c6, %c0_173] : memref<42x64xf32, #tpu.memory_space<vmem>>, vector<30x64xf32>
    %c0_174 = arith.constant 0 : index
    %c256_175 = arith.constant 256 : index
    %174 = vector.load %arg15[%c0_174, %c256_175] : memref<30x576xf32, #tpu.memory_space<vmem>>, vector<30x64xf32>
    tpu.vector_store %arg15[%c0_174, %c256_175], %173 {strides = array<i32>} : memref<30x576xf32, #tpu.memory_space<vmem>>, vector<30x64xf32>,
    %c7 = arith.constant 7 : index
    %c0_176 = arith.constant 0 : index
    %175 = vector.load %arg14[%c7, %c0_176] : memref<42x64xf32, #tpu.memory_space<vmem>>, vector<30x64xf32>
    %c0_177 = arith.constant 0 : index
    %c320 = arith.constant 320 : index
    %176 = vector.load %arg15[%c0_177, %c320] : memref<30x576xf32, #tpu.memory_space<vmem>>, vector<30x64xf32>
    tpu.vector_store %arg15[%c0_177, %c320], %175 {strides = array<i32>} : memref<30x576xf32, #tpu.memory_space<vmem>>, vector<30x64xf32>,
    %c10_178 = arith.constant 10 : index
    %c0_179 = arith.constant 0 : index
    %177 = vector.load %arg14[%c10_178, %c0_179] : memref<42x64xf32, #tpu.memory_space<vmem>>, vector<30x64xf32>
    %c0_180 = arith.constant 0 : index
    %c384 = arith.constant 384 : index
    %178 = vector.load %arg15[%c0_180, %c384] : memref<30x576xf32, #tpu.memory_space<vmem>>, vector<30x64xf32>
    tpu.vector_store %arg15[%c0_180, %c384], %177 {strides = array<i32>} : memref<30x576xf32, #tpu.memory_space<vmem>>, vector<30x64xf32>,
    %c11 = arith.constant 11 : index
    %c0_181 = arith.constant 0 : index
    %179 = vector.load %arg14[%c11, %c0_181] : memref<42x64xf32, #tpu.memory_space<vmem>>, vector<30x64xf32>
    %c0_182 = arith.constant 0 : index
    %c448 = arith.constant 448 : index
    %180 = vector.load %arg15[%c0_182, %c448] : memref<30x576xf32, #tpu.memory_space<vmem>>, vector<30x64xf32>
    tpu.vector_store %arg15[%c0_182, %c448], %179 {strides = array<i32>} : memref<30x576xf32, #tpu.memory_space<vmem>>, vector<30x64xf32>,
    %c12_183 = arith.constant 12 : index
    %c0_184 = arith.constant 0 : index
    %181 = vector.load %arg14[%c12_183, %c0_184] : memref<42x64xf32, #tpu.memory_space<vmem>>, vector<30x64xf32>
    %c0_185 = arith.constant 0 : index
    %c512 = arith.constant 512 : index
    %182 = vector.load %arg15[%c0_185, %c512] : memref<30x576xf32, #tpu.memory_space<vmem>>, vector<30x64xf32>
    tpu.vector_store %arg15[%c0_185, %c512], %181 {strides = array<i32>} : memref<30x576xf32, #tpu.memory_space<vmem>>, vector<30x64xf32>,
    %c0_186 = arith.constant 0 : index
    %c0_187 = arith.constant 0 : index
    %183 = vector.load %arg15[%c0_186, %c0_187] : memref<30x576xf32, #tpu.memory_space<vmem>>, vector<30x576xf32>
    %184 = arith.truncf %183 : vector<30x576xf32> to vector<30x576xbf16>
    %c0_188 = arith.constant 0 : index
    %c0_189 = arith.constant 0 : index
    %185 = vector.load %arg6[%c0_188, %c0_189] : memref<576x128xbf16, #tpu.memory_space<vmem>>, vector<576x128xbf16>
    %cst_190 = arith.constant dense<0.000000e+00> : vector<30x128xf32>
    %186 = tpu.matmul %184, %185, %cst_190 {dimension_numbers = #tpu.dot_dimension_numbers<[1], [0], [0], [1], [0, 0, 1, 1], [], []>} : vector<30x576xbf16>, vector<576x128xbf16>, vector<30x128xf32> -> vector<30x128xf32>
    %c0_191 = arith.constant 0 : index
    %c0_192 = arith.constant 0 : index
    %187 = vector.load %arg7[%c0_191, %c0_192] : memref<1x128xf32, #tpu.memory_space<vmem>>, vector<1x128xf32>
    %188 = vector.broadcast %187 : vector<1x128xf32> to vector<30x128xf32>
    %189 = arith.addf %186, %188 : vector<30x128xf32>
    %cst_193 = arith.constant 0.000000e+00 : f32
    %190 = vector.broadcast %cst_193 : f32 to vector<30x128xf32>
    %191 = arith.maximumf %189, %190 : vector<30x128xf32>
    %c0_194 = arith.constant 0 : index
    %c0_195 = arith.constant 0 : index
    %192 = vector.load %arg16[%c0_194, %c0_195] : memref<30x128xf32, #tpu.memory_space<vmem>>, vector<30x128xf32>
    tpu.vector_store %arg16[%c0_194, %c0_195], %191 {strides = array<i32>} : memref<30x128xf32, #tpu.memory_space<vmem>>, vector<30x128xf32>,
    %c6_196 = arith.constant 6 : index
    %c0_197 = arith.constant 0 : index
    %193 = tpu.strided_load %arg16[%c6_196, %c0_197] {strides = array<i32: 2, 1>} : memref<30x128xf32, #tpu.memory_space<vmem>>, vector<1x128xf32>
    %c7_198 = arith.constant 7 : index
    %c0_199 = arith.constant 0 : index
    %194 = tpu.strided_load %arg16[%c7_198, %c0_199] {strides = array<i32: 2, 1>} : memref<30x128xf32, #tpu.memory_space<vmem>>, vector<1x128xf32>
    %c11_200 = arith.constant 11 : index
    %c0_201 = arith.constant 0 : index
    %195 = tpu.strided_load %arg16[%c11_200, %c0_201] {strides = array<i32: 2, 1>} : memref<30x128xf32, #tpu.memory_space<vmem>>, vector<1x128xf32>
    %c12_202 = arith.constant 12 : index
    %c0_203 = arith.constant 0 : index
    %196 = tpu.strided_load %arg16[%c12_202, %c0_203] {strides = array<i32: 2, 1>} : memref<30x128xf32, #tpu.memory_space<vmem>>, vector<1x128xf32>
    %197 = arith.maximumf %193, %194 : vector<1x128xf32>
    %198 = arith.maximumf %195, %196 : vector<1x128xf32>
    %199 = arith.maximumf %197, %198 : vector<1x128xf32>
    %c0_204 = arith.constant 0 : index
    %c0_205 = arith.constant 0 : index
    %c0_206 = arith.constant 0 : index
    %200 = vector.load %arg8[%c0_204, %c0_205, %c0_206] : memref<1x2x128xf32, #tpu.memory_space<vmem>>, vector<1x1x128xf32>
    %201 = vector.shape_cast %200 : vector<1x1x128xf32> to vector<1x128xf32>
    %202 = vector.shape_cast %199 : vector<1x128xf32> to vector<1x1x128xf32>
    tpu.vector_store %arg8[%c0_204, %c0_205, %c0_206], %202 {strides = array<i32>} : memref<1x2x128xf32, #tpu.memory_space<vmem>>, vector<1x1x128xf32>,
    %c16_207 = arith.constant 16 : index
    %c0_208 = arith.constant 0 : index
    %203 = tpu.strided_load %arg16[%c16_207, %c0_208] {strides = array<i32: 2, 1>} : memref<30x128xf32, #tpu.memory_space<vmem>>, vector<1x128xf32>
    %c17_209 = arith.constant 17 : index
    %c0_210 = arith.constant 0 : index
    %204 = tpu.strided_load %arg16[%c17_209, %c0_210] {strides = array<i32: 2, 1>} : memref<30x128xf32, #tpu.memory_space<vmem>>, vector<1x128xf32>
    %c21 = arith.constant 21 : index
    %c0_211 = arith.constant 0 : index
    %205 = tpu.strided_load %arg16[%c21, %c0_211] {strides = array<i32: 2, 1>} : memref<30x128xf32, #tpu.memory_space<vmem>>, vector<1x128xf32>
    %c22_212 = arith.constant 22 : index
    %c0_213 = arith.constant 0 : index
    %206 = tpu.strided_load %arg16[%c22_212, %c0_213] {strides = array<i32: 2, 1>} : memref<30x128xf32, #tpu.memory_space<vmem>>, vector<1x128xf32>
    %207 = arith.maximumf %203, %204 : vector<1x128xf32>
    %208 = arith.maximumf %205, %206 : vector<1x128xf32>
    %209 = arith.maximumf %207, %208 : vector<1x128xf32>
    %c0_214 = arith.constant 0 : index
    %c1_215 = arith.constant 1 : index
    %c0_216 = arith.constant 0 : index
    %210 = vector.load %arg8[%c0_214, %c1_215, %c0_216] : memref<1x2x128xf32, #tpu.memory_space<vmem>>, vector<1x1x128xf32>
    %211 = vector.shape_cast %210 : vector<1x1x128xf32> to vector<1x128xf32>
    %212 = vector.shape_cast %209 : vector<1x128xf32> to vector<1x1x128xf32>
    tpu.vector_store %arg8[%c0_214, %c1_215, %c0_216], %212 {strides = array<i32>} : memref<1x2x128xf32, #tpu.memory_space<vmem>>, vector<1x1x128xf32>,
    return
  }
  func.func @transform_0(%arg0: i32) -> (i32, i32, i32) {
    %c0_i32 = arith.constant 0 : i32
    %c0_i32_0 = arith.constant 0 : i32
    %c0_i32_1 = arith.constant 0 : i32
    return %arg0, %c0_i32, %c0_i32_0 : i32, i32, i32
  }
  func.func @transform_1(%arg0: i32) -> (i32, i32) {
    %c0_i32 = arith.constant 0 : i32
    %c0_i32_0 = arith.constant 0 : i32
    %c0_i32_1 = arith.constant 0 : i32
    return %c0_i32, %c0_i32_0 : i32, i32
  }
  func.func @transform_2(%arg0: i32) -> (i32, i32) {
    %c0_i32 = arith.constant 0 : i32
    %c0_i32_0 = arith.constant 0 : i32
    %c0_i32_1 = arith.constant 0 : i32
    return %c0_i32, %c0_i32_0 : i32, i32
  }
  func.func @transform_3(%arg0: i32) -> (i32, i32) {
    %c0_i32 = arith.constant 0 : i32
    %c0_i32_0 = arith.constant 0 : i32
    %c0_i32_1 = arith.constant 0 : i32
    return %c0_i32, %c0_i32_0 : i32, i32
  }
  func.func @transform_4(%arg0: i32) -> (i32, i32) {
    %c0_i32 = arith.constant 0 : i32
    %c0_i32_0 = arith.constant 0 : i32
    %c0_i32_1 = arith.constant 0 : i32
    return %c0_i32, %c0_i32_0 : i32, i32
  }
  func.func @transform_5(%arg0: i32) -> (i32, i32) {
    %c0_i32 = arith.constant 0 : i32
    %c0_i32_0 = arith.constant 0 : i32
    %c0_i32_1 = arith.constant 0 : i32
    return %c0_i32, %c0_i32_0 : i32, i32
  }
  func.func @transform_6(%arg0: i32) -> (i32, i32) {
    %c0_i32 = arith.constant 0 : i32
    %c0_i32_0 = arith.constant 0 : i32
    %c0_i32_1 = arith.constant 0 : i32
    return %c0_i32, %c0_i32_0 : i32, i32
  }
  func.func @transform_7(%arg0: i32) -> (i32, i32, i32) {
    %c0_i32 = arith.constant 0 : i32
    %c0_i32_0 = arith.constant 0 : i32
    %c0_i32_1 = arith.constant 0 : i32
    return %arg0, %c0_i32, %c0_i32_0 : i32, i32, i32
  }
}

module attributes {stable_mosaic.version = 11 : i64} {
  func.func @mlp_kernel(%arg0: memref<8x256xf32, #tpu.memory_space<vmem>>, %arg1: memref<256x128xbf16, #tpu.memory_space<vmem>>, %arg2: memref<1x128xf32, #tpu.memory_space<vmem>>, %arg3: memref<128x2xbf16, #tpu.memory_space<vmem>>, %arg4: memref<1x2xf32, #tpu.memory_space<vmem>>, %arg5: memref<8x2xf32, #tpu.memory_space<vmem>>) attributes {dimension_semantics = [], scalar_prefetch = 0 : i64, scratch_operands = 0 : i64, tpu.core_type = #tpu.core_type<tc>} {
    %c0 = arith.constant 0 : index
    %c0_0 = arith.constant 0 : index
    %0 = vector.load %arg0[%c0, %c0_0] : memref<8x256xf32, #tpu.memory_space<vmem>>, vector<8x256xf32>
    %1 = arith.truncf %0 : vector<8x256xf32> to vector<8x256xbf16>
    %c0_1 = arith.constant 0 : index
    %c0_2 = arith.constant 0 : index
    %2 = vector.load %arg1[%c0_1, %c0_2] : memref<256x128xbf16, #tpu.memory_space<vmem>>, vector<256x128xbf16>
    %cst = arith.constant dense<0.000000e+00> : vector<8x128xf32>
    %3 = tpu.matmul %1, %2, %cst {dimension_numbers = #tpu.dot_dimension_numbers<[1], [0], [0], [1], [0, 0, 1, 1], [], []>} : vector<8x256xbf16>, vector<256x128xbf16>, vector<8x128xf32> -> vector<8x128xf32>
    %c0_3 = arith.constant 0 : index
    %c0_4 = arith.constant 0 : index
    %4 = vector.load %arg2[%c0_3, %c0_4] : memref<1x128xf32, #tpu.memory_space<vmem>>, vector<1x128xf32>
    %5 = vector.broadcast %4 : vector<1x128xf32> to vector<8x128xf32>
    %6 = arith.addf %3, %5 : vector<8x128xf32>
    %cst_5 = arith.constant 0.000000e+00 : f32
    %7 = vector.broadcast %cst_5 : f32 to vector<8x128xf32>
    %8 = arith.maximumf %6, %7 : vector<8x128xf32>
    %9 = arith.truncf %8 : vector<8x128xf32> to vector<8x128xbf16>
    %c0_6 = arith.constant 0 : index
    %c0_7 = arith.constant 0 : index
    %10 = vector.load %arg3[%c0_6, %c0_7] : memref<128x2xbf16, #tpu.memory_space<vmem>>, vector<128x2xbf16>
    %cst_8 = arith.constant dense<0.000000e+00> : vector<8x2xf32>
    %11 = tpu.matmul %9, %10, %cst_8 {dimension_numbers = #tpu.dot_dimension_numbers<[1], [0], [0], [1], [0, 0, 1, 1], [], []>} : vector<8x128xbf16>, vector<128x2xbf16>, vector<8x2xf32> -> vector<8x2xf32>
    %c0_9 = arith.constant 0 : index
    %c0_10 = arith.constant 0 : index
    %12 = vector.load %arg4[%c0_9, %c0_10] : memref<1x2xf32, #tpu.memory_space<vmem>>, vector<1x2xf32>
    %13 = vector.broadcast %12 : vector<1x2xf32> to vector<8x2xf32>
    %14 = arith.addf %11, %13 : vector<8x2xf32>
    %c0_11 = arith.constant 0 : index
    %c0_12 = arith.constant 0 : index
    %15 = vector.load %arg5[%c0_11, %c0_12] : memref<8x2xf32, #tpu.memory_space<vmem>>, vector<8x2xf32>
    tpu.vector_store %arg5[%c0_11, %c0_12], %14 {strides = array<i32>} : memref<8x2xf32, #tpu.memory_space<vmem>>, vector<8x2xf32>,
    return
  }
}

</mosaic_0001>

<bundles_post_ra>
// kernel: emotion_classifier_forward.3
= control target key start
LH: loop header
LB: loop body
LE: loop exit
PB: predicated region body
PF: predicated region fallthrough
CT: control target
= control target key end

     0   :  { %v422_v1 = vmov 0.0   ;;  %vm423_vm0 = vmmov 0   ;;  %vm313_vm1 = vcmask 15360   ;;  %s550_s1 = inlined_call_operand.vmem [shape: bf16[256,128], index: 1, kind: input, shape index: {}]   ;;  %s551_s0 = inlined_call_operand.vmem [shape: f32[8,256], index: 0, kind: input, shape index: {}]   ;;  %s552_s3 = inlined_call_operand.vmem [shape: bf16[128,2], index: 3, kind: input, shape index: {}]   ;;  %s553_s2 = inlined_call_operand.vmem [shape: f32[1,128], index: 2, kind: input, shape index: {}]   ;;  %s554_s4 = inlined_call_operand.vmem [shape: f32[1,2], index: 4, kind: input, shape index: {}]   ;;  %s555_s5 = inlined_call_operand.vmem [shape: f32[8,2], index: 5, kind: output, shape index: {}]  }
   0x1   :  { %v398_v0 = vld [vmem:[%s550_s1 + $0x40] sm:$0xff]   ;;  %376 = vmatprep.subr.bf16.mxu1 %v422_v1  ;;  %v400_v3 = vld [vmem:[%s550_s1 + $0x48] sm:$0xff]   ;;  %v402_v5 = vld [vmem:[%s550_s1 + $0x50] sm:$0xff]   ;;  %392 = vmatprep.mubr.msk.bf16.mxu1 %vm423_vm0, %v422_v1 }
   0x2   :  { %v399_v2 = vld [vmem:[%s550_s1] sm:$0xff]   ;;  %345 = vmatprep.subr.bf16.mxu0 %v398_v0  ;;  %v401_v4 = vld [vmem:[%s550_s1 + $0x8] sm:$0xff]   ;;  %v403_v6 = vld [vmem:[%s550_s1 + $0x10] sm:$0xff]  }
   0x3   :  { %346 = vmatpush3.bf16.msra.mxu0 %v399_v2  ;;  %v404_v7 = vld [vmem:[%s550_s1 + $0x58] sm:$0xff]   ;;  %v406_v9 = vld [vmem:[%s550_s1 + $0x60] sm:$0xff]   ;;  %v408_v11 = vld [vmem:[%s550_s1 + $0x68] sm:$0xff]  }
   0x4   :  { %347 = vmatprep.subr.bf16.mxu0 %v400_v3  ;;  %v405_v8 = vld [vmem:[%s550_s1 + $0x18] sm:$0xff]   ;;  %v407_v10 = vld [vmem:[%s550_s1 + $0x20] sm:$0xff]   ;;  %v22_v12 = vld [vmem:[%s551_s0 + $0x8] sm:$0xff] }
   0x5   :  { %v24_v13 = vpack.c.bf16 %v22_v12, %v22_v12  ;;  %v414_v14 = vld [vmem:[%s552_s3] sm:$0xff]   ;;  %v409_v15 = vld [vmem:[%s550_s1 + $0x28] sm:$0xff]   ;;  %v410_v16 = vld [vmem:[%s550_s1 + $0x70] sm:$0xff]  }
   0x6   :  { %377 = vmatpush3.bf16.msra.mxu1 %v414_v14  ;;  %v415_v17 = vld [vmem:[%s552_s3 + $0x8] sm:$0xff]   ;;  %v411_v18 = vld [vmem:[%s550_s1 + $0x30] sm:$0xff]   ;;  %v412_v19 = vld [vmem:[%s550_s1 + $0x78] sm:$0xff]  }
   0x7   :  { %348 = vmatpush3.bf16.msra.mxu0 %v401_v4  ;;  %192 = vmatprep.mubr.bf16.mxu0 %v24_v13  ;;  %v416_v20 = vld [vmem:[%s552_s3 + $0x10] sm:$0xff]   ;;  %v413_v21 = vld [vmem:[%s550_s1 + $0x38] sm:$0xff]   ;;  %v21_v22 = vld [vmem:[%s551_s0] sm:$0xff] }
   0x8   :  { %349 = vmatprep.subr.bf16.mxu0 %v402_v5  ;;  %378 = vmatprep.subr.bf16.mxu1 %v422_v1  ;;  %v417_v23 = vld [vmem:[%s552_s3 + $0x18] sm:$0xff]   ;;  %v23_v24 = vpack.c.bf16 %v21_v22, %v21_v22  ;;  %v418_v25 = vld [vmem:[%s552_s3 + $0x20] sm:$0xff]   ;;  %v419_v26 = vld [vmem:[%s552_s3 + $0x28] sm:$0xff]  }
   0x9   :  { %v420_v27 = vld [vmem:[%s552_s3 + $0x30] sm:$0xff]   ;;  %v421_v28 = vld [vmem:[%s552_s3 + $0x38] sm:$0xff]   ;;  %v319_v30 = vld [vmem:[%s553_s2] ss:$0 sm:$0xff] }
   0xa   :  { %379 = vmatpush3.bf16.msra.mxu1 %v415_v17  ;;  %v336_v38 = vld [vmem:[%s554_s4] ss:$0 sm:$0xff] }
   0xb   :  { %350 = vmatpush3.bf16.msra.mxu0 %v403_v6  ;;  %380 = vmatprep.subr.bf16.mxu1 %v422_v1 }
   0xc   :  { %351 = vmatprep.subr.bf16.mxu0 %v404_v7 }
   0xe   :  { %381 = vmatpush3.bf16.msra.mxu1 %v416_v20 }
   0xf   :  { %352 = vmatpush3.bf16.msra.mxu0 %v405_v8  ;;  %382 = vmatprep.subr.bf16.mxu1 %v422_v1 }
  0x10   :  { %353 = vmatprep.subr.bf16.mxu0 %v406_v9 }
  0x12   :  { %383 = vmatpush3.bf16.msra.mxu1 %v417_v23 }
  0x13   :  { %354 = vmatpush3.bf16.msra.mxu0 %v407_v10  ;;  %384 = vmatprep.subr.bf16.mxu1 %v422_v1 }
  0x14   :  { %355 = vmatprep.subr.bf16.mxu0 %v408_v11 }
  0x16   :  { %385 = vmatpush3.bf16.msra.mxu1 %v418_v25 }
  0x17   :  { %356 = vmatpush3.bf16.msra.mxu0 %v409_v15  ;;  %386 = vmatprep.subr.bf16.mxu1 %v422_v1 }
  0x18   :  { %357 = vmatprep.subr.bf16.mxu0 %v410_v16 }
  0x1a   :  { %387 = vmatpush3.bf16.msra.mxu1 %v419_v26 }
  0x1b   :  { %358 = vmatpush3.bf16.msra.mxu0 %v411_v18  ;;  %388 = vmatprep.subr.bf16.mxu1 %v422_v1 }
  0x1c   :  { %359 = vmatprep.subr.bf16.mxu0 %v412_v19 }
  0x1e   :  { %389 = vmatpush3.bf16.msra.mxu1 %v420_v27 }
  0x1f   :  { %360 = vmatpush3.bf16.msra.mxu0 %v413_v21  ;;  %390 = vmatprep.subr.bf16.mxu1 %v422_v1 }
  0x22   :  { %193 = vmatmul.mubr.bf16.vlgmr.msra.gmra.mrb[0].mxu0 %v23_v24  ;;  %391 = vmatpush3.bf16.msra.mxu1 %v421_v28 }
  0xf5   :  { %v361_v29 = vpop.f32.mrb[0].mxu0 }
  0xf6   :  { %v362_v31 = vpop.f32.mrb[1].mxu0 }
  0xf7   :  { %v363_v32 = vadd.f32 %v362_v31, %v361_v29  ;;  %v364_v33 = vpop.f32.mrb[2].mxu0 }
  0xf8   :  { %v365_v34 = vpop.f32.mrb[3].mxu0 }
  0xf9   :  { %v195_v35 = vadd.f32 %v363_v32, %v319_v30 }
  0xfb   :  { %v200_v36 = vmax.f32 %v195_v35, 0.0 }
  0xfd   :  { %v201_v37 = vpack.c.bf16 %v200_v36, %v200_v36 }
  0xff   :  { %393 = vmatmul.mubr.bf16.vlgmr.msra.gmra.mrb[0].mxu1 %v201_v37 }
 0x1d2   :  { %v307_v39 = vpop.f32.mrb[0].mxu1 }
 0x1d3   :  { %v308_v40 = vadd.f32 %v336_v38, %v307_v39  ;;  %v394_v41 = vpop.f32.mrb[1].mxu1 }
 0x1d4   :  { %v310_v42 = vpop.f32.mrb[2].mxu1 }
 0x1d5   :  { %314 = vst.msk [vmem:[%s555_s5] sm:$0xff] %vm313_vm1, %v308_v40  ;;  %v395_v43 = vpop.f32.mrb[3].mxu1 }

// kernel: emotion_classifier_forward.2
= control target key start
LH: loop header
LB: loop body
LE: loop exit
PB: predicated region body
PF: predicated region fallthrough
CT: control target
= control target key end

     0   :  { %s4540_s24 = smov 0   ;;  %s6186_s0 = inlined_call_operand.vmem [shape: f32[2,302,8], index: 0, kind: input, shape index: {}]   ;;  %s6187_s1 = inlined_call_operand.vmem [shape: bf16[72,32], index: 1, kind: input, shape index: {}]   ;;  %s6188_s2 = inlined_call_operand.vmem [shape: f32[1,32], index: 2, kind: input, shape index: {}]   ;;  %s6189_s3 = inlined_call_operand.vmem [shape: bf16[288,64], index: 3, kind: input, shape index: {}]   ;;  %s6190_s4 = inlined_call_operand.vmem [shape: f32[1,64], index: 4, kind: input, shape index: {}]   ;;  %s6191_s5 = inlined_call_operand.vmem [shape: bf16[576,128], index: 5, kind: input, shape index: {}]   ;;  %s6192_s6 = inlined_call_operand.vmem [shape: f32[1,128], index: 6, kind: input, shape index: {}]   ;;  %s6193_s7 = inlined_call_operand.vmem [shape: f32[2,2,128], index: 7, kind: output, shape index: {}]  }
   0x1 LB: > { %s4054_s25 = sadd.s32 4294967295, %s4487_s24   ;;  %p4058_p0 = scmp.ge.s32.totalorder %s4487_s24, 1  ;;  %s4487_s24 = sphi %s4540_s24, %s17_s24  }
   0x2   : > { %p237_p1 = scmp.lt.s32.totalorder %s4487_s24, 3 }
   0x4   : > { %p238_p2 = pnand %p4058_p0, %p237_p1 }
   0x5   : > { %p268_p3 = scmp.lt.s32.totalorder (!%p238_p2), %s4054_s25, 1  ;;  %s4489_s30 = smov (!%p238_p2), 16   ;;  %vm335_vm0 = vcmask (!%p238_p2), 64512   ;;  %v4491_v10 = vmov (!%p238_p2), 0.0   ;;  %v4420_v23 = vld [vmem:[%s6187_s1] sm:$0xff] (!%p238_p2)   ;;  %v4421_v25 = vld [vmem:[%s6187_s1 + $0x8] sm:$0xff] (!%p238_p2)  }
   0x6   : > { %241 = sbr.rel (%p238_p2) target bundleno = 1713 (0x6b1), region = 48  ;;  %s4490_s8 = smov (!%p238_p2), 8   ;;  %4286 = vmatprep.subr.bf16.mxu0 (!%p238_p2), %v4491_v10  ;;  %v4422_v27 = vld [vmem:[%s6187_s1 + $0x10] sm:$0xff] (!%p238_p2)   ;;  %v4423_v28 = vld [vmem:[%s6187_s1 + $0x18] sm:$0xff] (!%p238_p2)   ;;  %vm4497_vm1 = vmmov (!%p238_p2), 0   ;;  %vm2165_vm2 = vcmask (!%p238_p2), 1043456  }
   0x7   : > { %s4492_s9 = smov (!%p238_p2), 24   ;;  %s4493_s10 = smov (!%p238_p2), 32   ;;  %4287 = vmatpush3.bf16.msra.mxu0 (!%p238_p2), %v4420_v23  ;;  %4296 = vmatprep.mubr.msk.bf16.mxu0 (!%p238_p2), %vm4497_vm1, %v4491_v10  ;;  %v4424_v29 = vld [vmem:[%s6187_s1 + $0x20] ss:$0 sps:$4 sm:$0xff] (!%p238_p2)   ;;  %vm541_vm3 = vcmask (!%p238_p2), 130112   ;;  %vm747_vm4 = vcmask (!%p238_p2), 195712  }
   0x8   : > { %s4494_s11 = smov (!%p238_p2), 40   ;;  %s4495_s16 = smov (!%p238_p2), 48   ;;  %4288 = vmatprep.subr.bf16.mxu0 (!%p238_p2), %v4491_v10  ;;  %v2167_v34 = vsel (!%p238_p2), %vm2165_vm2, %v4424_v29, 0  ;;  %vm953_vm5 = vcmask (!%p238_p2), 261312   ;;  %vm1159_vm6 = vcmask (!%p238_p2), 326912   ;;  %vm1365_vm7 = vcmask (!%p238_p2), 392512  }
   0x9   : > { %s4496_s19 = smov (!%p238_p2), 56   ;;  %vm1571_vm8 = vcmask (!%p238_p2), 458112   ;;  %vm1777_vm9 = vcmask (!%p238_p2), 523712   ;;  %vm1983_vm10 = vcmask (!%p238_p2), 589312   ;;  %vm6194_vm11 = vcmask (!%p238_p2), 588800   ;;  %s4499_s22 = smov (!%p238_p2), 96  }
   0xa   : > { %vm278_vm12 = vcmask (!%p238_p2), 261120   ;;  %vm2405_vm13 = vcmask (!%p238_p2), 259072   ;;  %vm2573_vm14 = vcmask (!%p238_p2), 523520   ;;  %vm2634_vm15 = vcmask (!%p238_p2), 785920  }
   0xb   : > { %4289 = vmatpush3.bf16.msra.mxu0 (!%p238_p2), %v4421_v25  ;;  %279 = vst.msk [vmem:[#allocation4] sm:$0xff] (!%p238_p2), %vm278_vm12, %v4491_v10  ;;  %280 = vst.msk [vmem:[#allocation4 + $0x8] sm:$0xff] (!%p238_p2), %vm278_vm12, %v4491_v10  ;;  %vm2695_vm2 = vcmask (!%p238_p2), 1048320  }
   0xc   : > { %4290 = vmatprep.subr.bf16.mxu0 (!%p238_p2), %v4491_v10  ;;  %281 = vst.msk [vmem:[#allocation4 + $0x10] sm:$0xff] (!%p238_p2), %vm278_vm12, %v4491_v10  ;;  %282 = vst.msk [vmem:[#allocation4 + $0x18] sm:$0xff] (!%p238_p2), %vm278_vm12, %v4491_v10 }
   0xd   : > { %s6197_s25 = smov (!%p268_p3, %s4054_s25), 1  ;;  %283 = vst.msk [vmem:[#allocation4 + $0x20] sm:$0xff] %vm278_vm12, %v4491_v10  ;;  %284 = vst.msk [vmem:[#allocation4 + $0x28] sm:$0xff] %vm278_vm12, %v4491_v10 }
   0xe   : > { %s4400_s26 = smul.u32 304, %s6197_s25  ;;  %285 = vst.msk [vmem:[#allocation4 + $0x30] sm:$0xff] %vm278_vm12, %v4491_v10  ;;  %286 = vst.msk [vmem:[#allocation4 + $0x38] sm:$0xff] %vm278_vm12, %v4491_v10 }
   0xf   : > { %4291 = vmatpush3.bf16.msra.mxu0 %v4422_v27  ;;  %287 = vst.msk [vmem:[#allocation4 + $0x40] sm:$0xff] %vm278_vm12, %v4491_v10  ;;  %288 = vst.msk [vmem:[#allocation4 + $0x48] sm:$0xff] %vm278_vm12, %v4491_v10 }
  0x10   : > { %s4554_s29 = scalar_lea.vmem %s6186_s0, %s4400_s26  ;;  %s4498_s26 = smov 64   ;;  %4292 = vmatprep.subr.bf16.mxu0 %v4491_v10  ;;  %289 = vst.msk [vmem:[#allocation4 + $0x50] sm:$0xff] %vm278_vm12, %v4491_v10  ;;  %290 = vst.msk [vmem:[#allocation4 + $0x58] sm:$0xff] %vm278_vm12, %v4491_v10 }
  0x11   : > { %v577_v0 = vld [vmem:[%s4554_s29 + $0x2] sm:$0xff]  ;;  %v578_v2 = vld [vmem:[%s4554_s29 + $0xa] sm:$0xff]  ;;  %v990_v4 = vld [vmem:[%s4554_s29 + $0x18] sm:$0xff] }
  0x12   : > { %v371_v1 = vld [vmem:[%s4554_s29 + $0x1] sm:$0xff]  ;;  %645 = vrot.lane.b32.xlu1 %v577_v0, %s4489_s30  ;;  %v372_v3 = vld [vmem:[%s4554_s29 + $0x9] sm:$0xff]  ;;  %339 = vst.msk [vmem:[#allocation2 + $0x18] sm:$0xff] %vm335_vm0, %v990_v4  ;;  %v784_v8 = vld [vmem:[%s4554_s29 + $0x17] sm:$0xff] }
  0x13   : > { %439 = vrot.lane.b32.xlu0 %v371_v1, %s4490_s8  ;;  %v989_v5 = vld [vmem:[%s4554_s29 + $0x10] sm:$0xff]  ;;  %v4569_v6 = vld [vmem:[%s4554_s29 + $0x28] sm:$0xff]  ;;  %v4572_v7 = vld [vmem:[%s4554_s29 + $0x20] sm:$0xff]  ;;  %4293 = vmatpush3.bf16.msra.mxu0 %v4423_v28 }
  0x14   : > { %338 = vst.msk [vmem:[#allocation2 + $0x10] sm:$0xff] %vm335_vm0, %v989_v5  ;;  %v783_v9 = vld [vmem:[%s4554_s29 + $0xf] sm:$0xff]  ;;  %341 = vst.msk [vmem:[#allocation2 + $0x28] sm:$0xff] %vm335_vm0, %v4569_v6  ;;  %v4582_v11 = vld [vmem:[%s4554_s29 + $0x38] sm:$0xff]  ;;  %4294 = vmatprep.subr.bf16.mxu0 %v4491_v10 }
  0x15   : > { %340 = vst.msk [vmem:[#allocation2 + $0x20] sm:$0xff] %vm335_vm0, %v4572_v7  ;;  %v4587_v12 = vld [vmem:[%s4554_s29 + $0x30] sm:$0xff]  ;;  %343 = vst.msk [vmem:[#allocation2 + $0x38] sm:$0xff] %vm335_vm0, %v4582_v11  ;;  %v4594_v13 = vld [vmem:[%s4554_s29 + $0x48] sm:$0xff] }
  0x16   : > { %647 = vrot.lane.b32.xlu1 %v578_v2, %s4489_s30  ;;  %342 = vst.msk [vmem:[#allocation2 + $0x30] sm:$0xff] %vm335_vm0, %v4587_v12  ;;  %v4597_v14 = vld [vmem:[%s4554_s29 + $0x40] sm:$0xff]  ;;  %345 = vst.msk [vmem:[#allocation2 + $0x48] sm:$0xff] %vm335_vm0, %v4594_v13  ;;  %v1195_v16 = vld [vmem:[%s4554_s29 + $0x11] sm:$0xff] }
  0x17   : > { %441 = vrot.lane.b32.xlu0 %v372_v3, %s4490_s8  ;;  %344 = vst.msk [vmem:[#allocation2 + $0x40] sm:$0xff] %vm335_vm0, %v4597_v14  ;;  %v1196_v15 = vld [vmem:[%s4554_s29 + $0x19] sm:$0xff]  ;;  %v302_v18 = vld [vmem:[%s4554_s29 + $0x8] sm:$0xff]  ;;  %v4617_v20 = vld [vmem:[%s4554_s29 + $0x50] sm:$0xff]  ;;  %4295 = vmatpush3.bf16.msra.mxu0 %v2167_v34 }
  0x18   : > { %v301_v17 = vld [vmem:[%s4554_s29] sm:$0xff]  ;;  %337 = vst.msk [vmem:[#allocation2 + $0x8] sm:$0xff] %vm335_vm0, %v302_v18  ;;  %v4612_v19 = vld [vmem:[%s4554_s29 + $0x58] sm:$0xff]  ;;  %346 = vst.msk [vmem:[#allocation2 + $0x50] sm:$0xff] %vm335_vm0, %v4617_v20 }
  0x19   : > { %336 = vst.msk [vmem:[#allocation2] sm:$0xff] %vm335_vm0, %v301_v17  ;;  %347 = vst.msk [vmem:[#allocation2 + $0x58] sm:$0xff] %vm335_vm0, %v4612_v19  ;;  %v1402_v21 = vld [vmem:[%s4554_s29 + $0x26] sm:$0xff]  ;;  %v1401_v22 = vld [vmem:[%s4554_s29 + $0x1e] sm:$0xff] }
  0x1a   : > { %853 = vrot.lane.b32.xlu1 %v784_v8, %s4492_s9  ;;  %v1608_v24 = vld [vmem:[%s4554_s29 + $0x27] sm:$0xff]  ;;  %v1607_v26 = vld [vmem:[%s4554_s29 + $0x1f] sm:$0xff]  ;;  %v579_v33 = vld [vmem:[%s4554_s29 + $0x12] sm:$0xff] }
  0x1b   : > { %851 = vrot.lane.b32.xlu0 %v783_v9, %s4492_s9  ;;  %v4651_v30 = vld [vmem:[%s4554_s29 + $0x68] sm:$0xff]  ;;  %v4654_v31 = vld [vmem:[%s4554_s29 + $0x60] sm:$0xff]  ;;  %v1404_v37 = vld [vmem:[%s4554_s29 + $0x36] sm:$0xff] }
  0x1c   : > { %349 = vst.msk [vmem:[#allocation2 + $0x68] sm:$0xff] %vm335_vm0, %v4651_v30  ;;  %348 = vst.msk [vmem:[#allocation2 + $0x60] sm:$0xff] %vm335_vm0, %v4654_v31  ;;  %v580_v32 = vld [vmem:[%s4554_s29 + $0x1a] sm:$0xff]  ;;  %v1198_v35 = vld [vmem:[%s4554_s29 + $0x29] sm:$0xff] }
  0x1d   : > { %v1197_v36 = vld [vmem:[%s4554_s29 + $0x21] sm:$0xff]  ;;  %v1403_v38 = vld [vmem:[%s4554_s29 + $0x2e] sm:$0xff]  ;;  %v1610_v39 = vld [vmem:[%s4554_s29 + $0x37] sm:$0xff] }
  0x1e   : > { %1059 = vrot.lane.b32.xlu1 %v990_v4, %s4493_s10  ;;  %v1609_v40 = vld [vmem:[%s4554_s29 + $0x2f] sm:$0xff]  ;;  %v4691_v41 = vld [vmem:[%s4554_s29 + $0x78] sm:$0xff]  ;;  %v581_v44 = vld [vmem:[%s4554_s29 + $0x22] sm:$0xff] }
  0x1f   : > { %1057 = vrot.lane.b32.xlu0 %v989_v5, %s4493_s10  ;;  %v4694_v42 = vld [vmem:[%s4554_s29 + $0x70] sm:$0xff]  ;;  %351 = vst.msk [vmem:[#allocation2 + $0x78] sm:$0xff] %vm335_vm0, %v4691_v41  ;;  %v1200_v45 = vld [vmem:[%s4554_s29 + $0x39] sm:$0xff]  ;;  %v1406_v47 = vld [vmem:[%s4554_s29 + $0x46] sm:$0xff] }
  0x20   : > { %350 = vst.msk [vmem:[#allocation2 + $0x70] sm:$0xff] %vm335_vm0, %v4694_v42  ;;  %v582_v43 = vld [vmem:[%s4554_s29 + $0x2a] sm:$0xff]  ;;  %v1405_v48 = vld [vmem:[%s4554_s29 + $0x3e] sm:$0xff]  ;;  %v583_v54 = vld [vmem:[%s4554_s29 + $0x32] sm:$0xff] }
  0x21   : > { %v1199_v46 = vld [vmem:[%s4554_s29 + $0x31] sm:$0xff]  ;;  %v1612_v49 = vld [vmem:[%s4554_s29 + $0x47] sm:$0xff]  ;;  %v1611_v50 = vld [vmem:[%s4554_s29 + $0x3f] sm:$0xff] }
  0x22   : > { %1265 = vrot.lane.b32.xlu1 %v1196_v15, %s4494_s11  ;;  %v4729_v51 = vld [vmem:[%s4554_s29 + $0x88] sm:$0xff]  ;;  %v4732_v52 = vld [vmem:[%s4554_s29 + $0x80] sm:$0xff]  ;;  %v1408_v57 = vld [vmem:[%s4554_s29 + $0x56] sm:$0xff] }
  0x23   : > { %1263 = vrot.lane.b32.xlu0 %v1195_v16, %s4494_s11  ;;  %353 = vst.msk [vmem:[#allocation2 + $0x88] sm:$0xff] %vm335_vm0, %v4729_v51  ;;  %352 = vst.msk [vmem:[#allocation2 + $0x80] sm:$0xff] %vm335_vm0, %v4732_v52  ;;  %v584_v53 = vld [vmem:[%s4554_s29 + $0x3a] sm:$0xff]  ;;  %v1202_v55 = vld [vmem:[%s4554_s29 + $0x49] sm:$0xff] }
  0x24   : > { %v1201_v56 = vld [vmem:[%s4554_s29 + $0x41] sm:$0xff]  ;;  %v1407_v58 = vld [vmem:[%s4554_s29 + $0x4e] sm:$0xff]  ;;  %v1614_v61 = vld [vmem:[%s4554_s29 + $0x57] sm:$0xff] }
  0x25   : > { %v1613_v62 = vld [vmem:[%s4554_s29 + $0x4f] sm:$0xff]  ;;  %v4773_v3 = vld [vmem:[%s4554_s29 + $0x98] sm:$0xff]  ;;  %v585_v8 = vld [vmem:[%s4554_s29 + $0x42] sm:$0xff] }
  0x26   : > { %1471 = vrot.lane.b32.xlu1 %v1402_v21, %s4495_s16  ;;  %v4776_v4 = vld [vmem:[%s4554_s29 + $0x90] sm:$0xff]  ;;  %355 = vst.msk [vmem:[#allocation2 + $0x98] sm:$0xff] %vm335_vm0, %v4773_v3  ;;  %v1615_v25 = vld [vmem:[%s4554_s29 + $0x5f] sm:$0xff] }
  0x27   : > { %1469 = vrot.lane.b32.xlu0 %v1401_v22, %s4495_s16  ;;  %354 = vst.msk [vmem:[#allocation2 + $0x90] sm:$0xff] %vm335_vm0, %v4776_v4  ;;  %v1203_v17 = vld [vmem:[%s4554_s29 + $0x51] sm:$0xff]  ;;  %v1410_v22 = vld [vmem:[%s4554_s29 + $0x66] sm:$0xff] }
  0x2a   : > { %1677 = vrot.lane.b32.xlu1 %v1608_v24, %s4496_s19 }
  0x2b   : > { %1675 = vrot.lane.b32.xlu0 %v1607_v26, %s4496_s19 }
  0x2e   : > { %1883 = vrot.lane.b32.xlu1 %v4569_v6, %s4498_s26 }
  0x2f   : > { %1881 = vrot.lane.b32.xlu0 %v4572_v7, %s4498_s26 }
  0x32   : > { %445 = vrot.lane.b32.xlu1 %v1196_v15, %s4490_s8 }
  0x33   : > { %443 = vrot.lane.b32.xlu0 %v1195_v16, %s4490_s8  ;;  %v1204_v16 = vld [vmem:[%s4554_s29 + $0x59] sm:$0xff] }
  0x36   : > { %651 = vrot.lane.b32.xlu1 %v580_v32, %s4489_s30 }
  0x37   : > { %649 = vrot.lane.b32.xlu0 %v579_v33, %s4489_s30 }
  0x3a   : > { %857 = vrot.lane.b32.xlu1 %v1608_v24, %s4492_s9 }
  0x3b   : > { %855 = vrot.lane.b32.xlu0 %v1607_v26, %s4492_s9 }
  0x3e   : > { %1063 = vrot.lane.b32.xlu1 %v4569_v6, %s4493_s10 }
  0x3f   : > { %1061 = vrot.lane.b32.xlu0 %v4572_v7, %s4493_s10  ;;  %v586_v7 = vld [vmem:[%s4554_s29 + $0x4a] sm:$0xff] }
  0x42   : > { %1269 = vrot.lane.b32.xlu1 %v1198_v35, %s4494_s11 }
  0x43   : > { %1267 = vrot.lane.b32.xlu0 %v1197_v36, %s4494_s11 }
  0x46   : > { %1475 = vrot.lane.b32.xlu1 %v1404_v37, %s4495_s16 }
  0x47   : > { %1473 = vrot.lane.b32.xlu0 %v1403_v38, %s4495_s16 }
  0x4a   : > { %1681 = vrot.lane.b32.xlu1 %v1610_v39, %s4496_s19 }
  0x4b   : > { %1679 = vrot.lane.b32.xlu0 %v1609_v40, %s4496_s19 }
  0x4e   : > { %1887 = vrot.lane.b32.xlu1 %v4582_v11, %s4498_s26 }
  0x4f   : > { %1885 = vrot.lane.b32.xlu0 %v4587_v12, %s4498_s26 }
  0x52   : > { %449 = vrot.lane.b32.xlu1 %v1198_v35, %s4490_s8  ;;  %v4830_v35 = vld [vmem:[%s4554_s29 + $0xa8] sm:$0xff] }
  0x53   : > { %447 = vrot.lane.b32.xlu0 %v1197_v36, %s4490_s8  ;;  %v4833_v36 = vld [vmem:[%s4554_s29 + $0xa0] sm:$0xff]  ;;  %357 = vst.msk [vmem:[#allocation2 + $0xa8] sm:$0xff] %vm335_vm0, %v4830_v35 }
  0x54   : > { %356 = vst.msk [vmem:[#allocation2 + $0xa0] sm:$0xff] %vm335_vm0, %v4833_v36 }
  0x56   : > { %655 = vrot.lane.b32.xlu1 %v582_v43, %s4489_s30 }
  0x57   : > { %653 = vrot.lane.b32.xlu0 %v581_v44, %s4489_s30 }
  0x5a   : > { %861 = vrot.lane.b32.xlu1 %v1610_v39, %s4492_s9  ;;  %v588_v39 = vld [vmem:[%s4554_s29 + $0x5a] sm:$0xff] }
  0x5b   : > { %859 = vrot.lane.b32.xlu0 %v1609_v40, %s4492_s9  ;;  %v587_v40 = vld [vmem:[%s4554_s29 + $0x52] sm:$0xff] }
  0x5e   : > { %1067 = vrot.lane.b32.xlu1 %v4582_v11, %s4493_s10 }
  0x5f   : > { %1065 = vrot.lane.b32.xlu0 %v4587_v12, %s4493_s10 }
  0x62   : > { %1273 = vrot.lane.b32.xlu1 %v1200_v45, %s4494_s11 }
  0x63   : > { %1271 = vrot.lane.b32.xlu0 %v1199_v46, %s4494_s11 }
  0x66   : > { %1479 = vrot.lane.b32.xlu1 %v1406_v47, %s4495_s16 }
  0x67   : > { %1477 = vrot.lane.b32.xlu0 %v1405_v48, %s4495_s16 }
  0x6a   : > { %1685 = vrot.lane.b32.xlu1 %v1612_v49, %s4496_s19 }
  0x6b   : > { %1683 = vrot.lane.b32.xlu0 %v1611_v50, %s4496_s19 }
  0x6e   : > { %1891 = vrot.lane.b32.xlu1 %v4594_v13, %s4498_s26 }
  0x6f   : > { %1889 = vrot.lane.b32.xlu0 %v4597_v14, %s4498_s26 }
  0x72   : > { %453 = vrot.lane.b32.xlu1 %v1200_v45, %s4490_s8 }
  0x73   : > { %451 = vrot.lane.b32.xlu0 %v1199_v46, %s4490_s8 }
  0x76   : > { %659 = vrot.lane.b32.xlu1 %v584_v53, %s4489_s30 }
  0x77   : > { %657 = vrot.lane.b32.xlu0 %v583_v54, %s4489_s30 }
  0x7a   : > { %865 = vrot.lane.b32.xlu1 %v1612_v49, %s4492_s9  ;;  %v1206_v49 = vld [vmem:[%s4554_s29 + $0x69] sm:$0xff] }
  0x7b   : > { %863 = vrot.lane.b32.xlu0 %v1611_v50, %s4492_s9  ;;  %v1205_v50 = vld [vmem:[%s4554_s29 + $0x61] sm:$0xff] }
  0x7e   : > { %1071 = vrot.lane.b32.xlu1 %v4594_v13, %s4493_s10 }
  0x7f   : > { %1069 = vrot.lane.b32.xlu0 %v4597_v14, %s4493_s10 }
  0x82   : > { %1277 = vrot.lane.b32.xlu1 %v1202_v55, %s4494_s11 }
  0x83   : > { %1275 = vrot.lane.b32.xlu0 %v1201_v56, %s4494_s11 }
  0x84   : > { %v646_v59 = vpop.permute.xlu1 %645 }
  0x85   : > { %v440_v60 = vpop.permute.xlu0 %439 }
  0x86   : > { %542 = vst.msk [vmem:[#allocation2] sm:$0xff] %vm541_vm3, %v440_v60  ;;  %1483 = vrot.lane.b32.xlu1 %v1408_v57, %s4495_s16 }
  0x87   : > { %1481 = vrot.lane.b32.xlu0 %v1407_v58, %s4495_s16  ;;  %748 = vst.msk [vmem:[#allocation2] sm:$0xff] %vm747_vm4, %v646_v59  ;;  %v1617_v58 = vld [vmem:[%s4554_s29 + $0x6f] sm:$0xff] }
  0x88   : > { %v648_v63 = vpop.permute.xlu1 %647 }
  0x89   : > { %v442_v0 = vpop.permute.xlu0 %441 }
  0x8a   : > { %543 = vst.msk [vmem:[#allocation2 + $0x8] sm:$0xff] %vm541_vm3, %v442_v0  ;;  %1689 = vrot.lane.b32.xlu1 %v1614_v61, %s4496_s19 }
  0x8b   : > { %1687 = vrot.lane.b32.xlu0 %v1613_v62, %s4496_s19  ;;  %749 = vst.msk [vmem:[#allocation2 + $0x8] sm:$0xff] %vm747_vm4, %v648_v63 }
  0x8c   : > { %v854_v1 = vpop.permute.xlu1 %853 }
  0x8d   : > { %v852_v2 = vpop.permute.xlu0 %851  ;;  %955 = vst.msk [vmem:[#allocation2 + $0x8] sm:$0xff] %vm953_vm5, %v854_v1 }
  0x8e   : > { %954 = vst.msk [vmem:[#allocation2] sm:$0xff] %vm953_vm5, %v852_v2  ;;  %1895 = vrot.lane.b32.xlu1 %v4612_v19, %s4498_s26  ;;  %v4887_v2 = vld [vmem:[%s4554_s29 + $0xb8] sm:$0xff] }
  0x8f   : > { %1893 = vrot.lane.b32.xlu0 %v4617_v20, %s4498_s26  ;;  %359 = vst.msk [vmem:[#allocation2 + $0xb8] sm:$0xff] %vm335_vm0, %v4887_v2 }
  0x90   : > { %v1060_v5 = vpop.permute.xlu1 %1059 }
  0x91   : > { %v1058_v6 = vpop.permute.xlu0 %1057  ;;  %1161 = vst.msk [vmem:[#allocation2 + $0x8] sm:$0xff] %vm1159_vm6, %v1060_v5  ;;  %v4890_v5 = vld [vmem:[%s4554_s29 + $0xb0] sm:$0xff] }
  0x92   : > { %1160 = vst.msk [vmem:[#allocation2] sm:$0xff] %vm1159_vm6, %v1058_v6  ;;  %457 = vrot.lane.b32.xlu1 %v1202_v55, %s4490_s8  ;;  %v1412_v55 = vld [vmem:[%s4554_s29 + $0x76] sm:$0xff] }
  0x93   : > { %455 = vrot.lane.b32.xlu0 %v1201_v56, %s4490_s8  ;;  %v1411_v56 = vld [vmem:[%s4554_s29 + $0x6e] sm:$0xff]  ;;  %358 = vst.msk [vmem:[#allocation2 + $0xb0] sm:$0xff] %vm335_vm0, %v4890_v5 }
  0x94   : > { %v1266_v9 = vpop.permute.xlu1 %1265 }
  0x95   : > { %v1264_v11 = vpop.permute.xlu0 %1263  ;;  %1367 = vst.msk [vmem:[#allocation2 + $0x8] sm:$0xff] %vm1365_vm7, %v1266_v9  ;;  %v589_v9 = vld [vmem:[%s4554_s29 + $0x62] sm:$0xff] }
  0x96   : > { %1366 = vst.msk [vmem:[#allocation2] sm:$0xff] %vm1365_vm7, %v1264_v11  ;;  %663 = vrot.lane.b32.xlu1 %v586_v7, %s4489_s30 }
  0x97   : > { %661 = vrot.lane.b32.xlu0 %v585_v8, %s4489_s30  ;;  %v590_v8 = vld [vmem:[%s4554_s29 + $0x6a] sm:$0xff] }
  0x98   : > { %v1472_v12 = vpop.permute.xlu1 %1471 }
  0x99   : > { %v1470_v13 = vpop.permute.xlu0 %1469  ;;  %1573 = vst.msk [vmem:[#allocation2 + $0x8] sm:$0xff] %vm1571_vm8, %v1472_v12 }
  0x9a   : > { %1572 = vst.msk [vmem:[#allocation2] sm:$0xff] %vm1571_vm8, %v1470_v13  ;;  %869 = vrot.lane.b32.xlu1 %v1614_v61, %s4492_s9 }
  0x9b   : > { %867 = vrot.lane.b32.xlu0 %v1613_v62, %s4492_s9 }
  0x9c   : > { %v1678_v14 = vpop.permute.xlu1 %1677 }
  0x9d   : > { %v1676_v15 = vpop.permute.xlu0 %1675  ;;  %1779 = vst.msk [vmem:[#allocation2 + $0x8] sm:$0xff] %vm1777_vm9, %v1678_v14 }
  0x9e   : > { %1778 = vst.msk [vmem:[#allocation2] sm:$0xff] %vm1777_vm9, %v1676_v15  ;;  %1075 = vrot.lane.b32.xlu1 %v4612_v19, %s4493_s10  ;;  %v1409_v19 = vld [vmem:[%s4554_s29 + $0x5e] sm:$0xff] }
  0x9f   : > { %1073 = vrot.lane.b32.xlu0 %v4617_v20, %s4493_s10  ;;  %v1616_v20 = vld [vmem:[%s4554_s29 + $0x67] sm:$0xff] }
  0xa0   : > { %v1884_v18 = vpop.permute.xlu1 %1883 }
  0xa1   : > { %v1882_v21 = vpop.permute.xlu0 %1881  ;;  %1985 = vst.msk [vmem:[#allocation2 + $0x8] sm:$0xff] %vm1983_vm10, %v1884_v18  ;;  %v1207_v18 = vld [vmem:[%s4554_s29 + $0x71] sm:$0xff] }
  0xa2   : > { %1984 = vst.msk [vmem:[#allocation2] sm:$0xff] %vm1983_vm10, %v1882_v21  ;;  %1281 = vrot.lane.b32.xlu1 %v1204_v16, %s4494_s11 }
  0xa3   : > { %1279 = vrot.lane.b32.xlu0 %v1203_v17, %s4494_s11 }
  0xa4   : > { %v446_v23 = vpop.permute.xlu1 %445 }
  0xa5   : > { %v444_v24 = vpop.permute.xlu0 %443  ;;  %545 = vst.msk [vmem:[#allocation2 + $0x18] sm:$0xff] %vm541_vm3, %v446_v23  ;;  %v1413_v23 = vld [vmem:[%s4554_s29 + $0x7e] sm:$0xff] }
  0xa6   : > { %544 = vst.msk [vmem:[#allocation2 + $0x10] sm:$0xff] %vm541_vm3, %v444_v24  ;;  %1487 = vrot.lane.b32.xlu1 %v1410_v22, %s4495_s16 }
  0xa7   : > { %1485 = vrot.lane.b32.xlu0 %v1409_v19, %s4495_s16  ;;  %v1414_v19 = vld [vmem:[%s4554_s29 + $0x86] sm:$0xff] }
  0xa8   : > { %v652_v26 = vpop.permute.xlu1 %651  ;;  %v2020_v29 = vld [vmem:[#allocation2 + $0x8] sm:$0xff] }
  0xa9   : > { %v650_v27 = vpop.permute.xlu0 %649  ;;  %v2019_v28 = vld [vmem:[#allocation2] sm:$0xff]  ;;  %751 = vst.msk [vmem:[#allocation2 + $0x18] sm:$0xff] %vm747_vm4, %v652_v26 }
  0xaa   : > { %750 = vst.msk [vmem:[#allocation2 + $0x10] sm:$0xff] %vm747_vm4, %v650_v27  ;;  %v2053_v32 = vpack.c.bf16 %v2020_v29, %v2019_v28  ;;  %1693 = vrot.lane.b32.xlu1 %v1616_v20, %s4496_s19 }
  0xab   : > { %1691 = vrot.lane.b32.xlu0 %v1615_v25, %s4496_s19 }
  0xac   : > { %4297 = vmatmul.mubr.msk.bf16.vlgmr.msra.gmra.mrb[0].mxu0 %vm6194_vm11, %v2053_v32  ;;  %v858_v33 = vpop.permute.xlu1 %857 }
  0xad   : > { %v856_v34 = vpop.permute.xlu0 %855  ;;  %4300 = vmatprep.mubr.msk.bf16.mxu0 %vm4497_vm1, %v4491_v10  ;;  %957 = vst.msk [vmem:[#allocation2 + $0x18] sm:$0xff] %vm953_vm5, %v858_v33 }
  0xae   : > { %956 = vst.msk [vmem:[#allocation2 + $0x10] sm:$0xff] %vm953_vm5, %v856_v34  ;;  %1899 = vrot.lane.b32.xlu1 %v4651_v30, %s4498_s26  ;;  %v4944_v34 = vld [vmem:[%s4554_s29 + $0xc8] sm:$0xff] }
  0xaf   : > { %1897 = vrot.lane.b32.xlu0 %v4654_v31, %s4498_s26  ;;  %361 = vst.msk [vmem:[#allocation2 + $0xc8] sm:$0xff] %vm335_vm0, %v4944_v34 }
  0xb0   : > { %v1064_v37 = vpop.permute.xlu1 %1063 }
  0xb1   : > { %v1062_v38 = vpop.permute.xlu0 %1061  ;;  %1163 = vst.msk [vmem:[#allocation2 + $0x18] sm:$0xff] %vm1159_vm6, %v1064_v37  ;;  %v4947_v37 = vld [vmem:[%s4554_s29 + $0xc0] sm:$0xff] }
  0xb2   : > { %1162 = vst.msk [vmem:[#allocation2 + $0x10] sm:$0xff] %vm1159_vm6, %v1062_v38  ;;  %461 = vrot.lane.b32.xlu1 %v1204_v16, %s4490_s8 }
  0xb3   : > { %459 = vrot.lane.b32.xlu0 %v1203_v17, %s4490_s8  ;;  %v1208_v17 = vld [vmem:[%s4554_s29 + $0x79] sm:$0xff]  ;;  %360 = vst.msk [vmem:[#allocation2 + $0xc0] sm:$0xff] %vm335_vm0, %v4947_v37 }
  0xb4   : > { %v1270_v43 = vpop.permute.xlu1 %1269 }
  0xb5   : > { %v1268_v44 = vpop.permute.xlu0 %1267  ;;  %1369 = vst.msk [vmem:[#allocation2 + $0x18] sm:$0xff] %vm1365_vm7, %v1270_v43  ;;  %v591_v43 = vld [vmem:[%s4554_s29 + $0x72] sm:$0xff] }
  0xb6   : > { %1368 = vst.msk [vmem:[#allocation2 + $0x10] sm:$0xff] %vm1365_vm7, %v1268_v44  ;;  %667 = vrot.lane.b32.xlu1 %v588_v39, %s4489_s30 }
  0xb7   : > { %665 = vrot.lane.b32.xlu0 %v587_v40, %s4489_s30  ;;  %v592_v40 = vld [vmem:[%s4554_s29 + $0x7a] sm:$0xff] }
  0xb8   : > { %v1476_v45 = vpop.permute.xlu1 %1475 }
  0xb9   : > { %v1474_v46 = vpop.permute.xlu0 %1473  ;;  %1575 = vst.msk [vmem:[#allocation2 + $0x18] sm:$0xff] %vm1571_vm8, %v1476_v45 }
  0xba   : > { %1574 = vst.msk [vmem:[#allocation2 + $0x10] sm:$0xff] %vm1571_vm8, %v1474_v46  ;;  %873 = vrot.lane.b32.xlu1 %v1616_v20, %s4492_s9  ;;  %v1619_v20 = vld [vmem:[%s4554_s29 + $0x7f] sm:$0xff] }
  0xbb   : > { %871 = vrot.lane.b32.xlu0 %v1615_v25, %s4492_s9 }
  0xbc   : > { %v1682_v47 = vpop.permute.xlu1 %1681 }
  0xbd   : > { %v1680_v48 = vpop.permute.xlu0 %1679  ;;  %1781 = vst.msk [vmem:[#allocation2 + $0x18] sm:$0xff] %vm1777_vm9, %v1682_v47 }
  0xbe   : > { %1780 = vst.msk [vmem:[#allocation2 + $0x10] sm:$0xff] %vm1777_vm9, %v1680_v48  ;;  %1079 = vrot.lane.b32.xlu1 %v4651_v30, %s4493_s10 }
  0xbf   : > { %1077 = vrot.lane.b32.xlu0 %v4654_v31, %s4493_s10  ;;  %v1618_v31 = vld [vmem:[%s4554_s29 + $0x77] sm:$0xff] }
  0xc0   : > { %v1888_v53 = vpop.permute.xlu1 %1887 }
  0xc1   : > { %v1886_v54 = vpop.permute.xlu0 %1885  ;;  %1987 = vst.msk [vmem:[#allocation2 + $0x18] sm:$0xff] %vm1983_vm10, %v1888_v53  ;;  %v1209_v53 = vld [vmem:[%s4554_s29 + $0x81] sm:$0xff] }
  0xc2   : > { %1986 = vst.msk [vmem:[#allocation2 + $0x10] sm:$0xff] %vm1983_vm10, %v1886_v54  ;;  %1285 = vrot.lane.b32.xlu1 %v1206_v49, %s4494_s11  ;;  %v1416_v54 = vld [vmem:[%s4554_s29 + $0x96] sm:$0xff] }
  0xc3   : > { %1283 = vrot.lane.b32.xlu0 %v1205_v50, %s4494_s11 }
  0xc4   : > { %v450_v30 = vpop.permute.xlu1 %449 }
  0xc5   : > { %v448_v57 = vpop.permute.xlu0 %447  ;;  %547 = vst.msk [vmem:[#allocation2 + $0x28] sm:$0xff] %vm541_vm3, %v450_v30 }
  0xc6   : > { %546 = vst.msk [vmem:[#allocation2 + $0x20] sm:$0xff] %vm541_vm3, %v448_v57  ;;  %1491 = vrot.lane.b32.xlu1 %v1412_v55, %s4495_s16  ;;  %v1415_v55 = vld [vmem:[%s4554_s29 + $0x8e] sm:$0xff]  ;;  %v1622_v57 = vld [vmem:[%s4554_s29 + $0x97] sm:$0xff] }
  0xc7   : > { %1489 = vrot.lane.b32.xlu0 %v1411_v56, %s4495_s16 }
  0xc8   : > { %v656_v59 = vpop.permute.xlu1 %655  ;;  %v2022_v62 = vld [vmem:[#allocation2 + $0x18] sm:$0xff] }
  0xc9   : > { %v654_v60 = vpop.permute.xlu0 %653  ;;  %v2021_v61 = vld [vmem:[#allocation2 + $0x10] sm:$0xff]  ;;  %753 = vst.msk [vmem:[#allocation2 + $0x28] sm:$0xff] %vm747_vm4, %v656_v59 }
  0xca   : > { %752 = vst.msk [vmem:[#allocation2 + $0x20] sm:$0xff] %vm747_vm4, %v654_v60  ;;  %v2054_v63 = vpack.c.bf16 %v2022_v62, %v2021_v61  ;;  %1697 = vrot.lane.b32.xlu1 %v1618_v31, %s4496_s19 }
  0xcb   : > { %1695 = vrot.lane.b32.xlu0 %v1617_v58, %s4496_s19 }
  0xcc   : > { %4301 = vmatmul.mubr.msk.bf16.gmra.mrb[4].mxu0 %vm6194_vm11, %v2054_v63  ;;  %v862_v0 = vpop.permute.xlu1 %861 }
  0xcd   : > { %v860_v1 = vpop.permute.xlu0 %859  ;;  %4304 = vmatprep.mubr.msk.bf16.mxu0 %vm4497_vm1, %v4491_v10  ;;  %959 = vst.msk [vmem:[#allocation2 + $0x28] sm:$0xff] %vm953_vm5, %v862_v0 }
  0xce   : > { %958 = vst.msk [vmem:[#allocation2 + $0x20] sm:$0xff] %vm953_vm5, %v860_v1  ;;  %1903 = vrot.lane.b32.xlu1 %v4691_v41, %s4498_s26  ;;  %v5025_v1 = vld [vmem:[%s4554_s29 + $0xd8] sm:$0xff] }
  0xcf   : > { %1901 = vrot.lane.b32.xlu0 %v4694_v42, %s4498_s26  ;;  %363 = vst.msk [vmem:[#allocation2 + $0xd8] sm:$0xff] %vm335_vm0, %v5025_v1 }
  0xd0   : > { %v1068_v6 = vpop.permute.xlu1 %1067 }
  0xd1   : > { %v1066_v7 = vpop.permute.xlu0 %1065  ;;  %1165 = vst.msk [vmem:[#allocation2 + $0x28] sm:$0xff] %vm1159_vm6, %v1068_v6  ;;  %v5032_v6 = vld [vmem:[%s4554_s29 + $0xd0] sm:$0xff] }
  0xd2   : > { %1164 = vst.msk [vmem:[#allocation2 + $0x20] sm:$0xff] %vm1159_vm6, %v1066_v7  ;;  %465 = vrot.lane.b32.xlu1 %v1206_v49, %s4490_s8 }
  0xd3   : > { %463 = vrot.lane.b32.xlu0 %v1205_v50, %s4490_s8  ;;  %v1210_v50 = vld [vmem:[%s4554_s29 + $0x89] sm:$0xff]  ;;  %362 = vst.msk [vmem:[#allocation2 + $0xd0] sm:$0xff] %vm335_vm0, %v5032_v6 }
  0xd4   : > { %v1274_v11 = vpop.permute.xlu1 %1273 }
  0xd5   : > { %v1272_v12 = vpop.permute.xlu0 %1271  ;;  %1371 = vst.msk [vmem:[#allocation2 + $0x28] sm:$0xff] %vm1365_vm7, %v1274_v11  ;;  %v593_v11 = vld [vmem:[%s4554_s29 + $0x82] sm:$0xff] }
  0xd6   : > { %1370 = vst.msk [vmem:[#allocation2 + $0x20] sm:$0xff] %vm1365_vm7, %v1272_v12  ;;  %671 = vrot.lane.b32.xlu1 %v590_v8, %s4489_s30 }
  0xd7   : > { %669 = vrot.lane.b32.xlu0 %v589_v9, %s4489_s30  ;;  %v594_v9 = vld [vmem:[%s4554_s29 + $0x8a] sm:$0xff] }
  0xd8   : > { %v1480_v13 = vpop.permute.xlu1 %1479 }
  0xd9   : > { %v1478_v14 = vpop.permute.xlu0 %1477  ;;  %1577 = vst.msk [vmem:[#allocation2 + $0x28] sm:$0xff] %vm1571_vm8, %v1480_v13 }
  0xda   : > { %1576 = vst.msk [vmem:[#allocation2 + $0x20] sm:$0xff] %vm1571_vm8, %v1478_v14  ;;  %877 = vrot.lane.b32.xlu1 %v1618_v31, %s4492_s9  ;;  %v1621_v31 = vld [vmem:[%s4554_s29 + $0x8f] sm:$0xff] }
  0xdb   : > { %875 = vrot.lane.b32.xlu0 %v1617_v58, %s4492_s9 }
  0xdc   : > { %v1686_v15 = vpop.permute.xlu1 %1685 }
  0xdd   : > { %v1684_v16 = vpop.permute.xlu0 %1683  ;;  %1783 = vst.msk [vmem:[#allocation2 + $0x28] sm:$0xff] %vm1777_vm9, %v1686_v15 }
  0xde   : > { %1782 = vst.msk [vmem:[#allocation2 + $0x20] sm:$0xff] %vm1777_vm9, %v1684_v16  ;;  %1083 = vrot.lane.b32.xlu1 %v4691_v41, %s4493_s10 }
  0xdf   : > { %1081 = vrot.lane.b32.xlu0 %v4694_v42, %s4493_s10  ;;  %v1620_v42 = vld [vmem:[%s4554_s29 + $0x87] sm:$0xff] }
  0xe0   : > { %v1892_v21 = vpop.permute.xlu1 %1891 }
  0xe1   : > { %v1890_v22 = vpop.permute.xlu0 %1889  ;;  %1989 = vst.msk [vmem:[#allocation2 + $0x28] sm:$0xff] %vm1983_vm10, %v1892_v21  ;;  %v1211_v21 = vld [vmem:[%s4554_s29 + $0x91] sm:$0xff] }
  0xe2   : > { %1988 = vst.msk [vmem:[#allocation2 + $0x20] sm:$0xff] %vm1983_vm10, %v1890_v22  ;;  %1289 = vrot.lane.b32.xlu1 %v1208_v17, %s4494_s11 }
  0xe3   : > { %1287 = vrot.lane.b32.xlu0 %v1207_v18, %s4494_s11 }
  0xe4   : > { %v454_v41 = vpop.permute.xlu1 %453 }
  0xe5   : > { %v452_v24 = vpop.permute.xlu0 %451  ;;  %549 = vst.msk [vmem:[#allocation2 + $0x38] sm:$0xff] %vm541_vm3, %v454_v41  ;;  %v1417_v41 = vld [vmem:[%s4554_s29 + $0x9e] sm:$0xff] }
  0xe6   : > { %548 = vst.msk [vmem:[#allocation2 + $0x30] sm:$0xff] %vm541_vm3, %v452_v24  ;;  %1495 = vrot.lane.b32.xlu1 %v1414_v19, %s4495_s16 }
  0xe7   : > { %1493 = vrot.lane.b32.xlu0 %v1413_v23, %s4495_s16  ;;  %v1418_v23 = vld [vmem:[%s4554_s29 + $0xa6] sm:$0xff] }
  0xe8   : > { %v660_v25 = vpop.permute.xlu1 %659  ;;  %v2024_v28 = vld [vmem:[#allocation2 + $0x28] sm:$0xff] }
  0xe9   : > { %v658_v26 = vpop.permute.xlu0 %657  ;;  %v2023_v27 = vld [vmem:[#allocation2 + $0x20] sm:$0xff]  ;;  %755 = vst.msk [vmem:[#allocation2 + $0x38] sm:$0xff] %vm747_vm4, %v660_v25 }
  0xea   : > { %754 = vst.msk [vmem:[#allocation2 + $0x30] sm:$0xff] %vm747_vm4, %v658_v26  ;;  %v2055_v29 = vpack.c.bf16 %v2024_v28, %v2023_v27  ;;  %1701 = vrot.lane.b32.xlu1 %v1620_v42, %s4496_s19 }
  0xeb   : > { %1699 = vrot.lane.b32.xlu0 %v1619_v20, %s4496_s19 }
  0xec   : > { %4305 = vmatmul.mubr.msk.bf16.gmra.mrb[8].mxu0 %vm6194_vm11, %v2055_v29  ;;  %v866_v32 = vpop.permute.xlu1 %865 }
  0xed   : > { %v864_v33 = vpop.permute.xlu0 %863  ;;  %4308 = vmatprep.mubr.msk.bf16.mxu0 %vm4497_vm1, %v4491_v10  ;;  %961 = vst.msk [vmem:[#allocation2 + $0x38] sm:$0xff] %vm953_vm5, %v866_v32 }
  0xee   : > { %960 = vst.msk [vmem:[#allocation2 + $0x30] sm:$0xff] %vm953_vm5, %v864_v33  ;;  %1907 = vrot.lane.b32.xlu1 %v4729_v51, %s4498_s26  ;;  %v5086_v33 = vld [vmem:[%s4554_s29 + $0xe8] sm:$0xff] }
  0xef   : > { %1905 = vrot.lane.b32.xlu0 %v4732_v52, %s4498_s26  ;;  %365 = vst.msk [vmem:[#allocation2 + $0xe8] sm:$0xff] %vm335_vm0, %v5086_v33 }
  0xf0   : > { %v1072_v38 = vpop.permute.xlu1 %1071 }
  0xf1   : > { %v1070_v39 = vpop.permute.xlu0 %1069  ;;  %1167 = vst.msk [vmem:[#allocation2 + $0x38] sm:$0xff] %vm1159_vm6, %v1072_v38  ;;  %v5089_v38 = vld [vmem:[%s4554_s29 + $0xe0] sm:$0xff] }
  0xf2   : > { %1166 = vst.msk [vmem:[#allocation2 + $0x30] sm:$0xff] %vm1159_vm6, %v1070_v39  ;;  %469 = vrot.lane.b32.xlu1 %v1208_v17, %s4490_s8 }
  0xf3   : > { %467 = vrot.lane.b32.xlu0 %v1207_v18, %s4490_s8  ;;  %v1212_v18 = vld [vmem:[%s4554_s29 + $0x99] sm:$0xff]  ;;  %364 = vst.msk [vmem:[#allocation2 + $0xe0] sm:$0xff] %vm335_vm0, %v5089_v38 }
  0xf4   : > { %v1278_v44 = vpop.permute.xlu1 %1277 }
  0xf5   : > { %v1276_v45 = vpop.permute.xlu0 %1275  ;;  %1373 = vst.msk [vmem:[#allocation2 + $0x38] sm:$0xff] %vm1365_vm7, %v1278_v44  ;;  %v595_v44 = vld [vmem:[%s4554_s29 + $0x92] sm:$0xff] }
  0xf6   : > { %1372 = vst.msk [vmem:[#allocation2 + $0x30] sm:$0xff] %vm1365_vm7, %v1276_v45  ;;  %675 = vrot.lane.b32.xlu1 %v592_v40, %s4489_s30 }
  0xf7   : > { %673 = vrot.lane.b32.xlu0 %v591_v43, %s4489_s30  ;;  %v596_v43 = vld [vmem:[%s4554_s29 + $0x9a] sm:$0xff] }
  0xf8   : > { %v1484_v46 = vpop.permute.xlu1 %1483 }
  0xf9   : > { %v1482_v47 = vpop.permute.xlu0 %1481  ;;  %1579 = vst.msk [vmem:[#allocation2 + $0x38] sm:$0xff] %vm1571_vm8, %v1484_v46 }
  0xfa   : > { %1578 = vst.msk [vmem:[#allocation2 + $0x30] sm:$0xff] %vm1571_vm8, %v1482_v47  ;;  %881 = vrot.lane.b32.xlu1 %v1620_v42, %s4492_s9  ;;  %v1623_v42 = vld [vmem:[%s4554_s29 + $0x9f] sm:$0xff] }
  0xfb   : > { %879 = vrot.lane.b32.xlu0 %v1619_v20, %s4492_s9 }
  0xfc   : > { %v1690_v48 = vpop.permute.xlu1 %1689 }
  0xfd   : > { %v1688_v49 = vpop.permute.xlu0 %1687  ;;  %1785 = vst.msk [vmem:[#allocation2 + $0x38] sm:$0xff] %vm1777_vm9, %v1690_v48 }
  0xfe   : > { %1784 = vst.msk [vmem:[#allocation2 + $0x30] sm:$0xff] %vm1777_vm9, %v1688_v49  ;;  %1087 = vrot.lane.b32.xlu1 %v4729_v51, %s4493_s10 }
  0xff   : > { %1085 = vrot.lane.b32.xlu0 %v4732_v52, %s4493_s10 }
 0x100   : > { %v1896_v51 = vpop.permute.xlu1 %1895 }
 0x101   : > { %v1894_v52 = vpop.permute.xlu0 %1893  ;;  %1991 = vst.msk [vmem:[#allocation2 + $0x38] sm:$0xff] %vm1983_vm10, %v1896_v51  ;;  %v1213_v51 = vld [vmem:[%s4554_s29 + $0xa1] sm:$0xff] }
 0x102   : > { %1990 = vst.msk [vmem:[#allocation2 + $0x30] sm:$0xff] %vm1983_vm10, %v1894_v52  ;;  %1293 = vrot.lane.b32.xlu1 %v1210_v50, %s4494_s11 }
 0x103   : > { %1291 = vrot.lane.b32.xlu0 %v1209_v53, %s4494_s11 }
 0x104   : > { %v458_v56 = vpop.permute.xlu1 %457 }
 0x105   : > { %v456_v30 = vpop.permute.xlu0 %455  ;;  %551 = vst.msk [vmem:[#allocation2 + $0x48] sm:$0xff] %vm541_vm3, %v458_v56  ;;  %v1419_v56 = vld [vmem:[%s4554_s29 + $0xae] sm:$0xff] }
 0x106   : > { %550 = vst.msk [vmem:[#allocation2 + $0x40] sm:$0xff] %vm541_vm3, %v456_v30  ;;  %1499 = vrot.lane.b32.xlu1 %v1416_v54, %s4495_s16 }
 0x107   : > { %1497 = vrot.lane.b32.xlu0 %v1415_v55, %s4495_s16  ;;  %v1420_v55 = vld [vmem:[%s4554_s29 + $0xb6] sm:$0xff] }
 0x108   : > { %v664_v58 = vpop.permute.xlu1 %663  ;;  %v2026_v61 = vld [vmem:[#allocation2 + $0x38] sm:$0xff] }
 0x109   : > { %v662_v59 = vpop.permute.xlu0 %661  ;;  %v2025_v60 = vld [vmem:[#allocation2 + $0x30] sm:$0xff]  ;;  %757 = vst.msk [vmem:[#allocation2 + $0x48] sm:$0xff] %vm747_vm4, %v664_v58 }
 0x10a   : > { %756 = vst.msk [vmem:[#allocation2 + $0x40] sm:$0xff] %vm747_vm4, %v662_v59  ;;  %v2056_v62 = vpack.c.bf16 %v2026_v61, %v2025_v60  ;;  %1705 = vrot.lane.b32.xlu1 %v1622_v57, %s4496_s19 }
 0x10b   : > { %1703 = vrot.lane.b32.xlu0 %v1621_v31, %s4496_s19 }
 0x10c   : > { %4309 = vmatmul.mubr.msk.bf16.gmra.mrb[12].mxu0 %vm6194_vm11, %v2056_v62  ;;  %v870_v63 = vpop.permute.xlu1 %869 }
 0x10d   : > { %v868_v0 = vpop.permute.xlu0 %867  ;;  %4312 = vmatprep.mubr.msk.bf16.mxu0 %vm4497_vm1, %v4491_v10  ;;  %963 = vst.msk [vmem:[#allocation2 + $0x48] sm:$0xff] %vm953_vm5, %v870_v63 }
 0x10e   : > { %962 = vst.msk [vmem:[#allocation2 + $0x40] sm:$0xff] %vm953_vm5, %v868_v0  ;;  %1911 = vrot.lane.b32.xlu1 %v4773_v3, %s4498_s26  ;;  %v5143_v0 = vld [vmem:[%s4554_s29 + $0xf8] sm:$0xff] }
 0x10f   : > { %1909 = vrot.lane.b32.xlu0 %v4776_v4, %s4498_s26  ;;  %367 = vst.msk [vmem:[#allocation2 + $0xf8] sm:$0xff] %vm335_vm0, %v5143_v0 }
 0x110   : > { %v1076_v7 = vpop.permute.xlu1 %1075 }
 0x111   : > { %v1074_v8 = vpop.permute.xlu0 %1073  ;;  %1169 = vst.msk [vmem:[#allocation2 + $0x48] sm:$0xff] %vm1159_vm6, %v1076_v7  ;;  %v5146_v7 = vld [vmem:[%s4554_s29 + $0xf0] sm:$0xff] }
 0x112   : > { %1168 = vst.msk [vmem:[#allocation2 + $0x40] sm:$0xff] %vm1159_vm6, %v1074_v8  ;;  %473 = vrot.lane.b32.xlu1 %v1210_v50, %s4490_s8 }
 0x113   : > { %471 = vrot.lane.b32.xlu0 %v1209_v53, %s4490_s8  ;;  %v1214_v53 = vld [vmem:[%s4554_s29 + $0xa9] sm:$0xff]  ;;  %366 = vst.msk [vmem:[#allocation2 + $0xf0] sm:$0xff] %vm335_vm0, %v5146_v7 }
 0x114   : > { %v1282_v12 = vpop.permute.xlu1 %1281 }
 0x115   : > { %v1280_v13 = vpop.permute.xlu0 %1279  ;;  %1375 = vst.msk [vmem:[#allocation2 + $0x48] sm:$0xff] %vm1365_vm7, %v1282_v12  ;;  %v597_v12 = vld [vmem:[%s4554_s29 + $0xa2] sm:$0xff] }
 0x116   : > { %1374 = vst.msk [vmem:[#allocation2 + $0x40] sm:$0xff] %vm1365_vm7, %v1280_v13  ;;  %679 = vrot.lane.b32.xlu1 %v594_v9, %s4489_s30 }
 0x117   : > { %677 = vrot.lane.b32.xlu0 %v593_v11, %s4489_s30  ;;  %v598_v11 = vld [vmem:[%s4554_s29 + $0xaa] sm:$0xff] }
 0x118   : > { %v1488_v14 = vpop.permute.xlu1 %1487 }
 0x119   : > { %v1486_v15 = vpop.permute.xlu0 %1485  ;;  %1581 = vst.msk [vmem:[#allocation2 + $0x48] sm:$0xff] %vm1571_vm8, %v1488_v14 }
 0x11a   : > { %1580 = vst.msk [vmem:[#allocation2 + $0x40] sm:$0xff] %vm1571_vm8, %v1486_v15  ;;  %885 = vrot.lane.b32.xlu1 %v1622_v57, %s4492_s9  ;;  %v1625_v57 = vld [vmem:[%s4554_s29 + $0xaf] sm:$0xff] }
 0x11b   : > { %883 = vrot.lane.b32.xlu0 %v1621_v31, %s4492_s9 }
 0x11c   : > { %v1694_v16 = vpop.permute.xlu1 %1693 }
 0x11d   : > { %v1692_v17 = vpop.permute.xlu0 %1691  ;;  %1787 = vst.msk [vmem:[#allocation2 + $0x48] sm:$0xff] %vm1777_vm9, %v1694_v16 }
 0x11e   : > { %1786 = vst.msk [vmem:[#allocation2 + $0x40] sm:$0xff] %vm1777_vm9, %v1692_v17  ;;  %1091 = vrot.lane.b32.xlu1 %v4773_v3, %s4493_s10 }
 0x11f   : > { %1089 = vrot.lane.b32.xlu0 %v4776_v4, %s4493_s10  ;;  %v1624_v4 = vld [vmem:[%s4554_s29 + $0xa7] sm:$0xff] }
 0x120   : > { %v1900_v22 = vpop.permute.xlu1 %1899 }
 0x121   : > { %v1898_v19 = vpop.permute.xlu0 %1897  ;;  %1993 = vst.msk [vmem:[#allocation2 + $0x48] sm:$0xff] %vm1983_vm10, %v1900_v22  ;;  %v1215_v22 = vld [vmem:[%s4554_s29 + $0xb1] sm:$0xff] }
 0x122   : > { %1992 = vst.msk [vmem:[#allocation2 + $0x40] sm:$0xff] %vm1983_vm10, %v1898_v19  ;;  %1297 = vrot.lane.b32.xlu1 %v1212_v18, %s4494_s11 }
 0x123   : > { %1295 = vrot.lane.b32.xlu0 %v1211_v21, %s4494_s11 }
 0x124   : > { %v462_v3 = vpop.permute.xlu1 %461 }
 0x125   : > { %v460_v24 = vpop.permute.xlu0 %459  ;;  %553 = vst.msk [vmem:[#allocation2 + $0x58] sm:$0xff] %vm541_vm3, %v462_v3  ;;  %v1421_v3 = vld [vmem:[%s4554_s29 + $0xbe] sm:$0xff] }
 0x126   : > { %552 = vst.msk [vmem:[#allocation2 + $0x50] sm:$0xff] %vm541_vm3, %v460_v24  ;;  %1503 = vrot.lane.b32.xlu1 %v1418_v23, %s4495_s16 }
 0x127   : > { %1501 = vrot.lane.b32.xlu0 %v1417_v41, %s4495_s16  ;;  %v1422_v41 = vld [vmem:[%s4554_s29 + $0xc6] sm:$0xff] }
 0x128   : > { %v668_v20 = vpop.permute.xlu1 %667  ;;  %v2028_v27 = vld [vmem:[#allocation2 + $0x48] sm:$0xff] }
 0x129   : > { %v666_v25 = vpop.permute.xlu0 %665  ;;  %v2027_v26 = vld [vmem:[#allocation2 + $0x40] sm:$0xff]  ;;  %759 = vst.msk [vmem:[#allocation2 + $0x58] sm:$0xff] %vm747_vm4, %v668_v20 }
 0x12a   : > { %758 = vst.msk [vmem:[#allocation2 + $0x50] sm:$0xff] %vm747_vm4, %v666_v25  ;;  %v2057_v28 = vpack.c.bf16 %v2028_v27, %v2027_v26  ;;  %1709 = vrot.lane.b32.xlu1 %v1624_v4, %s4496_s19 }
 0x12b   : > { %1707 = vrot.lane.b32.xlu0 %v1623_v42, %s4496_s19 }
 0x12c   : > { %4313 = vmatmul.mubr.msk.bf16.gmra.mrb[16].mxu0 %vm6194_vm11, %v2057_v28  ;;  %v874_v29 = vpop.permute.xlu1 %873 }
 0x12d   : > { %v872_v32 = vpop.permute.xlu0 %871  ;;  %4316 = vmatprep.mubr.msk.bf16.mxu0 %vm4497_vm1, %v4491_v10  ;;  %965 = vst.msk [vmem:[#allocation2 + $0x58] sm:$0xff] %vm953_vm5, %v874_v29 }
 0x12e   : > { %964 = vst.msk [vmem:[#allocation2 + $0x50] sm:$0xff] %vm953_vm5, %v872_v32  ;;  %1915 = vrot.lane.b32.xlu1 %v4830_v35, %s4498_s26 }
 0x12f   : > { %1913 = vrot.lane.b32.xlu0 %v4833_v36, %s4498_s26 }
 0x130   : > { %v1080_v39 = vpop.permute.xlu1 %1079 }
 0x131   : > { %v1078_v40 = vpop.permute.xlu0 %1077  ;;  %1171 = vst.msk [vmem:[#allocation2 + $0x58] sm:$0xff] %vm1159_vm6, %v1080_v39 }
 0x132   : > { %1170 = vst.msk [vmem:[#allocation2 + $0x50] sm:$0xff] %vm1159_vm6, %v1078_v40  ;;  %477 = vrot.lane.b32.xlu1 %v1212_v18, %s4490_s8  ;;  %v600_v40 = vld [vmem:[%s4554_s29 + $0xba] sm:$0xff] }
 0x133   : > { %475 = vrot.lane.b32.xlu0 %v1211_v21, %s4490_s8  ;;  %v1216_v21 = vld [vmem:[%s4554_s29 + $0xb9] sm:$0xff] }
 0x134   : > { %v1286_v45 = vpop.permute.xlu1 %1285 }
 0x135   : > { %v1284_v46 = vpop.permute.xlu0 %1283  ;;  %1377 = vst.msk [vmem:[#allocation2 + $0x58] sm:$0xff] %vm1365_vm7, %v1286_v45 }
 0x136   : > { %1376 = vst.msk [vmem:[#allocation2 + $0x50] sm:$0xff] %vm1365_vm7, %v1284_v46  ;;  %683 = vrot.lane.b32.xlu1 %v596_v43, %s4489_s30  ;;  %v599_v43 = vld [vmem:[%s4554_s29 + $0xb2] sm:$0xff] }
 0x137   : > { %681 = vrot.lane.b32.xlu0 %v595_v44, %s4489_s30 }
 0x138   : > { %v1492_v47 = vpop.permute.xlu1 %1491 }
 0x139   : > { %v1490_v48 = vpop.permute.xlu0 %1489  ;;  %1583 = vst.msk [vmem:[#allocation2 + $0x58] sm:$0xff] %vm1571_vm8, %v1492_v47 }
 0x13a   : > { %1582 = vst.msk [vmem:[#allocation2 + $0x50] sm:$0xff] %vm1571_vm8, %v1490_v48  ;;  %889 = vrot.lane.b32.xlu1 %v1624_v4, %s4492_s9  ;;  %v1627_v4 = vld [vmem:[%s4554_s29 + $0xbf] sm:$0xff] }
 0x13b   : > { %887 = vrot.lane.b32.xlu0 %v1623_v42, %s4492_s9 }
 0x13c   : > { %v1698_v49 = vpop.permute.xlu1 %1697 }
 0x13d   : > { %v1696_v50 = vpop.permute.xlu0 %1695  ;;  %1789 = vst.msk [vmem:[#allocation2 + $0x58] sm:$0xff] %vm1777_vm9, %v1698_v49 }
 0x13e   : > { %1788 = vst.msk [vmem:[#allocation2 + $0x50] sm:$0xff] %vm1777_vm9, %v1696_v50  ;;  %1095 = vrot.lane.b32.xlu1 %v4830_v35, %s4493_s10  ;;  %v5216_v50 = vld [vmem:[%s6188_s2] ss:$0 sm:$0xff] }
 0x13f   : > { %1093 = vrot.lane.b32.xlu0 %v4833_v36, %s4493_s10  ;;  %v1626_v36 = vld [vmem:[%s4554_s29 + $0xb7] sm:$0xff] }
 0x140   : > { %v1904_v52 = vpop.permute.xlu1 %1903 }
 0x141   : > { %v1902_v54 = vpop.permute.xlu0 %1901  ;;  %1995 = vst.msk [vmem:[#allocation2 + $0x58] sm:$0xff] %vm1983_vm10, %v1904_v52  ;;  %v1218_v52 = vld [vmem:[%s4554_s29 + $0xc9] sm:$0xff] }
 0x142   : > { %1994 = vst.msk [vmem:[#allocation2 + $0x50] sm:$0xff] %vm1983_vm10, %v1902_v54  ;;  %1301 = vrot.lane.b32.xlu1 %v1214_v53, %s4494_s11  ;;  %v1217_v54 = vld [vmem:[%s4554_s29 + $0xc1] sm:$0xff] }
 0x143   : > { %1299 = vrot.lane.b32.xlu0 %v1213_v51, %s4494_s11 }
 0x144   : > { %v466_v35 = vpop.permute.xlu1 %465 }
 0x145   : > { %v464_v30 = vpop.permute.xlu0 %463  ;;  %555 = vst.msk [vmem:[#allocation2 + $0x68] sm:$0xff] %vm541_vm3, %v466_v35 }
 0x146   : > { %554 = vst.msk [vmem:[#allocation2 + $0x60] sm:$0xff] %vm541_vm3, %v464_v30  ;;  %1507 = vrot.lane.b32.xlu1 %v1420_v55, %s4495_s16 }
 0x147   : > { %1505 = vrot.lane.b32.xlu0 %v1419_v56, %s4495_s16 }
 0x148   : > { %v672_v31 = vpop.permute.xlu1 %671  ;;  %v2030_v60 = vld [vmem:[#allocation2 + $0x58] sm:$0xff] }
 0x149   : > { %v670_v58 = vpop.permute.xlu0 %669  ;;  %v2029_v59 = vld [vmem:[#allocation2 + $0x50] sm:$0xff]  ;;  %761 = vst.msk [vmem:[#allocation2 + $0x68] sm:$0xff] %vm747_vm4, %v672_v31 }
 0x14a   : > { %760 = vst.msk [vmem:[#allocation2 + $0x60] sm:$0xff] %vm747_vm4, %v670_v58  ;;  %v2058_v61 = vpack.c.bf16 %v2030_v60, %v2029_v59  ;;  %1713 = vrot.lane.b32.xlu1 %v1626_v36, %s4496_s19  ;;  %v1630_v31 = vld [vmem:[%s4554_s29 + $0xd7] sm:$0xff]  ;;  %v1629_v58 = vld [vmem:[%s4554_s29 + $0xcf] sm:$0xff] }
 0x14b   : > { %1711 = vrot.lane.b32.xlu0 %v1625_v57, %s4496_s19 }
 0x14c   : > { %4317 = vmatmul.mubr.msk.bf16.gmra.mrb[20].mxu0 %vm6194_vm11, %v2058_v61  ;;  %v878_v62 = vpop.permute.xlu1 %877 }
 0x14d   : > { %v876_v63 = vpop.permute.xlu0 %875  ;;  %4320 = vmatprep.mubr.msk.bf16.mxu0 %vm4497_vm1, %v4491_v10  ;;  %967 = vst.msk [vmem:[#allocation2 + $0x68] sm:$0xff] %vm953_vm5, %v878_v62 }
 0x14e   : > { %966 = vst.msk [vmem:[#allocation2 + $0x60] sm:$0xff] %vm953_vm5, %v876_v63  ;;  %1919 = vrot.lane.b32.xlu1 %v4887_v2, %s4498_s26 }
 0x14f   : > { %1917 = vrot.lane.b32.xlu0 %v4890_v5, %s4498_s26 }
 0x150   : > { %v1084_v8 = vpop.permute.xlu1 %1083 }
 0x151   : > { %v1082_v9 = vpop.permute.xlu0 %1081  ;;  %1173 = vst.msk [vmem:[#allocation2 + $0x68] sm:$0xff] %vm1159_vm6, %v1084_v8 }
 0x152   : > { %1172 = vst.msk [vmem:[#allocation2 + $0x60] sm:$0xff] %vm1159_vm6, %v1082_v9  ;;  %481 = vrot.lane.b32.xlu1 %v1214_v53, %s4490_s8 }
 0x153   : > { %479 = vrot.lane.b32.xlu0 %v1213_v51, %s4490_s8 }
 0x154   : > { %v1290_v13 = vpop.permute.xlu1 %1289 }
 0x155   : > { %v1288_v14 = vpop.permute.xlu0 %1287  ;;  %1379 = vst.msk [vmem:[#allocation2 + $0x68] sm:$0xff] %vm1365_vm7, %v1290_v13  ;;  %v602_v13 = vld [vmem:[%s4554_s29 + $0xca] sm:$0xff] }
 0x156   : > { %1378 = vst.msk [vmem:[#allocation2 + $0x60] sm:$0xff] %vm1365_vm7, %v1288_v14  ;;  %687 = vrot.lane.b32.xlu1 %v598_v11, %s4489_s30  ;;  %v601_v14 = vld [vmem:[%s4554_s29 + $0xc2] sm:$0xff] }
 0x157   : > { %685 = vrot.lane.b32.xlu0 %v597_v12, %s4489_s30 }
 0x158   : > { %v1496_v15 = vpop.permute.xlu1 %1495 }
 0x159   : > { %v1494_v16 = vpop.permute.xlu0 %1493  ;;  %1585 = vst.msk [vmem:[#allocation2 + $0x68] sm:$0xff] %vm1571_vm8, %v1496_v15 }
 0x15a   : > { %1584 = vst.msk [vmem:[#allocation2 + $0x60] sm:$0xff] %vm1571_vm8, %v1494_v16  ;;  %893 = vrot.lane.b32.xlu1 %v1626_v36, %s4492_s9 }
 0x15b   : > { %891 = vrot.lane.b32.xlu0 %v1625_v57, %s4492_s9 }
 0x15c   : > { %v1702_v17 = vpop.permute.xlu1 %1701 }
 0x15d   : > { %v1700_v18 = vpop.permute.xlu0 %1699  ;;  %1791 = vst.msk [vmem:[#allocation2 + $0x68] sm:$0xff] %vm1777_vm9, %v1702_v17  ;;  %v5261_v17 = vld [vmem:[#allocation4 + $0x9] sm:$0xff] }
 0x15e   : > { %1790 = vst.msk [vmem:[#allocation2 + $0x60] sm:$0xff] %vm1777_vm9, %v1700_v18  ;;  %1099 = vrot.lane.b32.xlu1 %v4887_v2, %s4493_s10 }
 0x15f   : > { %1097 = vrot.lane.b32.xlu0 %v4890_v5, %s4493_s10  ;;  %v1628_v5 = vld [vmem:[%s4554_s29 + $0xc7] sm:$0xff]  ;;  %2716 = vst.msk [vmem:[#allocation5 + $0x8] sm:$0xff] %vm278_vm12, %v5261_v17 }
 0x160   : > { %v1908_v19 = vpop.permute.xlu1 %1907 }
 0x161   : > { %v1906_v23 = vpop.permute.xlu0 %1905  ;;  %1997 = vst.msk [vmem:[#allocation2 + $0x68] sm:$0xff] %vm1983_vm10, %v1908_v19 }
 0x162   : > { %1996 = vst.msk [vmem:[#allocation2 + $0x60] sm:$0xff] %vm1983_vm10, %v1906_v23  ;;  %1305 = vrot.lane.b32.xlu1 %v1216_v21, %s4494_s11 }
 0x163   : > { %1303 = vrot.lane.b32.xlu0 %v1215_v22, %s4494_s11 }
 0x164   : > { %v470_v2 = vpop.permute.xlu1 %469 }
 0x165   : > { %v468_v24 = vpop.permute.xlu0 %467  ;;  %557 = vst.msk [vmem:[#allocation2 + $0x78] sm:$0xff] %vm541_vm3, %v470_v2  ;;  %v1220_v2 = vld [vmem:[%s4554_s29 + $0xd9] sm:$0xff] }
 0x166   : > { %556 = vst.msk [vmem:[#allocation2 + $0x70] sm:$0xff] %vm541_vm3, %v468_v24  ;;  %1511 = vrot.lane.b32.xlu1 %v1422_v41, %s4495_s16  ;;  %v1219_v24 = vld [vmem:[%s4554_s29 + $0xd1] sm:$0xff] }
 0x167   : > { %1509 = vrot.lane.b32.xlu0 %v1421_v3, %s4495_s16 }
 0x168   : > { %v676_v42 = vpop.permute.xlu1 %675  ;;  %v2032_v26 = vld [vmem:[#allocation2 + $0x68] sm:$0xff] }
 0x169   : > { %v674_v20 = vpop.permute.xlu0 %673  ;;  %v2031_v25 = vld [vmem:[#allocation2 + $0x60] sm:$0xff]  ;;  %763 = vst.msk [vmem:[#allocation2 + $0x78] sm:$0xff] %vm747_vm4, %v676_v42 }
 0x16a   : > { %762 = vst.msk [vmem:[#allocation2 + $0x70] sm:$0xff] %vm747_vm4, %v674_v20  ;;  %v2059_v27 = vpack.c.bf16 %v2032_v26, %v2031_v25  ;;  %1717 = vrot.lane.b32.xlu1 %v1628_v5, %s4496_s19  ;;  %v1426_v25 = vld [vmem:[%s4554_s29 + $0xe6] sm:$0xff]  ;;  %v1425_v26 = vld [vmem:[%s4554_s29 + $0xde] sm:$0xff] }
 0x16b   : > { %1715 = vrot.lane.b32.xlu0 %v1627_v4, %s4496_s19 }
 0x16c   : > { %4321 = vmatmul.mubr.msk.bf16.gmra.mrb[24].mxu0 %vm6194_vm11, %v2059_v27  ;;  %v882_v28 = vpop.permute.xlu1 %881 }
 0x16d   : > { %v880_v29 = vpop.permute.xlu0 %879  ;;  %4324 = vmatprep.mubr.msk.bf16.mxu0 %vm4497_vm1, %v4491_v10  ;;  %969 = vst.msk [vmem:[#allocation2 + $0x78] sm:$0xff] %vm953_vm5, %v882_v28 }
 0x16e   : > { %968 = vst.msk [vmem:[#allocation2 + $0x70] sm:$0xff] %vm953_vm5, %v880_v29  ;;  %1923 = vrot.lane.b32.xlu1 %v4944_v34, %s4498_s26 }
 0x16f   : > { %1921 = vrot.lane.b32.xlu0 %v4947_v37, %s4498_s26 }
 0x170   : > { %v1088_v32 = vpop.permute.xlu1 %1087 }
 0x171   : > { %v1086_v39 = vpop.permute.xlu0 %1085  ;;  %1175 = vst.msk [vmem:[#allocation2 + $0x78] sm:$0xff] %vm1159_vm6, %v1088_v32  ;;  %v5291_v32 = vld [vmem:[#allocation4 + $0x8] sm:$0xff] }
 0x172   : > { %1174 = vst.msk [vmem:[#allocation2 + $0x70] sm:$0xff] %vm1159_vm6, %v1086_v39  ;;  %485 = vrot.lane.b32.xlu1 %v1216_v21, %s4490_s8  ;;  %v1632_v39 = vld [vmem:[%s4554_s29 + $0xe7] sm:$0xff] }
 0x173   : > { %483 = vrot.lane.b32.xlu0 %v1215_v22, %s4490_s8  ;;  %2514 = vst.msk [vmem:[#allocation5 + $0x18] sm:$0xff] %vm278_vm12, %v5291_v32 }
 0x174   : > { %v1294_v44 = vpop.permute.xlu1 %1293 }
 0x175   : > { %v1292_v45 = vpop.permute.xlu0 %1291  ;;  %1381 = vst.msk [vmem:[#allocation2 + $0x78] sm:$0xff] %vm1365_vm7, %v1294_v44 }
 0x176   : > { %1380 = vst.msk [vmem:[#allocation2 + $0x70] sm:$0xff] %vm1365_vm7, %v1292_v45  ;;  %691 = vrot.lane.b32.xlu1 %v600_v40, %s4489_s30  ;;  %v1631_v40 = vld [vmem:[%s4554_s29 + $0xdf] sm:$0xff] }
 0x177   : > { %689 = vrot.lane.b32.xlu0 %v599_v43, %s4489_s30 }
 0x178   : > { %v1500_v46 = vpop.permute.xlu1 %1499 }
 0x179   : > { %v1498_v47 = vpop.permute.xlu0 %1497  ;;  %1587 = vst.msk [vmem:[#allocation2 + $0x78] sm:$0xff] %vm1571_vm8, %v1500_v46 }
 0x17a   : > { %1586 = vst.msk [vmem:[#allocation2 + $0x70] sm:$0xff] %vm1571_vm8, %v1498_v47  ;;  %897 = vrot.lane.b32.xlu1 %v1628_v5, %s4492_s9 }
 0x17b   : > { %895 = vrot.lane.b32.xlu0 %v1627_v4, %s4492_s9 }
 0x17c   : > { %v1706_v48 = vpop.permute.xlu1 %1705 }
 0x17d   : > { %v1704_v49 = vpop.permute.xlu0 %1703  ;;  %1793 = vst.msk [vmem:[#allocation2 + $0x78] sm:$0xff] %vm1777_vm9, %v1706_v48 }
 0x17e   : > { %1792 = vst.msk [vmem:[#allocation2 + $0x70] sm:$0xff] %vm1777_vm9, %v1704_v49  ;;  %1103 = vrot.lane.b32.xlu1 %v4944_v34, %s4493_s10  ;;  %v1424_v34 = vld [vmem:[%s4554_s29 + $0xd6] sm:$0xff] }
 0x17f   : > { %1101 = vrot.lane.b32.xlu0 %v4947_v37, %s4493_s10  ;;  %v2203_v53 = vpop.f32.mrb[0].mxu0  ;;  %v1423_v37 = vld [vmem:[%s4554_s29 + $0xce] sm:$0xff] }
 0x180   : > { %v4298_v51 = vpop.f32.mrb[1].mxu0  ;;  %v1912_v55 = vpop.permute.xlu1 %1911 }
 0x181   : > { %v1910_v56 = vpop.permute.xlu0 %1909  ;;  %1999 = vst.msk [vmem:[#allocation2 + $0x78] sm:$0xff] %vm1983_vm10, %v1912_v55  ;;  %v2206_v35 = vpop.f32.mrb[2].mxu0 }
 0x182   : > { %1998 = vst.msk [vmem:[#allocation2 + $0x70] sm:$0xff] %vm1983_vm10, %v1910_v56  ;;  %v4299_v30 = vpop.f32.mrb[3].mxu0  ;;  %1309 = vrot.lane.b32.xlu1 %v1218_v52, %s4494_s11 }
 0x183   : > { %1307 = vrot.lane.b32.xlu0 %v1217_v54, %s4494_s11 }
 0x184   : > { %v474_v36 = vpop.permute.xlu1 %473 }
 0x185   : > { %v472_v57 = vpop.permute.xlu0 %471  ;;  %559 = vst.msk [vmem:[#allocation2 + $0x88] sm:$0xff] %vm541_vm3, %v474_v36 }
 0x186   : > { %558 = vst.msk [vmem:[#allocation2 + $0x80] sm:$0xff] %vm541_vm3, %v472_v57  ;;  %1515 = vrot.lane.b32.xlu1 %v1424_v34, %s4495_s16 }
 0x187   : > { %1513 = vrot.lane.b32.xlu0 %v1423_v37, %s4495_s16 }
 0x188   : > { %v680_v59 = vpop.permute.xlu1 %679  ;;  %v2034_v62 = vld [vmem:[#allocation2 + $0x78] sm:$0xff] }
 0x189   : > { %v678_v60 = vpop.permute.xlu0 %677  ;;  %v2033_v61 = vld [vmem:[#allocation2 + $0x70] sm:$0xff]  ;;  %765 = vst.msk [vmem:[#allocation2 + $0x88] sm:$0xff] %vm747_vm4, %v680_v59  ;;  %v1221_v59 = vld [vmem:[%s4554_s29 + $0xe1] sm:$0xff] }
 0x18a   : > { %764 = vst.msk [vmem:[#allocation2 + $0x80] sm:$0xff] %vm747_vm4, %v678_v60  ;;  %v2060_v63 = vpack.c.bf16 %v2034_v62, %v2033_v61  ;;  %1721 = vrot.lane.b32.xlu1 %v1630_v31, %s4496_s19 }
 0x18b   : > { %1719 = vrot.lane.b32.xlu0 %v1629_v58, %s4496_s19 }
 0x18c   : > { %4325 = vmatmul.mubr.msk.bf16.gmra.mrb[28].mxu0 %vm6194_vm11, %v2060_v63  ;;  %v886_v8 = vpop.permute.xlu1 %885 }
 0x18d   : > { %v884_v9 = vpop.permute.xlu0 %883  ;;  %4328 = vmatprep.mubr.msk.bf16.mxu0 %vm4497_vm1, %v4491_v10  ;;  %971 = vst.msk [vmem:[#allocation2 + $0x88] sm:$0xff] %vm953_vm5, %v886_v8  ;;  %v1428_v8 = vld [vmem:[%s4554_s29 + $0xf6] sm:$0xff] }
 0x18e   : > { %970 = vst.msk [vmem:[#allocation2 + $0x80] sm:$0xff] %vm953_vm5, %v884_v9  ;;  %1927 = vrot.lane.b32.xlu1 %v5025_v1, %s4498_s26  ;;  %v1427_v9 = vld [vmem:[%s4554_s29 + $0xee] sm:$0xff] }
 0x18f   : > { %1925 = vrot.lane.b32.xlu0 %v5032_v6, %s4498_s26 }
 0x190   : > { %v1092_v11 = vpop.permute.xlu1 %1091 }
 0x191   : > { %v1090_v12 = vpop.permute.xlu0 %1089  ;;  %1177 = vst.msk [vmem:[#allocation2 + $0x88] sm:$0xff] %vm1159_vm6, %v1092_v11 }
 0x192   : > { %1176 = vst.msk [vmem:[#allocation2 + $0x80] sm:$0xff] %vm1159_vm6, %v1090_v12  ;;  %489 = vrot.lane.b32.xlu1 %v1218_v52, %s4490_s8  ;;  %v604_v52 = vld [vmem:[%s4554_s29 + $0xda] sm:$0xff] }
 0x193   : > { %487 = vrot.lane.b32.xlu0 %v1217_v54, %s4490_s8  ;;  %v603_v54 = vld [vmem:[%s4554_s29 + $0xd2] sm:$0xff] }
 0x194   : > { %v1298_v15 = vpop.permute.xlu1 %1297 }
 0x195   : > { %v1296_v16 = vpop.permute.xlu0 %1295  ;;  %1383 = vst.msk [vmem:[#allocation2 + $0x88] sm:$0xff] %vm1365_vm7, %v1298_v15  ;;  %v1633_v15 = vld [vmem:[%s4554_s29 + $0xef] sm:$0xff] }
 0x196   : > { %1382 = vst.msk [vmem:[#allocation2 + $0x80] sm:$0xff] %vm1365_vm7, %v1296_v16  ;;  %695 = vrot.lane.b32.xlu1 %v602_v13, %s4489_s30 }
 0x197   : > { %693 = vrot.lane.b32.xlu0 %v601_v14, %s4489_s30  ;;  %v1634_v14 = vld [vmem:[%s4554_s29 + $0xf7] sm:$0xff] }
 0x198   : > { %v1504_v18 = vpop.permute.xlu1 %1503 }
 0x199   : > { %v1502_v21 = vpop.permute.xlu0 %1501  ;;  %1589 = vst.msk [vmem:[#allocation2 + $0x88] sm:$0xff] %vm1571_vm8, %v1504_v18 }
 0x19a   : > { %1588 = vst.msk [vmem:[#allocation2 + $0x80] sm:$0xff] %vm1571_vm8, %v1502_v21  ;;  %901 = vrot.lane.b32.xlu1 %v1630_v31, %s4492_s9 }
 0x19b   : > { %899 = vrot.lane.b32.xlu0 %v1629_v58, %s4492_s9  ;;  %v1222_v58 = vld [vmem:[%s4554_s29 + $0xe9] sm:$0xff] }
 0x19c   : > { %v1710_v22 = vpop.permute.xlu1 %1709 }
 0x19d   : > { %v1708_v19 = vpop.permute.xlu0 %1707  ;;  %1795 = vst.msk [vmem:[#allocation2 + $0x88] sm:$0xff] %vm1777_vm9, %v1710_v22 }
 0x19e   : > { %1794 = vst.msk [vmem:[#allocation2 + $0x80] sm:$0xff] %vm1777_vm9, %v1708_v19  ;;  %1107 = vrot.lane.b32.xlu1 %v5025_v1, %s4493_s10 }
 0x19f   : > { %1105 = vrot.lane.b32.xlu0 %v5032_v6, %s4493_s10  ;;  %v2211_v23 = vpop.f32.mrb[4].mxu0 }
 0x1a0   : > { %v2212_v41 = vadd.f32 %v5216_v50, %v2211_v23  ;;  %v4302_v3 = vpop.f32.mrb[5].mxu0  ;;  %v1916_v5 = vpop.permute.xlu1 %1915 }
 0x1a1   : > { %v1914_v4 = vpop.permute.xlu0 %1913  ;;  %2001 = vst.msk [vmem:[#allocation2 + $0x88] sm:$0xff] %vm1983_vm10, %v1916_v5  ;;  %v2214_v20 = vpop.f32.mrb[6].mxu0 }
 0x1a2   : > { %v2340_v42 = vmax.f32 %v2212_v41, 0.0  ;;  %2000 = vst.msk [vmem:[#allocation2 + $0x80] sm:$0xff] %vm1983_vm10, %v1914_v4  ;;  %v2215_v1 = vadd.f32 %v5216_v50, %v2214_v20  ;;  %v4303_v6 = vpop.f32.mrb[7].mxu0  ;;  %1313 = vrot.lane.b32.xlu1 %v1220_v2, %s4494_s11 }
 0x1a3   : > { %1311 = vrot.lane.b32.xlu0 %v1219_v24, %s4494_s11 }
 0x1a4   : > { %2374 = vst.msk [vmem:[#allocation3 + $0x10] sm:$0xff] %vm278_vm12, %v2340_v42  ;;  %v2341_v27 = vmax.f32 %v2215_v1, 0.0  ;;  %v478_v28 = vpop.permute.xlu1 %477 }
 0x1a5   : > { %v476_v29 = vpop.permute.xlu0 %475  ;;  %561 = vst.msk [vmem:[#allocation2 + $0x98] sm:$0xff] %vm541_vm3, %v478_v28 }
 0x1a6   : > { %560 = vst.msk [vmem:[#allocation2 + $0x90] sm:$0xff] %vm541_vm3, %v476_v29  ;;  %1519 = vrot.lane.b32.xlu1 %v1426_v25, %s4495_s16  ;;  %v606_v25 = vld [vmem:[%s4554_s29 + $0xea] sm:$0xff] }
 0x1a7   : > { %2375 = vst.msk [vmem:[#allocation3 + $0x18] sm:$0xff] %vm278_vm12, %v2341_v27  ;;  %1517 = vrot.lane.b32.xlu0 %v1425_v26, %s4495_s16  ;;  %v605_v26 = vld [vmem:[%s4554_s29 + $0xe2] sm:$0xff] }
 0x1a8   : > { %v684_v43 = vpop.permute.xlu1 %683  ;;  %v2036_v46 = vld [vmem:[#allocation2 + $0x88] sm:$0xff] }
 0x1a9   : > { %v682_v44 = vpop.permute.xlu0 %681  ;;  %v2035_v45 = vld [vmem:[#allocation2 + $0x80] sm:$0xff]  ;;  %767 = vst.msk [vmem:[#allocation2 + $0x98] sm:$0xff] %vm747_vm4, %v684_v43 }
 0x1aa   : > { %766 = vst.msk [vmem:[#allocation2 + $0x90] sm:$0xff] %vm747_vm4, %v682_v44  ;;  %v2061_v47 = vpack.c.bf16 %v2036_v46, %v2035_v45  ;;  %1725 = vrot.lane.b32.xlu1 %v1632_v39, %s4496_s19 }
 0x1ab   : > { %1723 = vrot.lane.b32.xlu0 %v1631_v40, %s4496_s19 }
 0x1ac   : > { %4329 = vmatmul.mubr.msk.bf16.gmra.mrb[32].mxu0 %vm6194_vm11, %v2061_v47  ;;  %v890_v48 = vpop.permute.xlu1 %889 }
 0x1ad   : > { %v888_v49 = vpop.permute.xlu0 %887  ;;  %4332 = vmatprep.mubr.msk.bf16.mxu0 %vm4497_vm1, %v4491_v10  ;;  %973 = vst.msk [vmem:[#allocation2 + $0x98] sm:$0xff] %vm953_vm5, %v890_v48 }
 0x1ae   : > { %972 = vst.msk [vmem:[#allocation2 + $0x90] sm:$0xff] %vm953_vm5, %v888_v49  ;;  %1931 = vrot.lane.b32.xlu1 %v5086_v33, %s4498_s26  ;;  %v2408_v23 = vld [vmem:[#allocation3 + $0x10] ss:$2 sm:$0x3f] }
 0x1af   : > { %1929 = vrot.lane.b32.xlu0 %v5089_v38, %s4498_s26  ;;  %v2410_v41 = vld [vmem:[#allocation3 + $0x11] ss:$2 sm:$0x3f] }
 0x1b0   : > { %v1096_v53 = vpop.permute.xlu1 %1095  ;;  %v2415_v4 = vmax.f32 %v2408_v23, %v2410_v41 }
 0x1b1   : > { %v1094_v51 = vpop.permute.xlu0 %1093  ;;  %1179 = vst.msk [vmem:[#allocation2 + $0x98] sm:$0xff] %vm1159_vm6, %v1096_v53  ;;  %v1224_v53 = vld [vmem:[%s4554_s29 + $0xf9] sm:$0xff] }
 0x1b2   : > { %1178 = vst.msk [vmem:[#allocation2 + $0x90] sm:$0xff] %vm1159_vm6, %v1094_v51  ;;  %493 = vrot.lane.b32.xlu1 %v1220_v2, %s4490_s8  ;;  %v1223_v51 = vld [vmem:[%s4554_s29 + $0xf1] sm:$0xff] }
 0x1b3   : > { %491 = vrot.lane.b32.xlu0 %v1219_v24, %s4490_s8 }
 0x1b4   : > { %v1302_v55 = vpop.permute.xlu1 %1301 }
 0x1b5   : > { %v1300_v56 = vpop.permute.xlu0 %1299  ;;  %1385 = vst.msk [vmem:[#allocation2 + $0x98] sm:$0xff] %vm1365_vm7, %v1302_v55 }
 0x1b6   : > { %1384 = vst.msk [vmem:[#allocation2 + $0x90] sm:$0xff] %vm1365_vm7, %v1300_v56  ;;  %699 = vrot.lane.b32.xlu1 %v604_v52, %s4489_s30 }
 0x1b7   : > { %697 = vrot.lane.b32.xlu0 %v603_v54, %s4489_s30 }
 0x1b8   : > { %v1508_v35 = vpop.permute.xlu1 %1507 }
 0x1b9   : > { %v1506_v30 = vpop.permute.xlu0 %1505  ;;  %1591 = vst.msk [vmem:[#allocation2 + $0x98] sm:$0xff] %vm1571_vm8, %v1508_v35  ;;  %v1430_v35 = vld [vmem:[%s4554_s29 + $0x106] sm:$0xff] }
 0x1ba   : > { %1590 = vst.msk [vmem:[#allocation2 + $0x90] sm:$0xff] %vm1571_vm8, %v1506_v30  ;;  %905 = vrot.lane.b32.xlu1 %v1632_v39, %s4492_s9  ;;  %v1429_v30 = vld [vmem:[%s4554_s29 + $0xfe] sm:$0xff] }
 0x1bb   : > { %903 = vrot.lane.b32.xlu0 %v1631_v40, %s4492_s9 }
 0x1bc   : > { %v1714_v34 = vpop.permute.xlu1 %1713 }
 0x1bd   : > { %v1712_v37 = vpop.permute.xlu0 %1711  ;;  %1797 = vst.msk [vmem:[#allocation2 + $0x98] sm:$0xff] %vm1777_vm9, %v1714_v34 }
 0x1be   : > { %1796 = vst.msk [vmem:[#allocation2 + $0x90] sm:$0xff] %vm1777_vm9, %v1712_v37  ;;  %1111 = vrot.lane.b32.xlu1 %v5086_v33, %s4493_s10 }
 0x1bf   : > { %1109 = vrot.lane.b32.xlu0 %v5089_v38, %s4493_s10  ;;  %v2219_v36 = vpop.f32.mrb[8].mxu0 }
 0x1c0   : > { %v2220_v57 = vadd.f32 %v5216_v50, %v2219_v36  ;;  %v4306_v31 = vpop.f32.mrb[9].mxu0  ;;  %v1920_v60 = vpop.permute.xlu1 %1919 }
 0x1c1   : > { %v1918_v61 = vpop.permute.xlu0 %1917  ;;  %2003 = vst.msk [vmem:[#allocation2 + $0x98] sm:$0xff] %vm1983_vm10, %v1920_v60  ;;  %v2222_v63 = vpop.f32.mrb[10].mxu0  ;;  %v1635_v31 = vld [vmem:[%s4554_s29 + $0xff] sm:$0xff] }
 0x1c2   : > { %v2342_v62 = vmax.f32 %v2220_v57, 0.0  ;;  %2002 = vst.msk [vmem:[#allocation2 + $0x90] sm:$0xff] %vm1983_vm10, %v1918_v61  ;;  %v2223_v33 = vadd.f32 %v5216_v50, %v2222_v63  ;;  %v4307_v38 = vpop.f32.mrb[11].mxu0  ;;  %1317 = vrot.lane.b32.xlu1 %v1222_v58, %s4494_s11  ;;  %v1636_v57 = vld [vmem:[%s4554_s29 + $0x107] sm:$0xff] }
 0x1c3   : > { %1315 = vrot.lane.b32.xlu0 %v1221_v59, %s4494_s11  ;;  %v1842_v63 = vld [vmem:[%s4554_s29 + $0x108] sm:$0xff] }
 0x1c4   : > { %2376 = vst.msk [vmem:[#allocation3 + $0x20] sm:$0xff] %vm278_vm12, %v2342_v62  ;;  %v2343_v11 = vmax.f32 %v2223_v33, 0.0  ;;  %v482_v12 = vpop.permute.xlu1 %481  ;;  %v1841_v33 = vld [vmem:[%s4554_s29 + $0x100] sm:$0xff] }
 0x1c5   : > { %v480_v13 = vpop.permute.xlu0 %479  ;;  %563 = vst.msk [vmem:[#allocation2 + $0xa8] sm:$0xff] %vm541_vm3, %v482_v12  ;;  %v608_v12 = vld [vmem:[%s4554_s29 + $0xfa] sm:$0xff] }
 0x1c6   : > { %562 = vst.msk [vmem:[#allocation2 + $0xa0] sm:$0xff] %vm541_vm3, %v480_v13  ;;  %1523 = vrot.lane.b32.xlu1 %v1428_v8, %s4495_s16  ;;  %v607_v13 = vld [vmem:[%s4554_s29 + $0xf2] sm:$0xff] }
 0x1c7   : > { %2377 = vst.msk [vmem:[#allocation3 + $0x28] sm:$0xff] %vm278_vm12, %v2343_v11  ;;  %1521 = vrot.lane.b32.xlu0 %v1427_v9, %s4495_s16 }
 0x1c8   : > { %v688_v16 = vpop.permute.xlu1 %687  ;;  %v2038_v22 = vld [vmem:[#allocation2 + $0x98] sm:$0xff] }
 0x1c9   : > { %v686_v18 = vpop.permute.xlu0 %685  ;;  %v2037_v21 = vld [vmem:[#allocation2 + $0x90] sm:$0xff]  ;;  %769 = vst.msk [vmem:[#allocation2 + $0xa8] sm:$0xff] %vm747_vm4, %v688_v16 }
 0x1ca   : > { %768 = vst.msk [vmem:[#allocation2 + $0xa0] sm:$0xff] %vm747_vm4, %v686_v18  ;;  %v2062_v19 = vpack.c.bf16 %v2038_v22, %v2037_v21  ;;  %1729 = vrot.lane.b32.xlu1 %v1634_v14, %s4496_s19 }
 0x1cb   : > { %1727 = vrot.lane.b32.xlu0 %v1633_v15, %s4496_s19 }
 0x1cc   : > { %4333 = vmatmul.mubr.msk.bf16.gmra.mrb[36].mxu0 %vm6194_vm11, %v2062_v19  ;;  %v894_v3 = vpop.permute.xlu1 %893 }
 0x1cd   : > { %v892_v2 = vpop.permute.xlu0 %891  ;;  %4336 = vmatprep.mubr.msk.bf16.mxu0 %vm4497_vm1, %v4491_v10  ;;  %975 = vst.msk [vmem:[#allocation2 + $0xa8] sm:$0xff] %vm953_vm5, %v894_v3  ;;  %v1226_v3 = vld [vmem:[%s4554_s29 + $0x109] sm:$0xff] }
 0x1ce   : > { %v2412_v24 = vld [vmem:[#allocation3 + $0x1f] ss:$2 sm:$0x3f]  ;;  %v2414_v5 = vld [vmem:[#allocation3 + $0x20] ss:$2 sm:$0x3f]  ;;  %1935 = vrot.lane.b32.xlu1 %v5143_v0, %s4498_s26 }
 0x1cf   : > { %974 = vst.msk [vmem:[#allocation2 + $0xa0] sm:$0xff] %vm953_vm5, %v892_v2  ;;  %v2416_v42 = vmax.f32 %v2412_v24, %v2414_v5  ;;  %1933 = vrot.lane.b32.xlu0 %v5146_v7, %s4498_s26  ;;  %v1225_v2 = vld [vmem:[%s4554_s29 + $0x101] sm:$0xff] }
 0x1d0   : > { %v1100_v1 = vpop.permute.xlu1 %1099 }
 0x1d1   : > { %v2417_v20 = vmax.f32 %v2415_v4, %v2416_v42  ;;  %v1098_v6 = vpop.permute.xlu0 %1097  ;;  %1181 = vst.msk [vmem:[#allocation2 + $0xa8] sm:$0xff] %vm1159_vm6, %v1100_v1 }
 0x1d2   : > { %1180 = vst.msk [vmem:[#allocation2 + $0xa0] sm:$0xff] %vm1159_vm6, %v1098_v6  ;;  %497 = vrot.lane.b32.xlu1 %v1222_v58, %s4490_s8  ;;  %v4425_v6 = vld [vmem:[%s6189_s3 + $0x40] sm:$0xff]  }
 0x1d3   : > { %495 = vrot.lane.b32.xlu0 %v1221_v59, %s4490_s8  ;;  %2418 = vst.msk [vmem:[#allocation4 + $0x12] sm:$0x3f] %vm2405_vm13, %v2417_v20  ;;  %4171 = vmatprep.subr.bf16.mxu1 %v4425_v6 }
 0x1d4   : > { %v1306_v27 = vpop.permute.xlu1 %1305 }
 0x1d5   : > { %v1304_v28 = vpop.permute.xlu0 %1303  ;;  %1387 = vst.msk [vmem:[#allocation2 + $0xa8] sm:$0xff] %vm1365_vm7, %v1306_v27  ;;  %v4426_v27 = vld [vmem:[%s6189_s3] sm:$0xff]  }
 0x1d6   : > { %1386 = vst.msk [vmem:[#allocation2 + $0xa0] sm:$0xff] %vm1365_vm7, %v1304_v28  ;;  %703 = vrot.lane.b32.xlu1 %v606_v25, %s4489_s30  ;;  %v1432_v25 = vld [vmem:[%s4554_s29 + $0x116] sm:$0xff]  ;;  %4172 = vmatpush3.bf16.msra.mxu1 %v4426_v27 }
 0x1d7   : > { %701 = vrot.lane.b32.xlu0 %v605_v26, %s4489_s30  ;;  %v1431_v26 = vld [vmem:[%s4554_s29 + $0x10e] sm:$0xff] }
 0x1d8   : > { %v1512_v29 = vpop.permute.xlu1 %1511 }
 0x1d9   : > { %v1510_v39 = vpop.permute.xlu0 %1509  ;;  %1593 = vst.msk [vmem:[#allocation2 + $0xa8] sm:$0xff] %vm1571_vm8, %v1512_v29 }
 0x1da   : > { %1592 = vst.msk [vmem:[#allocation2 + $0xa0] sm:$0xff] %vm1571_vm8, %v1510_v39  ;;  %v5374_v40 = vld [vmem:[#allocation4 + $0x10] sm:$0xff]  ;;  %909 = vrot.lane.b32.xlu1 %v1634_v14, %s4492_s9 }
 0x1db   : > { %v5376_v43 = vld [vmem:[#allocation4 + $0x11] sm:$0xff]  ;;  %907 = vrot.lane.b32.xlu0 %v1633_v15, %s4492_s9  ;;  %2515 = vst.msk [vmem:[#allocation5 + $0x30] sm:$0xff] %vm278_vm12, %v5374_v40 }
 0x1dc   : > { %2717 = vst.msk [vmem:[#allocation5 + $0x20] sm:$0xff] %vm278_vm12, %v5376_v43  ;;  %v2906_v44 = vld [vmem:[#allocation4 + $0x12] sm:$0xff]  ;;  %v1718_v45 = vpop.permute.xlu1 %1717 }
 0x1dd   : > { %2916 = vst.msk [vmem:[#allocation5 + $0x10] sm:$0xff] %vm278_vm12, %v2906_v44  ;;  %v1716_v46 = vpop.permute.xlu0 %1715  ;;  %v4427_v44 = vld [vmem:[%s6189_s3 + $0x48] sm:$0xff]  }
 0x1de   : > { %1799 = vst.msk [vmem:[#allocation2 + $0xa8] sm:$0xff] %vm1777_vm9, %v1718_v45  ;;  %1798 = vst.msk [vmem:[#allocation2 + $0xa0] sm:$0xff] %vm1777_vm9, %v1716_v46  ;;  %1115 = vrot.lane.b32.xlu1 %v5143_v0, %s4493_s10  ;;  %v1638_v45 = vld [vmem:[%s4554_s29 + $0x117] sm:$0xff]  ;;  %v1637_v46 = vld [vmem:[%s4554_s29 + $0x10f] sm:$0xff]  ;;  %4173 = vmatprep.subr.bf16.mxu1 %v4427_v44 }
 0x1df   : > { %1113 = vrot.lane.b32.xlu0 %v5146_v7, %s4493_s10  ;;  %v2227_v47 = vpop.f32.mrb[12].mxu0 }
 0x1e0   : > { %v2228_v48 = vadd.f32 %v5216_v50, %v2227_v47  ;;  %v4310_v49 = vpop.f32.mrb[13].mxu0  ;;  %v1924_v52 = vpop.permute.xlu1 %1923  ;;  %v4428_v47 = vld [vmem:[%s6189_s3 + $0x8] sm:$0xff]  }
 0x1e1   : > { %v1922_v54 = vpop.permute.xlu0 %1921  ;;  %2005 = vst.msk [vmem:[#allocation2 + $0xa8] sm:$0xff] %vm1983_vm10, %v1924_v52  ;;  %v2230_v56 = vpop.f32.mrb[14].mxu0  ;;  %4174 = vmatpush3.bf16.msra.mxu1 %v4428_v47 }
 0x1e2   : > { %v2344_v55 = vmax.f32 %v2228_v48, 0.0  ;;  %2004 = vst.msk [vmem:[#allocation2 + $0xa0] sm:$0xff] %vm1983_vm10, %v1922_v54  ;;  %v2231_v0 = vadd.f32 %v5216_v50, %v2230_v56  ;;  %v4311_v7 = vpop.f32.mrb[15].mxu0  ;;  %1321 = vrot.lane.b32.xlu1 %v1224_v53, %s4494_s11  ;;  %v4429_v56 = vld [vmem:[%s6189_s3 + $0x50] sm:$0xff]  }
 0x1e3   : > { %1319 = vrot.lane.b32.xlu0 %v1223_v51, %s4494_s11  ;;  %v1843_v7 = vld [vmem:[%s4554_s29 + $0x110] sm:$0xff]  ;;  %4175 = vmatprep.subr.bf16.mxu1 %v4429_v56 }
 0x1e4   : > { %2378 = vst.msk [vmem:[#allocation3 + $0x30] sm:$0xff] %vm278_vm12, %v2344_v55  ;;  %v2345_v34 = vmax.f32 %v2231_v0, 0.0  ;;  %v486_v37 = vpop.permute.xlu1 %485  ;;  %v1844_v55 = vld [vmem:[%s4554_s29 + $0x118] sm:$0xff] }
 0x1e5   : > { %v484_v36 = vpop.permute.xlu0 %483  ;;  %565 = vst.msk [vmem:[#allocation2 + $0xb8] sm:$0xff] %vm541_vm3, %v486_v37 }
 0x1e6   : > { %564 = vst.msk [vmem:[#allocation2 + $0xb0] sm:$0xff] %vm541_vm3, %v484_v36  ;;  %1527 = vrot.lane.b32.xlu1 %v1430_v35, %s4495_s16  ;;  %v4430_v35 = vld [vmem:[%s6189_s3 + $0x10] sm:$0xff]  }
 0x1e7   : > { %2379 = vst.msk [vmem:[#allocation3 + $0x38] sm:$0xff] %vm278_vm12, %v2345_v34  ;;  %1525 = vrot.lane.b32.xlu0 %v1429_v30, %s4495_s16  ;;  %4176 = vmatpush3.bf16.msra.mxu1 %v4430_v35 }
 0x1e8   : > { %v692_v58 = vpop.permute.xlu1 %691  ;;  %v2040_v61 = vld [vmem:[#allocation2 + $0xa8] sm:$0xff] }
 0x1e9   : > { %v690_v59 = vpop.permute.xlu0 %689  ;;  %v2039_v60 = vld [vmem:[#allocation2 + $0xa0] sm:$0xff]  ;;  %771 = vst.msk [vmem:[#allocation2 + $0xb8] sm:$0xff] %vm747_vm4, %v692_v58  ;;  %v4431_v58 = vld [vmem:[%s6189_s3 + $0x58] sm:$0xff]  }
 0x1ea   : > { %770 = vst.msk [vmem:[#allocation2 + $0xb0] sm:$0xff] %vm747_vm4, %v690_v59  ;;  %v2063_v62 = vpack.c.bf16 %v2040_v61, %v2039_v60  ;;  %1733 = vrot.lane.b32.xlu1 %v1636_v57, %s4496_s19  ;;  %v2726_v59 = vld [vmem:[#allocation4 + $0xa] sm:$0xff]  ;;  %v2503_v60 = vld [vmem:[#allocation4] sm:$0xff]  ;;  %v4432_v61 = vld [vmem:[%s6189_s3 + $0x18] sm:$0xff]   ;;  %4177 = vmatprep.subr.bf16.mxu1 %v4431_v58 }
 0x1eb   : > { %1731 = vrot.lane.b32.xlu0 %v1635_v31, %s4496_s19  ;;  %2513 = vst.msk [vmem:[#allocation5] sm:$0xff] %vm278_vm12, %v2503_v60  ;;  %4178 = vmatpush3.bf16.msra.mxu1 %v4432_v61 }
 0x1ec   : > { %4337 = vmatmul.mubr.msk.bf16.gmra.mrb[40].mxu0 %vm6194_vm11, %v2063_v62  ;;  %v898_v38 = vpop.permute.xlu1 %897 }
 0x1ed   : > { %v896_v8 = vpop.permute.xlu0 %895  ;;  %4340 = vmatprep.mubr.msk.bf16.mxu0 %vm4497_vm1, %v4491_v10  ;;  %977 = vst.msk [vmem:[#allocation2 + $0xb8] sm:$0xff] %vm953_vm5, %v898_v38  ;;  %v5498_v38 = vld [vmem:[#allocation4 + $0x12] sm:$0xff] }
 0x1ee   : > { %976 = vst.msk [vmem:[#allocation2 + $0xb0] sm:$0xff] %vm953_vm5, %v896_v8  ;;  %1939 = vrot.lane.b32.xlu1 %v1842_v63, %s4498_s26  ;;  %v2420_v54 = vld [vmem:[#allocation3 + $0x2e] ss:$2 sm:$0x3f] }
 0x1ef   : > { %1937 = vrot.lane.b32.xlu0 %v1841_v33, %s4498_s26  ;;  %v2422_v0 = vld [vmem:[#allocation3 + $0x2f] ss:$2 sm:$0x3f] }
 0x1f0   : > { %v1104_v9 = vpop.permute.xlu1 %1103  ;;  %v4433_v8 = vld [vmem:[%s6189_s3 + $0x60] sm:$0xff]  }
 0x1f1   : > { %v1102_v11 = vpop.permute.xlu0 %1101  ;;  %1183 = vst.msk [vmem:[#allocation2 + $0xb8] sm:$0xff] %vm1159_vm6, %v1104_v9  ;;  %v4434_v9 = vld [vmem:[%s6189_s3 + $0x20] sm:$0xff]   ;;  %4179 = vmatprep.subr.bf16.mxu1 %v4433_v8 }
 0x1f2   : > { %1182 = vst.msk [vmem:[#allocation2 + $0xb0] sm:$0xff] %vm1159_vm6, %v1102_v11  ;;  %501 = vrot.lane.b32.xlu1 %v1224_v53, %s4490_s8  ;;  %v2523_v11 = vld [vmem:[#allocation4 + $0x1] sm:$0xff]  ;;  %4180 = vmatpush3.bf16.msra.mxu1 %v4434_v9 }
 0x1f3   : > { %499 = vrot.lane.b32.xlu0 %v1223_v51, %s4490_s8 }
 0x1f4   : > { %v1310_v14 = vpop.permute.xlu1 %1309 }
 0x1f5   : > { %v1308_v15 = vpop.permute.xlu0 %1307  ;;  %1389 = vst.msk [vmem:[#allocation2 + $0xb8] sm:$0xff] %vm1365_vm7, %v1310_v14  ;;  %v4435_v14 = vld [vmem:[%s6189_s3 + $0x68] sm:$0xff]  }
 0x1f6   : > { %1388 = vst.msk [vmem:[#allocation2 + $0xb0] sm:$0xff] %vm1365_vm7, %v1308_v15  ;;  %707 = vrot.lane.b32.xlu1 %v608_v12, %s4489_s30  ;;  %4181 = vmatprep.subr.bf16.mxu1 %v4435_v14  ;;  %v4436_v15 = vld [vmem:[%s6189_s3 + $0x28] sm:$0xff]  }
 0x1f7   : > { %705 = vrot.lane.b32.xlu0 %v607_v13, %s4489_s30  ;;  %4182 = vmatpush3.bf16.msra.mxu1 %v4436_v15 }
 0x1f8   : > { %v1516_v16 = vpop.permute.xlu1 %1515 }
 0x1f9   : > { %v1514_v18 = vpop.permute.xlu0 %1513  ;;  %1595 = vst.msk [vmem:[#allocation2 + $0xb8] sm:$0xff] %vm1571_vm8, %v1516_v16 }
 0x1fa   : > { %1594 = vst.msk [vmem:[#allocation2 + $0xb0] sm:$0xff] %vm1571_vm8, %v1514_v18  ;;  %913 = vrot.lane.b32.xlu1 %v1636_v57, %s4492_s9  ;;  %v2427_v57 = vmax.f32 %v2420_v54, %v2422_v0 }
 0x1fb   : > { %911 = vrot.lane.b32.xlu0 %v1635_v31, %s4492_s9 }
 0x1fc   : > { %v1722_v21 = vpop.permute.xlu1 %1721 }
 0x1fd   : > { %v1720_v22 = vpop.permute.xlu0 %1719  ;;  %1801 = vst.msk [vmem:[#allocation2 + $0xb8] sm:$0xff] %vm1777_vm9, %v1722_v21 }
 0x1fe   : > { %1800 = vst.msk [vmem:[#allocation2 + $0xb0] sm:$0xff] %vm1777_vm9, %v1720_v22  ;;  %1119 = vrot.lane.b32.xlu1 %v1842_v63, %s4493_s10 }
 0x1ff   : > { %1117 = vrot.lane.b32.xlu0 %v1841_v33, %s4493_s10  ;;  %v2235_v19 = vpop.f32.mrb[16].mxu0 }
 0x200   : > { %v2236_v23 = vadd.f32 %v5216_v50, %v2235_v19  ;;  %v4314_v41 = vpop.f32.mrb[17].mxu0  ;;  %v1928_v24 = vpop.permute.xlu1 %1927 }
 0x201   : > { %v1926_v5 = vpop.permute.xlu0 %1925  ;;  %2007 = vst.msk [vmem:[#allocation2 + $0xb8] sm:$0xff] %vm1983_vm10, %v1928_v24  ;;  %v2238_v42 = vpop.f32.mrb[18].mxu0  ;;  %v4438_v41 = vld [vmem:[%s6189_s3 + $0x30] sm:$0xff]  }
 0x202   : > { %v2346_v4 = vmax.f32 %v2236_v23, 0.0  ;;  %2006 = vst.msk [vmem:[#allocation2 + $0xb0] sm:$0xff] %vm1983_vm10, %v1926_v5  ;;  %v2239_v20 = vadd.f32 %v5216_v50, %v2238_v42  ;;  %v4315_v1 = vpop.f32.mrb[19].mxu0  ;;  %1325 = vrot.lane.b32.xlu1 %v1226_v3, %s4494_s11  ;;  %v2584_v23 = vld [vmem:[#allocation4 + $0x2] sm:$0xff]  ;;  %v4439_v5 = vld [vmem:[%s6189_s3 + $0x78] sm:$0xff]  }
 0x203   : > { %1323 = vrot.lane.b32.xlu0 %v1225_v2, %s4494_s11 }
 0x204   : > { %2380 = vst.msk [vmem:[#allocation3 + $0x40] sm:$0xff] %vm278_vm12, %v2346_v4  ;;  %v2347_v28 = vmax.f32 %v2239_v20, 0.0  ;;  %v490_v29 = vpop.permute.xlu1 %489  ;;  %v4440_v20 = vld [vmem:[%s6189_s3 + $0x38] sm:$0xff]  }
 0x205   : > { %v488_v39 = vpop.permute.xlu0 %487  ;;  %567 = vst.msk [vmem:[#allocation2 + $0xc8] sm:$0xff] %vm541_vm3, %v490_v29 }
 0x206   : > { %566 = vst.msk [vmem:[#allocation2 + $0xc0] sm:$0xff] %vm541_vm3, %v488_v39  ;;  %1531 = vrot.lane.b32.xlu1 %v1432_v25, %s4495_s16 }
 0x207   : > { %2381 = vst.msk [vmem:[#allocation3 + $0x48] sm:$0xff] %vm278_vm12, %v2347_v28  ;;  %1529 = vrot.lane.b32.xlu0 %v1431_v26, %s4495_s16 }
 0x208   : > { %v696_v48 = vpop.permute.xlu1 %695  ;;  %v2042_v51 = vld [vmem:[#allocation2 + $0xb8] sm:$0xff] }
 0x209   : > { %v694_v49 = vpop.permute.xlu0 %693  ;;  %v2041_v53 = vld [vmem:[#allocation2 + $0xb0] sm:$0xff]  ;;  %773 = vst.msk [vmem:[#allocation2 + $0xc8] sm:$0xff] %vm747_vm4, %v696_v48 }
 0x20a   : > { %772 = vst.msk [vmem:[#allocation2 + $0xc0] sm:$0xff] %vm747_vm4, %v694_v49  ;;  %v2064_v52 = vpack.c.bf16 %v2042_v51, %v2041_v53  ;;  %1737 = vrot.lane.b32.xlu1 %v1638_v45, %s4496_s19 }
 0x20b   : > { %1735 = vrot.lane.b32.xlu0 %v1637_v46, %s4496_s19  ;;  %v2424_v37 = vld [vmem:[#allocation3 + $0x3d] ss:$2 sm:$0x3f] }
 0x20c   : > { %4341 = vmatmul.mubr.msk.bf16.gmra.mrb[44].mxu0 %vm6194_vm11, %v2064_v52  ;;  %v902_v30 = vpop.permute.xlu1 %901 }
 0x20d   : > { %v900_v34 = vpop.permute.xlu0 %899  ;;  %4344 = vmatprep.mubr.msk.bf16.mxu0 %vm4497_vm1, %v4491_v10  ;;  %979 = vst.msk [vmem:[#allocation2 + $0xc8] sm:$0xff] %vm953_vm5, %v902_v30 }
 0x20e   : > { %v2426_v36 = vld [vmem:[#allocation3 + $0x3e] ss:$2 sm:$0x3f]  ;;  %978 = vst.msk [vmem:[#allocation2 + $0xc0] sm:$0xff] %vm953_vm5, %v900_v34  ;;  %1943 = vrot.lane.b32.xlu1 %v1844_v55, %s4498_s26 }
 0x20f   : > { %v2428_v31 = vmax.f32 %v2424_v37, %v2426_v36  ;;  %1941 = vrot.lane.b32.xlu0 %v1843_v7, %s4498_s26 }
 0x210   : > { %v1108_v63 = vpop.permute.xlu1 %1107 }
 0x211   : > { %v2429_v62 = vmax.f32 %v2427_v57, %v2428_v31  ;;  %v1106_v33 = vpop.permute.xlu0 %1105  ;;  %1185 = vst.msk [vmem:[#allocation2 + $0xc8] sm:$0xff] %vm1159_vm6, %v1108_v63 }
 0x212   : > { %1184 = vst.msk [vmem:[#allocation2 + $0xc0] sm:$0xff] %vm1159_vm6, %v1106_v33  ;;  %2748 = vrot.lane.b32.xlu1 %v5498_v38, %s4493_s10 }
 0x213   : > { %2746 = vrot.lane.b32.xlu0 %v2726_v59, %s4493_s10  ;;  %2430 = vst.msk [vmem:[#allocation4 + $0x1a] sm:$0x3f] %vm2405_vm13, %v2429_v62 }
 0x214   : > { %v1314_v12 = vpop.permute.xlu1 %1313 }
 0x215   : > { %v1312_v13 = vpop.permute.xlu0 %1311  ;;  %1391 = vst.msk [vmem:[#allocation2 + $0xc8] sm:$0xff] %vm1365_vm7, %v1314_v12 }
 0x216   : > { %1390 = vst.msk [vmem:[#allocation2 + $0xc0] sm:$0xff] %vm1365_vm7, %v1312_v13  ;;  %2545 = vrot.lane.b32.xlu1 %v5261_v17, %s4493_s10  ;;  %v4437_v17 = vld [vmem:[%s6189_s3 + $0x70] sm:$0xff]  }
 0x217   : > { %2543 = vrot.lane.b32.xlu0 %v2523_v11, %s4493_s10  ;;  %4183 = vmatprep.subr.bf16.mxu1 %v4437_v17 }
 0x218   : > { %v1520_v16 = vpop.permute.xlu1 %1519  ;;  %4184 = vmatpush3.bf16.msra.mxu1 %v4438_v41 }
 0x219   : > { %v1518_v18 = vpop.permute.xlu0 %1517  ;;  %1597 = vst.msk [vmem:[#allocation2 + $0xc8] sm:$0xff] %vm1571_vm8, %v1520_v16  ;;  %4185 = vmatprep.subr.bf16.mxu1 %v4439_v5 }
 0x21a   : > { %1596 = vst.msk [vmem:[#allocation2 + $0xc0] sm:$0xff] %vm1571_vm8, %v1518_v18  ;;  %v5523_v21 = vld [vmem:[#allocation4 + $0x18] sm:$0xff] }
 0x21b   : > { %v5525_v22 = vld [vmem:[#allocation4 + $0x19] sm:$0xff]  ;;  %2806 = vrot.lane.b32.xlu0 %v5374_v40, %s4498_s26  ;;  %2808 = vrot.lane.b32.xlu1 %v5523_v21, %s4498_s26  ;;  %2516 = vst.msk [vmem:[#allocation5 + $0x48] sm:$0xff] %vm278_vm12, %v5523_v21 }
 0x21c   : > { %2718 = vst.msk [vmem:[#allocation5 + $0x38] sm:$0xff] %vm278_vm12, %v5525_v22  ;;  %v2907_v19 = vld [vmem:[#allocation4 + $0x1a] sm:$0xff]  ;;  %v1726_v3 = vpop.permute.xlu1 %1725  ;;  %4186 = vmatpush3.bf16.msra.mxu1 %v4440_v20 }
 0x21d   : > { %2917 = vst.msk [vmem:[#allocation5 + $0x28] sm:$0xff] %vm278_vm12, %v2907_v19  ;;  %v1724_v2 = vpop.permute.xlu0 %1723  ;;  %4364 = vmatprep.subr.bf16.mxu1 %v4491_v10  ;;  %v5571_v49 = vld [vmem:[#allocation4 + $0x1a] sm:$0xff] }
 0x21e   : > { %1803 = vst.msk [vmem:[#allocation2 + $0xc8] sm:$0xff] %vm1777_vm9, %v1726_v3  ;;  %1802 = vst.msk [vmem:[#allocation2 + $0xc0] sm:$0xff] %vm1777_vm9, %v1724_v2 }
 0x21f   : > { %2604 = vrot.lane.b32.xlu0 %v2584_v23, %s4498_s26  ;;  %2606 = vrot.lane.b32.xlu1 %v2726_v59, %s4498_s26  ;;  %v2243_v24 = vpop.f32.mrb[20].mxu0 }
 0x220   : > { %v2244_v4 = vadd.f32 %v5216_v50, %v2243_v24  ;;  %v4318_v42 = vpop.f32.mrb[21].mxu0  ;;  %v1932_v1 = vpop.permute.xlu1 %1931 }
 0x221   : > { %v1930_v6 = vpop.permute.xlu0 %1929  ;;  %2009 = vst.msk [vmem:[#allocation2 + $0xc8] sm:$0xff] %vm1983_vm10, %v1932_v1  ;;  %v2246_v26 = vpop.f32.mrb[22].mxu0 }
 0x222   : > { %v2348_v25 = vmax.f32 %v2244_v4, 0.0  ;;  %2008 = vst.msk [vmem:[#allocation2 + $0xc0] sm:$0xff] %vm1983_vm10, %v1930_v6  ;;  %v2247_v27 = vadd.f32 %v5216_v50, %v2246_v26  ;;  %v4319_v28 = vpop.f32.mrb[23].mxu0 }
 0x223   : > { %2866 = vrot.lane.b32.xlu0 %v5376_v43, %s4499_s22  ;;  %2868 = vrot.lane.b32.xlu1 %v5525_v22, %s4499_s22 }
 0x224   : > { %2382 = vst.msk [vmem:[#allocation3 + $0x50] sm:$0xff] %vm278_vm12, %v2348_v25  ;;  %v2349_v29 = vmax.f32 %v2247_v27, 0.0  ;;  %v494_v39 = vpop.permute.xlu1 %493  ;;  %v5636_v27 = vld [vmem:[%s6188_s2] ss:$0 sm:$0xff] }
 0x225   : > { %v492_v44 = vpop.permute.xlu0 %491  ;;  %569 = vst.msk [vmem:[#allocation2 + $0xd8] sm:$0xff] %vm541_vm3, %v494_v39 }
 0x226   : > { %568 = vst.msk [vmem:[#allocation2 + $0xd0] sm:$0xff] %vm541_vm3, %v492_v44 }
 0x227   : > { %2383 = vst.msk [vmem:[#allocation3 + $0x58] sm:$0xff] %vm278_vm12, %v2349_v29  ;;  %2665 = vrot.lane.b32.xlu0 %v5291_v32, %s4499_s22  ;;  %2667 = vrot.lane.b32.xlu1 %v5374_v40, %s4499_s22 }
 0x228   : > { %v700_v45 = vpop.permute.xlu1 %699  ;;  %v2044_v48 = vld [vmem:[#allocation2 + $0xc8] sm:$0xff] }
 0x229   : > { %v698_v46 = vpop.permute.xlu0 %697  ;;  %v2043_v47 = vld [vmem:[#allocation2 + $0xc0] sm:$0xff]  ;;  %775 = vst.msk [vmem:[#allocation2 + $0xd8] sm:$0xff] %vm747_vm4, %v700_v45 }
 0x22a   : > { %774 = vst.msk [vmem:[#allocation2 + $0xd0] sm:$0xff] %vm747_vm4, %v698_v46  ;;  %v2065_v53 = vpack.c.bf16 %v2044_v48, %v2043_v47 }
 0x22b   : > { %2750 = vrot.lane.b32.xlu0 %v5571_v49, %s4493_s10  ;;  %v2432_v63 = vld [vmem:[#allocation3 + $0x4c] ss:$2 sm:$0x3f]  ;;  %v2434_v33 = vld [vmem:[#allocation3 + $0x4d] ss:$2 sm:$0x3f] }
 0x22c   : > { %4345 = vmatmul.mubr.msk.bf16.gmra.mrb[48].mxu0 %vm6194_vm11, %v2065_v53  ;;  %v906_v32 = vpop.permute.xlu1 %905  ;;  %v2439_v15 = vmax.f32 %v2432_v63, %v2434_v33 }
 0x22d   : > { %v904_v51 = vpop.permute.xlu0 %903  ;;  %4348 = vmatprep.mubr.msk.bf16.mxu0 %vm4497_vm1, %v4491_v10  ;;  %981 = vst.msk [vmem:[#allocation2 + $0xd8] sm:$0xff] %vm953_vm5, %v906_v32 }
 0x22e   : > { %980 = vst.msk [vmem:[#allocation2 + $0xd0] sm:$0xff] %vm953_vm5, %v904_v51 }
 0x22f   : > { %2547 = vrot.lane.b32.xlu0 %v5376_v43, %s4493_s10 }
 0x230   : > { %v1112_v40 = vpop.permute.xlu1 %1111 }
 0x231   : > { %v1110_v52 = vpop.permute.xlu0 %1109  ;;  %1187 = vst.msk [vmem:[#allocation2 + $0xd8] sm:$0xff] %vm1159_vm6, %v1112_v40 }
 0x232   : > { %1186 = vst.msk [vmem:[#allocation2 + $0xd0] sm:$0xff] %vm1159_vm6, %v1110_v52 }
 0x234   : > { %v1318_v54 = vpop.permute.xlu1 %1317 }
 0x235   : > { %v1316_v55 = vpop.permute.xlu0 %1315  ;;  %1393 = vst.msk [vmem:[#allocation2 + $0xd8] sm:$0xff] %vm1365_vm7, %v1318_v54 }
 0x236   : > { %1392 = vst.msk [vmem:[#allocation2 + $0xd0] sm:$0xff] %vm1365_vm7, %v1316_v55 }
 0x238   : > { %v1524_v56 = vpop.permute.xlu1 %1523 }
 0x239   : > { %v1522_v0 = vpop.permute.xlu0 %1521  ;;  %1599 = vst.msk [vmem:[#allocation2 + $0xd8] sm:$0xff] %vm1571_vm8, %v1524_v56 }
 0x23a   : > { %1598 = vst.msk [vmem:[#allocation2 + $0xd0] sm:$0xff] %vm1571_vm8, %v1522_v0 }
 0x23c   : > { %v1730_v7 = vpop.permute.xlu1 %1729 }
 0x23d   : > { %v1728_v43 = vpop.permute.xlu0 %1727  ;;  %1805 = vst.msk [vmem:[#allocation2 + $0xd8] sm:$0xff] %vm1777_vm9, %v1730_v7 }
 0x23e   : > { %1804 = vst.msk [vmem:[#allocation2 + $0xd0] sm:$0xff] %vm1777_vm9, %v1728_v43 }
 0x23f   : > { %v2251_v35 = vpop.f32.mrb[24].mxu0 }
 0x240   : > { %v2252_v30 = vadd.f32 %v5216_v50, %v2251_v35  ;;  %v4322_v34 = vpop.f32.mrb[25].mxu0  ;;  %v1936_v37 = vpop.permute.xlu1 %1935 }
 0x241   : > { %v1934_v36 = vpop.permute.xlu0 %1933  ;;  %2011 = vst.msk [vmem:[#allocation2 + $0xd8] sm:$0xff] %vm1983_vm10, %v1936_v37  ;;  %v2254_v31 = vpop.f32.mrb[26].mxu0 }
 0x242   : > { %v2350_v57 = vmax.f32 %v2252_v30, 0.0  ;;  %2010 = vst.msk [vmem:[#allocation2 + $0xd0] sm:$0xff] %vm1983_vm10, %v1934_v36  ;;  %v2255_v58 = vadd.f32 %v5216_v50, %v2254_v31  ;;  %v4323_v59 = vpop.f32.mrb[27].mxu0 }
 0x244   : > { %2384 = vst.msk [vmem:[#allocation3 + $0x60] sm:$0xff] %vm278_vm12, %v2350_v57  ;;  %v2351_v60 = vmax.f32 %v2255_v58, 0.0  ;;  %v498_v61 = vpop.permute.xlu1 %497 }
 0x245   : > { %v496_v62 = vpop.permute.xlu0 %495  ;;  %571 = vst.msk [vmem:[#allocation2 + $0xe8] sm:$0xff] %vm541_vm3, %v498_v61 }
 0x246   : > { %570 = vst.msk [vmem:[#allocation2 + $0xe0] sm:$0xff] %vm541_vm3, %v496_v62 }
 0x247   : > { %2385 = vst.msk [vmem:[#allocation3 + $0x68] sm:$0xff] %vm278_vm12, %v2351_v60 }
 0x248   : > { %v704_v8 = vpop.permute.xlu1 %703  ;;  %v2046_v12 = vld [vmem:[#allocation2 + $0xd8] sm:$0xff] }
 0x249   : > { %v702_v9 = vpop.permute.xlu0 %701  ;;  %v2045_v11 = vld [vmem:[#allocation2 + $0xd0] sm:$0xff]  ;;  %777 = vst.msk [vmem:[#allocation2 + $0xe8] sm:$0xff] %vm747_vm4, %v704_v8 }
 0x24a   : > { %776 = vst.msk [vmem:[#allocation2 + $0xe0] sm:$0xff] %vm747_vm4, %v702_v9  ;;  %v2066_v50 = vpack.c.bf16 %v2046_v12, %v2045_v11 }
 0x24b   : > { %v2436_v13 = vld [vmem:[#allocation3 + $0x5b] ss:$2 sm:$0x3f]  ;;  %v2438_v14 = vld [vmem:[#allocation3 + $0x5c] ss:$2 sm:$0x3f] }
 0x24c   : > { %v2440_v16 = vmax.f32 %v2436_v13, %v2438_v14  ;;  %4349 = vmatmul.mubr.msk.bf16.gmra.mrb[52].mxu0 %vm6194_vm11, %v2066_v50  ;;  %v910_v18 = vpop.permute.xlu1 %909 }
 0x24d   : > { %v908_v17 = vpop.permute.xlu0 %907  ;;  %4352 = vmatprep.mubr.msk.bf16.mxu0 %vm4497_vm1, %v4491_v10  ;;  %983 = vst.msk [vmem:[#allocation2 + $0xe8] sm:$0xff] %vm953_vm5, %v910_v18 }
 0x24e   : > { %v2441_v19 = vmax.f32 %v2439_v15, %v2440_v16  ;;  %982 = vst.msk [vmem:[#allocation2 + $0xe0] sm:$0xff] %vm953_vm5, %v908_v17 }
 0x250   : > { %2442 = vst.msk [vmem:[#allocation4 + $0x22] sm:$0x3f] %vm2405_vm13, %v2441_v19  ;;  %v1116_v23 = vpop.permute.xlu1 %1115 }
 0x251   : > { %v1114_v41 = vpop.permute.xlu0 %1113  ;;  %1189 = vst.msk [vmem:[#allocation2 + $0xe8] sm:$0xff] %vm1159_vm6, %v1116_v23 }
 0x252   : > { %1188 = vst.msk [vmem:[#allocation2 + $0xe0] sm:$0xff] %vm1159_vm6, %v1114_v41 }
 0x254   : > { %v1322_v3 = vpop.permute.xlu1 %1321 }
 0x255   : > { %v1320_v2 = vpop.permute.xlu0 %1319  ;;  %1395 = vst.msk [vmem:[#allocation2 + $0xe8] sm:$0xff] %vm1365_vm7, %v1322_v3 }
 0x256   : > { %1394 = vst.msk [vmem:[#allocation2 + $0xe0] sm:$0xff] %vm1365_vm7, %v1320_v2 }
 0x257   : > { %v5610_v24 = vld [vmem:[#allocation4 + $0x20] sm:$0xff] }
 0x258   : > { %v5612_v5 = vld [vmem:[#allocation4 + $0x22] sm:$0xff]  ;;  %2810 = vrot.lane.b32.xlu0 %v5610_v24, %s4498_s26  ;;  %2517 = vst.msk [vmem:[#allocation5 + $0x60] sm:$0xff] %vm278_vm12, %v5610_v24  ;;  %v1528_v20 = vpop.permute.xlu1 %1527 }
 0x259   : > { %v5614_v4 = vld [vmem:[#allocation4 + $0x21] sm:$0xff]  ;;  %2752 = vrot.lane.b32.xlu1 %v5612_v5, %s4493_s10  ;;  %v1526_v1 = vpop.permute.xlu0 %1525  ;;  %1601 = vst.msk [vmem:[#allocation2 + $0xe8] sm:$0xff] %vm1571_vm8, %v1528_v20 }
 0x25a   : > { %2719 = vst.msk [vmem:[#allocation5 + $0x50] sm:$0xff] %vm278_vm12, %v5614_v4  ;;  %v2908_v42 = vld [vmem:[#allocation4 + $0x22] sm:$0xff] }
 0x25b   : > { %2918 = vst.msk [vmem:[#allocation5 + $0x40] sm:$0xff] %vm278_vm12, %v2908_v42 }
 0x25c   : > { %1600 = vst.msk [vmem:[#allocation2 + $0xe0] sm:$0xff] %vm1571_vm8, %v1526_v1  ;;  %2608 = vrot.lane.b32.xlu0 %v5498_v38, %s4498_s26  ;;  %v1734_v6 = vpop.permute.xlu1 %1733 }
 0x25d   : > { %2549 = vrot.lane.b32.xlu1 %v5525_v22, %s4493_s10  ;;  %v1732_v25 = vpop.permute.xlu0 %1731  ;;  %1807 = vst.msk [vmem:[#allocation2 + $0xe8] sm:$0xff] %vm1777_vm9, %v1734_v6 }
 0x25e   : > { %1806 = vst.msk [vmem:[#allocation2 + $0xe0] sm:$0xff] %vm1777_vm9, %v1732_v25 }
 0x25f   : > { %v2259_v26 = vpop.f32.mrb[28].mxu0 }
 0x260   : > { %v2260_v28 = vadd.f32 %v5636_v27, %v2259_v26  ;;  %2870 = vrot.lane.b32.xlu0 %v5614_v4, %s4499_s22  ;;  %v4326_v38 = vpop.f32.mrb[29].mxu0  ;;  %v1940_v29 = vpop.permute.xlu1 %1939 }
 0x261   : > { %v1938_v22 = vpop.permute.xlu0 %1937  ;;  %2013 = vst.msk [vmem:[#allocation2 + $0xe8] sm:$0xff] %vm1983_vm10, %v1940_v29  ;;  %v2262_v44 = vpop.f32.mrb[30].mxu0 }
 0x262   : > { %v2352_v39 = vmax.f32 %v2260_v28, 0.0  ;;  %2012 = vst.msk [vmem:[#allocation2 + $0xe0] sm:$0xff] %vm1983_vm10, %v1938_v22  ;;  %v2263_v45 = vadd.f32 %v5636_v27, %v2262_v44  ;;  %v4327_v46 = vpop.f32.mrb[31].mxu0 }
 0x264   : > { %2386 = vst.msk [vmem:[#allocation3 + $0x70] sm:$0xff] %vm278_vm12, %v2352_v39  ;;  %2669 = vrot.lane.b32.xlu0 %v5523_v21, %s4499_s22  ;;  %v2353_v47 = vmax.f32 %v2263_v45, 0.0  ;;  %v502_v48 = vpop.permute.xlu1 %501 }
 0x265   : > { %v500_v53 = vpop.permute.xlu0 %499  ;;  %573 = vst.msk [vmem:[#allocation2 + $0xf8] sm:$0xff] %vm541_vm3, %v502_v48 }
 0x266   : > { %572 = vst.msk [vmem:[#allocation2 + $0xf0] sm:$0xff] %vm541_vm3, %v500_v53 }
 0x267   : > { %2387 = vst.msk [vmem:[#allocation3 + $0x78] sm:$0xff] %vm278_vm12, %v2353_v47 }
 0x268   : > { %v708_v32 = vpop.permute.xlu1 %707  ;;  %v2048_v52 = vld [vmem:[#allocation2 + $0xe8] sm:$0xff] }
 0x269   : > { %v706_v51 = vpop.permute.xlu0 %705  ;;  %v2047_v40 = vld [vmem:[#allocation2 + $0xe0] sm:$0xff]  ;;  %779 = vst.msk [vmem:[#allocation2 + $0xf8] sm:$0xff] %vm747_vm4, %v708_v32 }
 0x26a   : > { %778 = vst.msk [vmem:[#allocation2 + $0xf0] sm:$0xff] %vm747_vm4, %v706_v51  ;;  %v2067_v54 = vpack.c.bf16 %v2048_v52, %v2047_v40 }
 0x26b   : > { %v2444_v11 = vld [vmem:[#allocation3 + $0x6a] ss:$2 sm:$0x3f]  ;;  %v2446_v12 = vld [vmem:[#allocation3 + $0x6b] ss:$2 sm:$0x3f] }
 0x26c   : > { %4353 = vmatmul.mubr.msk.bf16.gmra.mrb[56].mxu0 %vm6194_vm11, %v2067_v54  ;;  %v914_v21 = vpop.permute.xlu1 %913  ;;  %v2451_v19 = vmax.f32 %v2444_v11, %v2446_v12 }
 0x26d   : > { %v912_v55 = vpop.permute.xlu0 %911  ;;  %4356 = vmatprep.mubr.msk.bf16.mxu0 %vm4497_vm1, %v4491_v10  ;;  %985 = vst.msk [vmem:[#allocation2 + $0xf8] sm:$0xff] %vm953_vm5, %v914_v21 }
 0x26e   : > { %984 = vst.msk [vmem:[#allocation2 + $0xf0] sm:$0xff] %vm953_vm5, %v912_v55 }
 0x270   : > { %v1120_v56 = vpop.permute.xlu1 %1119 }
 0x271   : > { %v1118_v0 = vpop.permute.xlu0 %1117  ;;  %1191 = vst.msk [vmem:[#allocation2 + $0xf8] sm:$0xff] %vm1159_vm6, %v1120_v56 }
 0x272   : > { %1190 = vst.msk [vmem:[#allocation2 + $0xf0] sm:$0xff] %vm1159_vm6, %v1118_v0 }
 0x274   : > { %v1326_v7 = vpop.permute.xlu1 %1325 }
 0x275   : > { %v1324_v43 = vpop.permute.xlu0 %1323  ;;  %1397 = vst.msk [vmem:[#allocation2 + $0xf8] sm:$0xff] %vm1365_vm7, %v1326_v7 }
 0x276   : > { %1396 = vst.msk [vmem:[#allocation2 + $0xf0] sm:$0xff] %vm1365_vm7, %v1324_v43 }
 0x278   : > { %v1532_v35 = vpop.permute.xlu1 %1531 }
 0x279   : > { %v1530_v30 = vpop.permute.xlu0 %1529  ;;  %1603 = vst.msk [vmem:[#allocation2 + $0xf8] sm:$0xff] %vm1571_vm8, %v1532_v35 }
 0x27a   : > { %1602 = vst.msk [vmem:[#allocation2 + $0xf0] sm:$0xff] %vm1571_vm8, %v1530_v30 }
 0x27c   : > { %v1738_v34 = vpop.permute.xlu1 %1737 }
 0x27d   : > { %v1736_v37 = vpop.permute.xlu0 %1735  ;;  %1809 = vst.msk [vmem:[#allocation2 + $0xf8] sm:$0xff] %vm1777_vm9, %v1738_v34 }
 0x27e   : > { %1808 = vst.msk [vmem:[#allocation2 + $0xf0] sm:$0xff] %vm1777_vm9, %v1736_v37 }
 0x27f   : > { %v2267_v36 = vpop.f32.mrb[32].mxu0 }
 0x280   : > { %v2268_v57 = vadd.f32 %v5636_v27, %v2267_v36  ;;  %v4330_v31 = vpop.f32.mrb[33].mxu0  ;;  %v1944_v58 = vpop.permute.xlu1 %1943 }
 0x281   : > { %v1942_v59 = vpop.permute.xlu0 %1941  ;;  %2015 = vst.msk [vmem:[#allocation2 + $0xf8] sm:$0xff] %vm1983_vm10, %v1944_v58  ;;  %v2270_v61 = vpop.f32.mrb[34].mxu0 }
 0x282   : > { %v2354_v60 = vmax.f32 %v2268_v57, 0.0  ;;  %2014 = vst.msk [vmem:[#allocation2 + $0xf0] sm:$0xff] %vm1983_vm10, %v1942_v59  ;;  %v2271_v62 = vadd.f32 %v5636_v27, %v2270_v61  ;;  %v4331_v63 = vpop.f32.mrb[35].mxu0 }
 0x284   : > { %2388 = vst.msk [vmem:[#allocation3 + $0x80] sm:$0xff] %vm278_vm12, %v2354_v60  ;;  %v2355_v33 = vmax.f32 %v2271_v62, 0.0  ;;  %v2749_v9 = vpop.permute.xlu1 %2748 }
 0x285   : > { %v2747_v8 = vpop.permute.xlu0 %2746  ;;  %2777 = vst.msk [vmem:[#allocation5 + $0x20] sm:$0xff] %vm2573_vm14, %v2749_v9 }
 0x286   : > { %2776 = vst.msk [vmem:[#allocation5 + $0x8] sm:$0xff] %vm2573_vm14, %v2747_v8 }
 0x287   : > { %2389 = vst.msk [vmem:[#allocation3 + $0x88] sm:$0xff] %vm278_vm12, %v2355_v33 }
 0x288   : > { %v2546_v13 = vpop.permute.xlu1 %2545  ;;  %v2050_v15 = vld [vmem:[#allocation2 + $0xf8] sm:$0xff] }
 0x289   : > { %v2544_v50 = vpop.permute.xlu0 %2543  ;;  %v2049_v14 = vld [vmem:[#allocation2 + $0xf0] sm:$0xff]  ;;  %2575 = vst.msk [vmem:[#allocation5 + $0x18] sm:$0xff] %vm2573_vm14, %v2546_v13 }
 0x28a   : > { %2574 = vst.msk [vmem:[#allocation5] sm:$0xff] %vm2573_vm14, %v2544_v50  ;;  %v2068_v16 = vpack.c.bf16 %v2050_v15, %v2049_v14 }
 0x28b   : > { %v2448_v18 = vld [vmem:[#allocation3 + $0x79] ss:$2 sm:$0x3f]  ;;  %v2450_v17 = vld [vmem:[#allocation3 + $0x7a] ss:$2 sm:$0x3f] }
 0x28c   : > { %v2452_v23 = vmax.f32 %v2448_v18, %v2450_v17  ;;  %4357 = vmatmul.mubr.msk.bf16.gmra.mrb[60].mxu0 %vm6194_vm11, %v2068_v16  ;;  %vm291_vm11 = vcmask 254976  }
 0x28d   : > { %v2807_v41 = vpop.permute.xlu0 %2806  ;;  %v2809_v3 = vpop.permute.xlu1 %2808  ;;  %4360 = vmatprep.mubr.msk.bf16.mxu0 %vm4497_vm1, %v4491_v10  ;;  %292 = vst.msk [vmem:[#allocation4 + $0x60] sm:$0x3] %vm291_vm11, %v4491_v10  ;;  %vm293_vm11 = vcmask 523264  }
 0x28e   : > { %v2453_v2 = vmax.f32 %v2451_v19, %v2452_v23  ;;  %2836 = vst.msk [vmem:[#allocation5 + $0x8] sm:$0xff] %vm2634_vm15, %v2807_v41  ;;  %2837 = vst.msk [vmem:[#allocation5 + $0x20] sm:$0xff] %vm2634_vm15, %v2809_v3 }
 0x28f   : > { %294 = vst.msk [vmem:[#allocation7] sm:$0xff] %vm293_vm11, %v4491_v10  ;;  %295 = vst.msk [vmem:[#allocation7 + $0x8] sm:$0xff] %vm293_vm11, %v4491_v10 }
 0x290   : > { %2454 = vst.msk [vmem:[#allocation4 + $0x2a] sm:$0x3f] %vm2405_vm13, %v2453_v2 }
 0x291   : > { %v2605_v42 = vpop.permute.xlu0 %2604  ;;  %v2607_v20 = vpop.permute.xlu1 %2606  ;;  %296 = vst.msk [vmem:[#allocation7 + $0x10] sm:$0xff] %vm293_vm11, %v4491_v10  ;;  %297 = vst.msk [vmem:[#allocation7 + $0x18] sm:$0xff] %vm293_vm11, %v4491_v10 }
 0x292   : > { %2635 = vst.msk [vmem:[#allocation5] sm:$0xff] %vm2634_vm15, %v2605_v42  ;;  %2636 = vst.msk [vmem:[#allocation5 + $0x18] sm:$0xff] %vm2634_vm15, %v2607_v20 }
 0x293   : > { %298 = vst.msk [vmem:[#allocation7 + $0x20] sm:$0xff] %vm293_vm11, %v4491_v10 }
 0x295   : > { %v2867_v1 = vpop.permute.xlu0 %2866  ;;  %v2869_v6 = vpop.permute.xlu1 %2868 }
 0x296   : > { %2896 = vst.msk [vmem:[#allocation5 + $0x8] sm:$0xff] %vm2695_vm2, %v2867_v1  ;;  %2897 = vst.msk [vmem:[#allocation5 + $0x20] sm:$0xff] %vm2695_vm2, %v2869_v6 }
 0x297   : > { %v5685_v25 = vld [vmem:[#allocation4 + $0x28] sm:$0xff] }
 0x298   : > { %v5687_v26 = vld [vmem:[#allocation4 + $0x2a] sm:$0xff]  ;;  %2812 = vrot.lane.b32.xlu1 %v5685_v25, %s4498_s26  ;;  %2518 = vst.msk [vmem:[#allocation5 + $0x78] sm:$0xff] %vm278_vm12, %v5685_v25 }
 0x299   : > { %v5689_v28 = vld [vmem:[#allocation4 + $0x29] sm:$0xff]  ;;  %2754 = vrot.lane.b32.xlu0 %v5687_v26, %s4493_s10  ;;  %2919 = vst.msk [vmem:[#allocation5 + $0x58] sm:$0xff] %vm278_vm12, %v5687_v26  ;;  %v2666_v38 = vpop.permute.xlu0 %2665  ;;  %v2668_v29 = vpop.permute.xlu1 %2667 }
 0x29a   : > { %2720 = vst.msk [vmem:[#allocation5 + $0x68] sm:$0xff] %vm278_vm12, %v5689_v28 }
 0x29b   : > { %2696 = vst.msk [vmem:[#allocation5] sm:$0xff] %vm2695_vm2, %v2666_v38  ;;  %2697 = vst.msk [vmem:[#allocation5 + $0x18] sm:$0xff] %vm2695_vm2, %v2668_v29  ;;  %v5760_v29 = vld [vmem:[#allocation4 + $0x52] sm:$0xff] }
 0x29c   : > { %2610 = vrot.lane.b32.xlu1 %v5571_v49, %s4498_s26  ;;  %2924 = vst.msk [vmem:[#allocation5 + $0xd0] sm:$0xff] %vm278_vm12, %v5760_v29 }
 0x29d   : > { %2551 = vrot.lane.b32.xlu0 %v5614_v4, %s4493_s10  ;;  %v2751_v22 = vpop.permute.xlu0 %2750  ;;  %v2927_v39 = vld [vmem:[#allocation5 + $0x8] sm:$0xff]  ;;  %v2930_v44 = vld [vmem:[#allocation5 + $0x20] sm:$0xff] }
 0x29e   : > { %2778 = vst.msk [vmem:[#allocation5 + $0x38] sm:$0xff] %vm2573_vm14, %v2751_v22  ;;  %v2957_v45 = vpack.c.bf16 %v2930_v44, %v2927_v39  ;;  %v5762_v22 = vld [vmem:[#allocation4 + $0x51] sm:$0xff] }
 0x29f   : > { %v2275_v46 = vpop.f32.mrb[36].mxu0  ;;  %2725 = vst.msk [vmem:[#allocation5 + $0xe0] sm:$0xff] %vm278_vm12, %v5762_v22 }
 0x2a0   : > { %v2276_v47 = vadd.f32 %v5636_v27, %v2275_v46  ;;  %3169 = vmatprep.mubr.bf16.mxu1 %v2957_v45  ;;  %2872 = vrot.lane.b32.xlu1 %v5689_v28, %s4499_s22  ;;  %v4334_v48 = vpop.f32.mrb[37].mxu0 }
 0x2a1   : > { %v2548_v53 = vpop.permute.xlu0 %2547  ;;  %v2278_v32 = vpop.f32.mrb[38].mxu0 }
 0x2a2   : > { %v2926_v49 = vld [vmem:[#allocation5] sm:$0xff]  ;;  %v2929_v51 = vld [vmem:[#allocation5 + $0x18] sm:$0xff]  ;;  %v2356_v40 = vmax.f32 %v2276_v47, 0.0  ;;  %2576 = vst.msk [vmem:[#allocation5 + $0x30] sm:$0xff] %vm2573_vm14, %v2548_v53  ;;  %v2279_v4 = vadd.f32 %v5636_v27, %v2278_v32  ;;  %v4335_v52 = vpop.f32.mrb[39].mxu0 }
 0x2a3   : > { %v2956_v54 = vpack.c.bf16 %v2929_v51, %v2926_v49 }
 0x2a4   : > { %2390 = vst.msk [vmem:[#allocation3 + $0x90] sm:$0xff] %vm278_vm12, %v2356_v40  ;;  %v2357_v21 = vmax.f32 %v2279_v4, 0.0  ;;  %2671 = vrot.lane.b32.xlu1 %v5610_v24, %s4499_s22 }
 0x2a5   : > { %3170 = vmatmul.mubr.bf16.vlgmr.msra.gmra.mrb[0].mxu1 %v2956_v54 }
 0x2a6   : > { %2391 = vst.msk [vmem:[#allocation3 + $0x98] sm:$0xff] %vm278_vm12, %v2357_v21 }
 0x2ab   : > { %v2456_v37 = vld [vmem:[#allocation3 + $0x88] ss:$2 sm:$0x3f]  ;;  %v2458_v36 = vld [vmem:[#allocation3 + $0x89] ss:$2 sm:$0x3f] }
 0x2ac   : > { %v2463_v59 = vmax.f32 %v2456_v37, %v2458_v36 }
 0x2bf   : > { %v2283_v55 = vpop.f32.mrb[40].mxu0 }
 0x2c0   : > { %v2284_v56 = vadd.f32 %v5636_v27, %v2283_v55  ;;  %v4338_v0 = vpop.f32.mrb[41].mxu0 }
 0x2c1   : > { %v2286_v7 = vpop.f32.mrb[42].mxu0 }
 0x2c2   : > { %v2358_v43 = vmax.f32 %v2284_v56, 0.0  ;;  %v2287_v35 = vadd.f32 %v5636_v27, %v2286_v7  ;;  %v4339_v30 = vpop.f32.mrb[43].mxu0 }
 0x2c4   : > { %2392 = vst.msk [vmem:[#allocation3 + $0xa0] sm:$0xff] %vm278_vm12, %v2358_v43  ;;  %v2359_v34 = vmax.f32 %v2287_v35, 0.0 }
 0x2c6   : > { %2393 = vst.msk [vmem:[#allocation3 + $0xa8] sm:$0xff] %vm278_vm12, %v2359_v34 }
 0x2ca   : > { %v2811_v57 = vpop.permute.xlu0 %2810 }
 0x2cb   : > { %v2753_v24 = vpop.permute.xlu1 %2752  ;;  %v2460_v31 = vld [vmem:[#allocation3 + $0x97] ss:$2 sm:$0x3f]  ;;  %v2462_v58 = vld [vmem:[#allocation3 + $0x98] ss:$2 sm:$0x3f] }
 0x2cc   : > { %2838 = vst.msk [vmem:[#allocation5 + $0x38] sm:$0xff] %vm2634_vm15, %v2811_v57  ;;  %v2464_v60 = vmax.f32 %v2460_v31, %v2462_v58 }
 0x2cd   : > { %2779 = vst.msk [vmem:[#allocation5 + $0x50] sm:$0xff] %vm2573_vm14, %v2753_v24 }
 0x2ce   : > { %v2465_v61 = vmax.f32 %v2463_v59, %v2464_v60  ;;  %v2609_v62 = vpop.permute.xlu0 %2608 }
 0x2cf   : > { %v2550_v63 = vpop.permute.xlu1 %2549  ;;  %2637 = vst.msk [vmem:[#allocation5 + $0x30] sm:$0xff] %vm2634_vm15, %v2609_v62 }
 0x2d0   : > { %2577 = vst.msk [vmem:[#allocation5 + $0x48] sm:$0xff] %vm2573_vm14, %v2550_v63 }
 0x2d1   : > { %2466 = vst.msk [vmem:[#allocation4 + $0x32] sm:$0x3f] %vm2405_vm13, %v2465_v61 }
 0x2d2   : > { %v2871_v33 = vpop.permute.xlu0 %2870 }
 0x2d3   : > { %2898 = vst.msk [vmem:[#allocation5 + $0x38] sm:$0xff] %vm2695_vm2, %v2871_v33 }
 0x2d6   : > { %v2670_v8 = vpop.permute.xlu0 %2669 }
 0x2d7   : > { %2698 = vst.msk [vmem:[#allocation5 + $0x30] sm:$0xff] %vm2695_vm2, %v2670_v8 }
 0x2d8   : > { %v5728_v9 = vld [vmem:[#allocation4 + $0x30] sm:$0xff] }
 0x2d9   : > { %v5730_v11 = vld [vmem:[#allocation4 + $0x32] sm:$0xff]  ;;  %2814 = vrot.lane.b32.xlu0 %v5728_v9, %s4498_s26  ;;  %2519 = vst.msk [vmem:[#allocation5 + $0x90] sm:$0xff] %vm278_vm12, %v5728_v9 }
 0x2da   : > { %v5732_v12 = vld [vmem:[#allocation4 + $0x31] sm:$0xff]  ;;  %2756 = vrot.lane.b32.xlu1 %v5730_v11, %s4493_s10  ;;  %2920 = vst.msk [vmem:[#allocation5 + $0x70] sm:$0xff] %vm278_vm12, %v5730_v11  ;;  %v2933_v52 = vld [vmem:[#allocation5 + $0x38] sm:$0xff] }
 0x2db   : > { %2721 = vst.msk [vmem:[#allocation5 + $0x80] sm:$0xff] %vm278_vm12, %v5732_v12 }
 0x2dd   : > { %2612 = vrot.lane.b32.xlu0 %v5612_v5, %s4498_s26 }
 0x2de   : > { %2553 = vrot.lane.b32.xlu1 %v5689_v28, %s4493_s10  ;;  %v2932_v55 = vld [vmem:[#allocation5 + $0x30] sm:$0xff] }
 0x2df   : > { %v2291_v50 = vpop.f32.mrb[44].mxu0 }
 0x2e0   : > { %v2292_v13 = vadd.f32 %v5636_v27, %v2291_v50  ;;  %v4342_v14 = vpop.f32.mrb[45].mxu0 }
 0x2e1   : > { %2874 = vrot.lane.b32.xlu0 %v5732_v12, %s4499_s22  ;;  %v2294_v15 = vpop.f32.mrb[46].mxu0 }
 0x2e2   : > { %v2360_v16 = vmax.f32 %v2292_v13, 0.0  ;;  %v2295_v18 = vadd.f32 %v5636_v27, %v2294_v15  ;;  %v4343_v17 = vpop.f32.mrb[47].mxu0 }
 0x2e4   : > { %2394 = vst.msk [vmem:[#allocation3 + $0xb0] sm:$0xff] %vm278_vm12, %v2360_v16  ;;  %v2361_v19 = vmax.f32 %v2295_v18, 0.0 }
 0x2e5   : > { %2673 = vrot.lane.b32.xlu0 %v5685_v25, %s4499_s22 }
 0x2e6   : > { %2395 = vst.msk [vmem:[#allocation3 + $0xb8] sm:$0xff] %vm278_vm12, %v2361_v19 }
 0x2eb   : > { %v2468_v6 = vld [vmem:[#allocation3 + $0xa6] ss:$2 sm:$0x3f]  ;;  %v2470_v28 = vld [vmem:[#allocation3 + $0xa7] ss:$2 sm:$0x3f] }
 0x2ec   : > { %v2475_v45 = vmax.f32 %v2468_v6, %v2470_v28 }
 0x2ed   : > { %v2472_v39 = vld [vmem:[#allocation3 + $0xb5] ss:$2 sm:$0x3f] }
 0x2ff   : > { %v2299_v5 = vpop.f32.mrb[48].mxu0 }
 0x300   : > { %v2300_v23 = vadd.f32 %v5636_v27, %v2299_v5  ;;  %v4346_v41 = vpop.f32.mrb[49].mxu0 }
 0x301   : > { %v2302_v3 = vpop.f32.mrb[50].mxu0 }
 0x302   : > { %v2362_v2 = vmax.f32 %v2300_v23, 0.0  ;;  %v2303_v42 = vadd.f32 %v5636_v27, %v2302_v3  ;;  %v4347_v20 = vpop.f32.mrb[51].mxu0 }
 0x304   : > { %2396 = vst.msk [vmem:[#allocation3 + $0xc0] sm:$0xff] %vm278_vm12, %v2362_v2  ;;  %v2363_v1 = vmax.f32 %v2303_v42, 0.0 }
 0x306   : > { %2397 = vst.msk [vmem:[#allocation3 + $0xc8] sm:$0xff] %vm278_vm12, %v2363_v1 }
 0x30a   : > { %v2813_v38 = vpop.permute.xlu1 %2812 }
 0x30b   : > { %v2755_v25 = vpop.permute.xlu0 %2754  ;;  %v2474_v44 = vld [vmem:[#allocation3 + $0xb6] ss:$2 sm:$0x3f]  ;;  %2839 = vst.msk [vmem:[#allocation5 + $0x50] sm:$0xff] %vm2634_vm15, %v2813_v38 }
 0x30c   : > { %2780 = vst.msk [vmem:[#allocation5 + $0x68] sm:$0xff] %vm2573_vm14, %v2755_v25  ;;  %v2476_v46 = vmax.f32 %v2472_v39, %v2474_v44 }
 0x30d   : > { %v2480_v57 = vld [vmem:[#allocation3 + $0xc4] ss:$2 sm:$0x3f]  ;;  %v2482_v24 = vld [vmem:[#allocation3 + $0xc5] ss:$2 sm:$0x3f] }
 0x30e   : > { %v2477_v47 = vmax.f32 %v2475_v45, %v2476_v46  ;;  %v2611_v48 = vpop.permute.xlu1 %2610  ;;  %v2487_v59 = vmax.f32 %v2480_v57, %v2482_v24 }
 0x30f   : > { %v2552_v53 = vpop.permute.xlu0 %2551  ;;  %2638 = vst.msk [vmem:[#allocation5 + $0x48] sm:$0xff] %vm2634_vm15, %v2611_v48 }
 0x310   : > { %2578 = vst.msk [vmem:[#allocation5 + $0x60] sm:$0xff] %vm2573_vm14, %v2552_v53 }
 0x311   : > { %2478 = vst.msk [vmem:[#allocation4 + $0x3a] sm:$0x3f] %vm2405_vm13, %v2477_v47 }
 0x312   : > { %v2873_v32 = vpop.permute.xlu1 %2872 }
 0x313   : > { %2899 = vst.msk [vmem:[#allocation5 + $0x50] sm:$0xff] %vm2695_vm2, %v2873_v32 }
 0x316   : > { %v2672_v49 = vpop.permute.xlu1 %2671 }
 0x317   : > { %2699 = vst.msk [vmem:[#allocation5 + $0x48] sm:$0xff] %vm2695_vm2, %v2672_v49 }
 0x318   : > { %v2791_v51 = vld [vmem:[#allocation4 + $0x38] sm:$0xff] }
 0x319   : > { %v5776_v40 = vld [vmem:[#allocation4 + $0x3a] sm:$0xff]  ;;  %2816 = vrot.lane.b32.xlu1 %v2791_v51, %s4498_s26  ;;  %2520 = vst.msk [vmem:[#allocation5 + $0xa8] sm:$0xff] %vm278_vm12, %v2791_v51 }
 0x31a   : > { %v2851_v4 = vld [vmem:[#allocation4 + $0x39] sm:$0xff]  ;;  %2758 = vrot.lane.b32.xlu0 %v5776_v40, %s4493_s10  ;;  %2921 = vst.msk [vmem:[#allocation5 + $0x88] sm:$0xff] %vm278_vm12, %v5776_v40 }
 0x31b   : > { %2722 = vst.msk [vmem:[#allocation5 + $0x98] sm:$0xff] %vm278_vm12, %v2851_v4  ;;  %v2936_v54 = vld [vmem:[#allocation5 + $0x50] sm:$0xff] }
 0x31c   : > { %v2960_v21 = vpack.c.bf16 %v2936_v54, %v2933_v52  ;;  %v4441_v52 = vld [vmem:[%s6189_s3 + $0x80] sm:$0xff]  }
 0x31d   : > { %2614 = vrot.lane.b32.xlu1 %v5687_v26, %s4498_s26  ;;  %4365 = vmatpush3.bf16.msra.mxu1 %v4441_v52  ;;  %v2934_v52 = vld [vmem:[#allocation5 + $0x40] sm:$0xff] }
 0x31e   : > { %2555 = vrot.lane.b32.xlu0 %v5732_v12, %s4493_s10  ;;  %3177 = vmatprep.mubr.bf16.mxu1 %v2960_v21  ;;  %v2935_v56 = vld [vmem:[#allocation5 + $0x48] sm:$0xff] }
 0x31f   : > { %v2307_v0 = vpop.f32.mrb[52].mxu0  ;;  %v2959_v7 = vpack.c.bf16 %v2935_v56, %v2932_v55  ;;  %4366 = vmatprep.subr.bf16.mxu1 %v4491_v10  ;;  %v2794_v21 = vld [vmem:[#allocation4 + $0x50] sm:$0xff] }
 0x320   : > { %v2308_v43 = vadd.f32 %v5636_v27, %v2307_v0  ;;  %v4350_v35 = vpop.f32.mrb[53].mxu0 }
 0x321   : > { %2876 = vrot.lane.b32.xlu1 %v2851_v4, %s4499_s22  ;;  %v2310_v30 = vpop.f32.mrb[54].mxu0  ;;  %3178 = vmatmul.mubr.bf16.gmra.mrb[4].mxu1 %v2959_v7  ;;  %v2855_v35 = vld [vmem:[#allocation4 + $0x59] sm:$0xff] }
 0x322   : > { %v2364_v34 = vmax.f32 %v2308_v43, 0.0  ;;  %v2311_v37 = vadd.f32 %v5636_v27, %v2310_v30  ;;  %v4351_v36 = vpop.f32.mrb[55].mxu0 }
 0x324   : > { %2398 = vst.msk [vmem:[#allocation3 + $0xd0] sm:$0xff] %vm278_vm12, %v2364_v34  ;;  %v2365_v26 = vmax.f32 %v2311_v37, 0.0 }
 0x325   : > { %2675 = vrot.lane.b32.xlu1 %v5728_v9, %s4499_s22 }
 0x326   : > { %2399 = vst.msk [vmem:[#allocation3 + $0xd8] sm:$0xff] %vm278_vm12, %v2365_v26 }
 0x32d   : > { %v2484_v31 = vld [vmem:[#allocation3 + $0xd3] ss:$2 sm:$0x3f]  ;;  %v2486_v58 = vld [vmem:[#allocation3 + $0xd4] ss:$2 sm:$0x3f] }
 0x32e   : > { %v2488_v60 = vmax.f32 %v2484_v31, %v2486_v58 }
 0x330   : > { %v2489_v61 = vmax.f32 %v2487_v59, %v2488_v60 }
 0x332   : > { %2490 = vst.msk [vmem:[#allocation4 + $0x42] sm:$0x3f] %vm2405_vm13, %v2489_v61 }
 0x339   : > { %v5797_v62 = vld [vmem:[#allocation4 + $0x40] sm:$0xff] }
 0x33a   : > { %v5799_v63 = vld [vmem:[#allocation4 + $0x42] sm:$0xff]  ;;  %2818 = vrot.lane.b32.xlu0 %v5797_v62, %s4498_s26  ;;  %2521 = vst.msk [vmem:[#allocation5 + $0xc0] sm:$0xff] %vm278_vm12, %v5797_v62 }
 0x33b   : > { %v5801_v33 = vld [vmem:[#allocation4 + $0x41] sm:$0xff]  ;;  %2760 = vrot.lane.b32.xlu1 %v5799_v63, %s4493_s10  ;;  %2922 = vst.msk [vmem:[#allocation5 + $0xa0] sm:$0xff] %vm278_vm12, %v5799_v63 }
 0x33c   : > { %2723 = vst.msk [vmem:[#allocation5 + $0xb0] sm:$0xff] %vm278_vm12, %v5801_v33 }
 0x33e   : > { %2616 = vrot.lane.b32.xlu0 %v5730_v11, %s4498_s26 }
 0x33f   : > { %2557 = vrot.lane.b32.xlu1 %v2851_v4, %s4493_s10  ;;  %v2315_v8 = vpop.f32.mrb[56].mxu0 }
 0x340   : > { %v2316_v9 = vadd.f32 %v5636_v27, %v2315_v8  ;;  %v4354_v12 = vpop.f32.mrb[57].mxu0 }
 0x341   : > { %v2318_v50 = vpop.f32.mrb[58].mxu0 }
 0x342   : > { %v2366_v13 = vmax.f32 %v2316_v9, 0.0  ;;  %v2319_v14 = vadd.f32 %v5636_v27, %v2318_v50  ;;  %2878 = vrot.lane.b32.xlu0 %v5801_v33, %s4499_s22  ;;  %v4355_v15 = vpop.f32.mrb[59].mxu0 }
 0x344   : > { %2400 = vst.msk [vmem:[#allocation3 + $0xe0] sm:$0xff] %vm278_vm12, %v2366_v13  ;;  %v2367_v16 = vmax.f32 %v2319_v14, 0.0 }
 0x346   : > { %2401 = vst.msk [vmem:[#allocation3 + $0xe8] sm:$0xff] %vm278_vm12, %v2367_v16  ;;  %2677 = vrot.lane.b32.xlu0 %v2791_v51, %s4499_s22 }
 0x34b   : > { %v2815_v11 = vpop.permute.xlu0 %2814 }
 0x34c   : > { %v2757_v18 = vpop.permute.xlu1 %2756  ;;  %2840 = vst.msk [vmem:[#allocation5 + $0x68] sm:$0xff] %vm2634_vm15, %v2815_v11 }
 0x34d   : > { %2781 = vst.msk [vmem:[#allocation5 + $0x80] sm:$0xff] %vm2573_vm14, %v2757_v18  ;;  %v2492_v38 = vld [vmem:[#allocation3 + $0xe2] ss:$2 sm:$0x3f] }
 0x34e   : > { %v2494_v25 = vld [vmem:[#allocation3 + $0xe3] ss:$2 sm:$0x3f] }
 0x34f   : > { %v2613_v17 = vpop.permute.xlu0 %2612  ;;  %v2499_v45 = vmax.f32 %v2492_v38, %v2494_v25 }
 0x350   : > { %v2554_v19 = vpop.permute.xlu1 %2553  ;;  %2639 = vst.msk [vmem:[#allocation5 + $0x60] sm:$0xff] %vm2634_vm15, %v2613_v17 }
 0x351   : > { %2579 = vst.msk [vmem:[#allocation5 + $0x78] sm:$0xff] %vm2573_vm14, %v2554_v19 }
 0x353   : > { %v2875_v5 = vpop.permute.xlu0 %2874 }
 0x354   : > { %2900 = vst.msk [vmem:[#allocation5 + $0x68] sm:$0xff] %vm2695_vm2, %v2875_v5 }
 0x357   : > { %v2674_v23 = vpop.permute.xlu0 %2673 }
 0x358   : > { %2700 = vst.msk [vmem:[#allocation5 + $0x60] sm:$0xff] %vm2695_vm2, %v2674_v23 }
 0x35b   : > { %v2939_v30 = vld [vmem:[#allocation5 + $0x68] sm:$0xff] }
 0x35f   : > { %v2323_v41 = vpop.f32.mrb[60].mxu0  ;;  %v2938_v36 = vld [vmem:[#allocation5 + $0x60] sm:$0xff] }
 0x360   : > { %v2324_v3 = vadd.f32 %v5636_v27, %v2323_v41  ;;  %v4358_v2 = vpop.f32.mrb[61].mxu0 }
 0x361   : > { %v2326_v42 = vpop.f32.mrb[62].mxu0 }
 0x362   : > { %v2368_v20 = vmax.f32 %v2324_v3, 0.0  ;;  %v2327_v1 = vadd.f32 %v5636_v27, %v2326_v42  ;;  %v4359_v6 = vpop.f32.mrb[63].mxu0 }
 0x364   : > { %2402 = vst.msk [vmem:[#allocation3 + $0xf0] sm:$0xff] %vm278_vm12, %v2368_v20  ;;  %v2369_v28 = vmax.f32 %v2327_v1, 0.0 }
 0x366   : > { %2403 = vst.msk [vmem:[#allocation3 + $0xf8] sm:$0xff] %vm278_vm12, %v2369_v28 }
 0x36d   : > { %v2496_v39 = vld [vmem:[#allocation3 + $0xf1] ss:$2 sm:$0x3f]  ;;  %v2498_v44 = vld [vmem:[#allocation3 + $0xf2] ss:$2 sm:$0x3f] }
 0x36e   : > { %v2500_v46 = vmax.f32 %v2496_v39, %v2498_v44 }
 0x370   : > { %v2501_v47 = vmax.f32 %v2499_v45, %v2500_v46 }
 0x372   : > { %2502 = vst.msk [vmem:[#allocation4 + $0x4a] sm:$0x3f] %vm2405_vm13, %v2501_v47  ;;  %vm369_vm13 = vcmask 62464  }
 0x378   : > { %v4187_v48 = vpop.f32.mrb[0].mxu1 }
 0x379   : > { %v4188_v53 = vpop.f32.mrb[1].mxu1  ;;  %v2793_v49 = vld [vmem:[#allocation4 + $0x48] sm:$0xff] }
 0x37a   : > { %v4190_v32 = vpop.f32.mrb[2].mxu1  ;;  %v2734_v27 = vld [vmem:[#allocation4 + $0x4a] sm:$0xff]  ;;  %2820 = vrot.lane.b32.xlu1 %v2793_v49, %s4498_s26  ;;  %2522 = vst.msk [vmem:[#allocation5 + $0xd8] sm:$0xff] %vm278_vm12, %v2793_v49 }
 0x37b   : > { %v2853_v51 = vld [vmem:[#allocation4 + $0x49] sm:$0xff]  ;;  %v4191_v4 = vpop.f32.mrb[3].mxu1  ;;  %2762 = vrot.lane.b32.xlu0 %v2734_v27, %s4493_s10  ;;  %2923 = vst.msk [vmem:[#allocation5 + $0xb8] sm:$0xff] %vm278_vm12, %v2734_v27 }
 0x37c   : > { %2724 = vst.msk [vmem:[#allocation5 + $0xc8] sm:$0xff] %vm278_vm12, %v2853_v51  ;;  %v5842_v54 = vadd.f32 %v4191_v4, %v4190_v32  ;;  %v2937_v4 = vld [vmem:[#allocation5 + $0x58] sm:$0xff] }
 0x37e   : > { %2618 = vrot.lane.b32.xlu1 %v5776_v40, %s4498_s26  ;;  %v4442_v40 = vld [vmem:[%s6189_s3 + $0x88] sm:$0xff]  }
 0x37f   : > { %2559 = vrot.lane.b32.xlu0 %v5801_v33, %s4493_s10  ;;  %4367 = vmatpush3.bf16.msra.mxu1 %v4442_v40 }
 0x382   : > { %2880 = vrot.lane.b32.xlu1 %v2853_v51, %s4499_s22 }
 0x383   : > { %2822 = vrot.lane.b32.xlu0 %v2794_v21, %s4498_s26 }
 0x386   : > { %2679 = vrot.lane.b32.xlu1 %v5797_v62, %s4499_s22  ;;  %v2915_v62 = vld [vmem:[#allocation4 + $0x5a] sm:$0xff] }
 0x387   : > { %2620 = vrot.lane.b32.xlu0 %v5799_v63, %s4498_s26  ;;  %2925 = vst.msk [vmem:[#allocation5 + $0xe8] sm:$0xff] %vm278_vm12, %v2915_v62  ;;  %v816_v62 = vld [vmem:[%s4554_s29 + $0x117] sm:$0x3f] }
 0x38a   : > { %2764 = vrot.lane.b32.xlu1 %v5760_v29, %s4493_s10  ;;  %v2795_v29 = vld [vmem:[#allocation4 + $0x58] sm:$0xff] }
 0x38b   : > { %v2817_v55 = vpop.permute.xlu1 %2816  ;;  %2882 = vrot.lane.b32.xlu0 %v5762_v22, %s4499_s22 }
 0x38c   : > { %v2759_v56 = vpop.permute.xlu0 %2758  ;;  %2841 = vst.msk [vmem:[#allocation5 + $0x80] sm:$0xff] %vm2634_vm15, %v2817_v55  ;;  %v2943_v55 = vld [vmem:[#allocation5 + $0x88] sm:$0xff] }
 0x38d   : > { %2782 = vst.msk [vmem:[#allocation5 + $0x98] sm:$0xff] %vm2573_vm14, %v2759_v56  ;;  %v2940_v56 = vld [vmem:[#allocation5 + $0x70] sm:$0xff] }
 0x38e   : > { %2561 = vrot.lane.b32.xlu1 %v2853_v51, %s4493_s10  ;;  %v2964_v40 = vpack.c.bf16 %v2943_v55, %v2940_v56 }
 0x38f   : > { %v2615_v0 = vpop.permute.xlu1 %2614  ;;  %2681 = vrot.lane.b32.xlu0 %v2793_v49, %s4499_s22  ;;  %v2931_v49 = vld [vmem:[#allocation5 + $0x28] sm:$0xff] }
 0x390   : > { %v2556_v7 = vpop.permute.xlu0 %2555  ;;  %2640 = vst.msk [vmem:[#allocation5 + $0x78] sm:$0xff] %vm2634_vm15, %v2615_v0  ;;  %v2949_v0 = vld [vmem:[#allocation5 + $0xb8] sm:$0xff] }
 0x391   : > { %2580 = vst.msk [vmem:[#allocation5 + $0x90] sm:$0xff] %vm2573_vm14, %v2556_v7  ;;  %v2946_v7 = vld [vmem:[#allocation5 + $0xa0] sm:$0xff] }
 0x392   : > { %2824 = vrot.lane.b32.xlu1 %v2795_v29, %s4498_s26  ;;  %v2967_v29 = vpack.c.bf16 %v2949_v0, %v2946_v7 }
 0x393   : > { %v2877_v22 = vpop.permute.xlu1 %2876 }
 0x394   : > { %2901 = vst.msk [vmem:[#allocation5 + $0x80] sm:$0xff] %vm2695_vm2, %v2877_v22  ;;  %v2952_v22 = vld [vmem:[#allocation5 + $0xd0] sm:$0xff] }
 0x396   : > { %2622 = vrot.lane.b32.xlu1 %v2734_v27, %s4498_s26  ;;  %v2928_v27 = vld [vmem:[#allocation5 + $0x10] sm:$0xff] }
 0x397   : > { %v2676_v43 = vpop.permute.xlu1 %2675  ;;  %v2958_v51 = vpack.c.bf16 %v2931_v49, %v2928_v27 }
 0x398   : > { %2701 = vst.msk [vmem:[#allocation5 + $0x78] sm:$0xff] %vm2695_vm2, %v2676_v43  ;;  %v2955_v43 = vld [vmem:[#allocation5 + $0xe8] sm:$0xff] }
 0x39a   : > { %2884 = vrot.lane.b32.xlu1 %v2855_v35, %s4499_s22  ;;  %v2970_v35 = vpack.c.bf16 %v2955_v43, %v2952_v22 }
 0x39b   : > { %v2942_v34 = vld [vmem:[#allocation5 + $0x80] sm:$0xff] }
 0x39c   : > { %v2963_v37 = vpack.c.bf16 %v2942_v34, %v2939_v30 }
 0x39e   : > { %3185 = vmatprep.mubr.bf16.mxu1 %v2963_v37  ;;  %2683 = vrot.lane.b32.xlu1 %v2794_v21, %s4499_s22  ;;  %v2961_v21 = vpack.c.bf16 %v2937_v4, %v2934_v52 }
 0x39f   : > { %v2941_v26 = vld [vmem:[#allocation5 + $0x78] sm:$0xff] }
 0x3a0   : > { %v2962_v57 = vpack.c.bf16 %v2941_v26, %v2938_v36 }
 0x3a2   : > { %3186 = vmatmul.mubr.bf16.gmra.mrb[8].mxu1 %v2962_v57 }
 0x3ac   : > { %v2819_v24 = vpop.permute.xlu0 %2818 }
 0x3ad   : > { %v2761_v31 = vpop.permute.xlu1 %2760  ;;  %2842 = vst.msk [vmem:[#allocation5 + $0x98] sm:$0xff] %vm2634_vm15, %v2819_v24  ;;  %v3361_v24 = vld [vmem:[#allocation7 + $0x1] sm:$0xff] }
 0x3ae   : > { %2783 = vst.msk [vmem:[#allocation5 + $0xb0] sm:$0xff] %vm2573_vm14, %v2761_v31  ;;  %3369 = vrot.lane.b32.xlu0 %v3361_v24, %s4498_s26  ;;  %v403_v31 = vld [vmem:[%s4554_s29 + $0x101] sm:$0xff] }
 0x3b0   : > { %v2617_v58 = vpop.permute.xlu0 %2616 }
 0x3b1   : > { %v2558_v59 = vpop.permute.xlu1 %2557  ;;  %2641 = vst.msk [vmem:[#allocation5 + $0x90] sm:$0xff] %vm2634_vm15, %v2617_v58  ;;  %v404_v58 = vld [vmem:[%s4554_s29 + $0x109] sm:$0x3f] }
 0x3b2   : > { %2581 = vst.msk [vmem:[#allocation5 + $0xa8] sm:$0xff] %vm2573_vm14, %v2558_v59  ;;  %503 = vrot.lane.b32.xlu0 %v403_v31, %s4490_s8  ;;  %505 = vrot.lane.b32.xlu1 %v404_v58, %s4490_s8  ;;  %v609_v59 = vld [vmem:[%s4554_s29 + $0x102] sm:$0xff] }
 0x3b4   : > { %v2879_v60 = vpop.permute.xlu0 %2878 }
 0x3b5   : > { %2902 = vst.msk [vmem:[#allocation5 + $0x98] sm:$0xff] %vm2695_vm2, %v2879_v60  ;;  %v610_v60 = vld [vmem:[%s4554_s29 + $0x10a] sm:$0x3f] }
 0x3b6   : > { %709 = vrot.lane.b32.xlu0 %v609_v59, %s4489_s30  ;;  %711 = vrot.lane.b32.xlu1 %v610_v60, %s4489_s30 }
 0x3b8   : > { %v2678_v61 = vpop.permute.xlu0 %2677 }
 0x3b9   : > { %2702 = vst.msk [vmem:[#allocation5 + $0x90] sm:$0xff] %vm2695_vm2, %v2678_v61  ;;  %v815_v61 = vld [vmem:[%s4554_s29 + $0x10f] sm:$0xff] }
 0x3ba   : > { %915 = vrot.lane.b32.xlu0 %v815_v61, %s4492_s9  ;;  %917 = vrot.lane.b32.xlu1 %v816_v62, %s4492_s9  ;;  %s4060_s9 = sshll.u32 %s6197_s25, 1 }
 0x3bc   : > { %v2945_v23 = vld [vmem:[#allocation5 + $0x98] sm:$0xff] }
 0x3c0   : > { %v2944_v20 = vld [vmem:[#allocation5 + $0x90] sm:$0xff] }
 0x3ec   : > { %v2821_v63 = vpop.permute.xlu1 %2820 }
 0x3ed   : > { %v2763_v33 = vpop.permute.xlu0 %2762  ;;  %2843 = vst.msk [vmem:[#allocation5 + $0xb0] sm:$0xff] %vm2634_vm15, %v2821_v63  ;;  %v1021_v63 = vld [vmem:[%s4554_s29 + $0x110] sm:$0xff] }
 0x3ee   : > { %2784 = vst.msk [vmem:[#allocation5 + $0xc8] sm:$0xff] %vm2573_vm14, %v2763_v33  ;;  %v1022_v33 = vld [vmem:[%s4554_s29 + $0x118] sm:$0x3f]  ;;  %1121 = vrot.lane.b32.xlu0 %v1021_v63, %s4493_s10 }
 0x3ef   : > { %1123 = vrot.lane.b32.xlu1 %v1022_v33, %s4493_s10  ;;  %s276_s10 = scalar_lea.vmem %s6193_s7, %s4060_s9 }
 0x3f0   : > { %v2619_v8 = vpop.permute.xlu1 %2618 }
 0x3f1   : > { %v2560_v9 = vpop.permute.xlu0 %2559  ;;  %2642 = vst.msk [vmem:[#allocation5 + $0xa8] sm:$0xff] %vm2634_vm15, %v2619_v8 }
 0x3f2   : > { %2582 = vst.msk [vmem:[#allocation5 + $0xc0] sm:$0xff] %vm2573_vm14, %v2560_v9  ;;  %v4443_v9 = vld [vmem:[%s6191_s5 + $0x100] sm:$0xff]  }
 0x3f3   : > { %4388 = vmatprep.subr.bf16.mxu0 %v4443_v9 }
 0x3f4   : > { %v4193_v12 = vpop.f32.mrb[4].mxu1  ;;  %v2881_v50 = vpop.permute.xlu1 %2880  ;;  %4389 = vmatpush3.bf16.msra.mxu0 %v4443_v9 }
 0x3f5   : > { %2903 = vst.msk [vmem:[#allocation5 + $0xb0] sm:$0xff] %vm2695_vm2, %v2881_v50  ;;  %v2823_v13 = vpop.permute.xlu0 %2822  ;;  %v4194_v14 = vpop.f32.mrb[5].mxu1  ;;  %v4445_v50 = vld [vmem:[%s6191_s5 + $0x40] sm:$0xff]  }
 0x3f6   : > { %2844 = vst.msk [vmem:[#allocation5 + $0xc8] sm:$0xff] %vm2634_vm15, %v2823_v13  ;;  %v5887_v15 = vadd.f32 %v4194_v14, %v4193_v12  ;;  %v4196_v16 = vpop.f32.mrb[6].mxu1  ;;  %v4444_v12 = vld [vmem:[%s6191_s5 + $0x108] sm:$0xff]   ;;  %v333_v14 = vld [vmem:[%s4554_s29 + $0x100] sm:$0xff]  ;;  %4224 = vmatprep.subr.bf16.mxu1 %v4445_v50 }
 0x3f7   : > { %v4197_v11 = vpop.f32.mrb[7].mxu1  ;;  %v3352_v13 = vld [vmem:[#allocation7] sm:$0xff]  ;;  %4390 = vmatprep.subr.bf16.mxu0 %v4444_v12  ;;  %368 = vst.msk [vmem:[#allocation2 + $0x100] sm:$0xff] %vm335_vm0, %v333_v14  ;;  %vm3381_vm0 = vcmask 1048064  }
 0x3f8   : > { %v5889_v18 = vadd.f32 %v4197_v11, %v4196_v16  ;;  %v2680_v17 = vpop.permute.xlu1 %2679  ;;  %3356 = vst.msk [vmem:[#allocation8] sm:$0xff] %vm293_vm11, %v3352_v13  ;;  %v334_v16 = vld [vmem:[%s4554_s29 + $0x108] sm:$0x3f]  ;;  %4391 = vmatpush3.bf16.msra.mxu0 %v4444_v12 }
 0x3f9   : > { %2703 = vst.msk [vmem:[#allocation5 + $0xa8] sm:$0xff] %vm2695_vm2, %v2680_v17  ;;  %v2621_v19 = vpop.permute.xlu0 %2620  ;;  %v4447_v11 = vld [vmem:[%s6191_s5 + $0x48] sm:$0xff]  }
 0x3fa   : > { %2643 = vst.msk [vmem:[#allocation5 + $0xc0] sm:$0xff] %vm2634_vm15, %v2621_v19  ;;  %v4448_v17 = vld [vmem:[%s6191_s5 + $0x8] sm:$0xff]   ;;  %v4451_v19 = vld [vmem:[%s6191_s5 + $0x110] sm:$0xff]  }
 0x3fb   : > { %370 = vst.msk [vmem:[#allocation2 + $0x108] sm:$0x3f] %vm369_vm13, %v334_v16  ;;  %4392 = vmatprep.subr.bf16.mxu0 %v4451_v19 }
 0x3fc   : > { %v2765_v5 = vpop.permute.xlu1 %2764  ;;  %v2948_v41 = vld [vmem:[#allocation5 + $0xb0] sm:$0xff]  ;;  %4393 = vmatpush3.bf16.msra.mxu0 %v4451_v19 }
 0x3fd   : > { %2785 = vst.msk [vmem:[#allocation5 + $0xe0] sm:$0xff] %vm2573_vm14, %v2765_v5  ;;  %v2883_v3 = vpop.permute.xlu0 %2882  ;;  %v2966_v2 = vpack.c.bf16 %v2948_v41, %v2945_v23  ;;  %v4449_v5 = vld [vmem:[%s6191_s5 + $0x50] sm:$0xff]  }
 0x3fe   : > { %2904 = vst.msk [vmem:[#allocation5 + $0xc8] sm:$0xff] %vm2695_vm2, %v2883_v3  ;;  %v3387_v23 = vld [vmem:[#allocation7 + $0x2] sm:$0xff]  ;;  %v4452_v3 = vld [vmem:[%s6191_s5 + $0x58] sm:$0xff]  }
 0x3ff   : > { %3193 = vmatprep.mubr.bf16.mxu1 %v2966_v2  ;;  %3391 = vst.msk [vmem:[#allocation8 + $0x8] sm:$0xff] %vm293_vm11, %v3387_v23  ;;  %v4450_v41 = vld [vmem:[%s6191_s5 + $0x10] sm:$0xff]   ;;  %v4453_v2 = vld [vmem:[%s6191_s5 + $0x18] sm:$0xff]   ;;  %v4457_v23 = vld [vmem:[%s6191_s5 + $0x28] sm:$0xff]  }
 0x400   : > { %v2562_v42 = vpop.permute.xlu1 %2561  ;;  %v2947_v1 = vld [vmem:[#allocation5 + $0xa8] sm:$0xff] }
 0x401   : > { %v2682_v6 = vpop.permute.xlu0 %2681  ;;  %2583 = vst.msk [vmem:[#allocation5 + $0xd8] sm:$0xff] %vm2573_vm14, %v2562_v42  ;;  %v2965_v28 = vpack.c.bf16 %v2947_v1, %v2944_v20  ;;  %v4454_v42 = vld [vmem:[%s6191_s5 + $0x60] sm:$0xff]   ;;  %vm575_vm14 = vcmask 128064  }
 0x402   : > { %2704 = vst.msk [vmem:[#allocation5 + $0xc0] sm:$0xff] %vm2695_vm2, %v2682_v6  ;;  %v4455_v1 = vld [vmem:[%s6191_s5 + $0x20] sm:$0xff]  }
 0x403   : > { %3194 = vmatmul.mubr.bf16.gmra.mrb[12].mxu1 %v2965_v28 }
 0x404   : > { %v2825_v38 = vpop.permute.xlu1 %2824 }
 0x405   : > { %2845 = vst.msk [vmem:[#allocation5 + $0xe0] sm:$0xff] %vm2634_vm15, %v2825_v38  ;;  %v2951_v45 = vld [vmem:[#allocation5 + $0xc8] sm:$0xff] }
 0x408   : > { %v2623_v25 = vpop.permute.xlu1 %2622 }
 0x409   : > { %2644 = vst.msk [vmem:[#allocation5 + $0xd8] sm:$0xff] %vm2634_vm15, %v2623_v25  ;;  %v2950_v48 = vld [vmem:[#allocation5 + $0xc0] sm:$0xff]  ;;  %vm781_vm15 = vcmask 193664  }
 0x40c   : > { %v2885_v39 = vpop.permute.xlu1 %2884 }
 0x40d   : > { %2905 = vst.msk [vmem:[#allocation5 + $0xe0] sm:$0xff] %vm2695_vm2, %v2885_v39 }
 0x410   : > { %v2684_v44 = vpop.permute.xlu1 %2683 }
 0x411   : > { %2705 = vst.msk [vmem:[#allocation5 + $0xd8] sm:$0xff] %vm2695_vm2, %v2684_v44  ;;  %vm1605_vm2 = vcmask 456064  }
 0x414   : > { %v2954_v46 = vld [vmem:[#allocation5 + $0xe0] sm:$0xff] }
 0x415   : > { %v2969_v47 = vpack.c.bf16 %v2954_v46, %v2951_v45 }
 0x417   : > { %3201 = vmatprep.mubr.bf16.mxu1 %v2969_v47 }
 0x418   : > { %v2953_v53 = vld [vmem:[#allocation5 + $0xd8] sm:$0xff] }
 0x419   : > { %v2968_v32 = vpack.c.bf16 %v2953_v53, %v2950_v48  ;;  %v6002_v53 = vld [vmem:[%s6190_s4] ss:$0 sm:$0xff] }
 0x41a   : > { %v3175_v27 = vadd.f32 %v5842_v54, %v6002_v53  ;;  %v3180_v0 = vadd.f32 %v5887_v15, %v6002_v53  ;;  %v3183_v22 = vadd.f32 %v5889_v18, %v6002_v53 }
 0x41b   : > { %3202 = vmatmul.mubr.bf16.gmra.mrb[16].mxu1 %v2968_v32 }
 0x41c   : > { %4368 = vmatprep.mubr.msk.bf16.mxu1 %vm4497_vm1, %v4491_v10 }
 0x423   : > { %4369 = vmatmul.mubr.msk.bf16.vlgmr.msra.gmra.mrb[20].mxu1 %vm278_vm12, %v2958_v51  ;;  %v3370_v51 = vpop.permute.xlu0 %3369 }
 0x424   : > { %4372 = vmatprep.mubr.msk.bf16.mxu1 %vm4497_vm1, %v4491_v10  ;;  %3382 = vst.msk [vmem:[#allocation8] sm:$0xff] %vm3381_vm0, %v3370_v51 }
 0x427   : > { %v504_v56 = vpop.permute.xlu0 %503 }
 0x428   : > { %574 = vst.msk [vmem:[#allocation2 + $0x100] sm:$0xff] %vm541_vm3, %v504_v56  ;;  %vm987_vm3 = vcmask 259264  }
 0x42b   : > { %4373 = vmatmul.mubr.msk.bf16.gmra.mrb[24].mxu1 %vm278_vm12, %v2961_v21  ;;  %v710_v43 = vpop.permute.xlu0 %709 }
 0x42c   : > { %4376 = vmatprep.mubr.msk.bf16.mxu1 %vm4497_vm1, %v4491_v10  ;;  %780 = vst.msk [vmem:[#allocation2 + $0x100] sm:$0xff] %vm747_vm4, %v710_v43  ;;  %vm1193_vm4 = vcmask 324864  }
 0x42f   : > { %v916_v24 = vpop.permute.xlu0 %915 }
 0x430   : > { %986 = vst.msk [vmem:[#allocation2 + $0x100] sm:$0xff] %vm953_vm5, %v916_v24  ;;  %vm3314_vm5 = vcmask 518144   ;;  %v4462_v24 = vld [vmem:[%s6191_s5 + $0xc0] sm:$0xff]  }
 0x433   : > { %4377 = vmatmul.mubr.msk.bf16.gmra.mrb[28].mxu1 %vm278_vm12, %v2964_v40  ;;  %v506_v40 = vpop.permute.xlu1 %505 }
 0x434   : > { %4380 = vmatprep.mubr.msk.bf16.mxu1 %vm4497_vm1, %v4491_v10  ;;  %576 = vst.msk [vmem:[#allocation2 + $0x108] sm:$0x3f] %vm575_vm14, %v506_v40 }
 0x43b   : > { %4381 = vmatmul.mubr.msk.bf16.gmra.mrb[32].mxu1 %vm278_vm12, %v2967_v29 }
 0x43c   : > { %4384 = vmatprep.mubr.msk.bf16.mxu1 %vm4497_vm1, %v4491_v10  ;;  %vm299_vm1 = vcmask 517120  }
 0x43d   : > { %300 = vst.msk [vmem:[#allocation7 + $0x28] sm:$0x3] %vm299_vm1, %v4491_v10  ;;  %v4446_v10 = vld [vmem:[%s6191_s5] sm:$0xff]  }
 0x43e   : > { %4225 = vmatpush3.bf16.msra.mxu1 %v4446_v10 }
 0x43f   : > { %4226 = vmatprep.subr.bf16.mxu1 %v4447_v11 }
 0x442   : > { %4227 = vmatpush3.bf16.msra.mxu1 %v4448_v17 }
 0x443   : > { %4385 = vmatmul.mubr.msk.bf16.gmra.mrb[36].mxu1 %vm278_vm12, %v2970_v35  ;;  %vm3359_vm12 = vcmask 521216   ;;  %4228 = vmatprep.subr.bf16.mxu1 %v4449_v5 }
 0x444   : > { %v3486_v8 = vld [vmem:[#allocation7 + $0x24] sm:$0x3f] }
 0x445   : > { %3490 = vst.msk [vmem:[#allocation8 + $0x98] sm:$0x3f] %vm3359_vm12, %v3486_v8 }
 0x446   : > { %4229 = vmatpush3.bf16.msra.mxu1 %v4450_v41 }
 0x447   : > { %4230 = vmatprep.subr.bf16.mxu1 %v4452_v3 }
 0x44a   : > { %4231 = vmatpush3.bf16.msra.mxu1 %v4453_v2 }
 0x44b   : > { %4232 = vmatprep.subr.bf16.mxu1 %v4454_v42 }
 0x44e   : > { %4233 = vmatpush3.bf16.msra.mxu1 %v4455_v1 }
 0x460   : > { %v1122_v63 = vpop.permute.xlu0 %1121 }
 0x461   : > { %1192 = vst.msk [vmem:[#allocation2 + $0x100] sm:$0xff] %vm1159_vm6, %v1122_v63  ;;  %vm1399_vm6 = vcmask 390464  }
 0x475   : > { %v4199_v30 = vpop.f32.mrb[8].mxu1 }
 0x476   : > { %v4200_v34 = vpop.f32.mrb[9].mxu1 }
 0x477   : > { %v5926_v37 = vadd.f32 %v4200_v34, %v4199_v30  ;;  %v4202_v36 = vpop.f32.mrb[10].mxu1  ;;  %v712_v30 = vpop.permute.xlu1 %711 }
 0x478   : > { %v4203_v26 = vpop.f32.mrb[11].mxu1  ;;  %782 = vst.msk [vmem:[#allocation2 + $0x108] sm:$0x3f] %vm781_vm15, %v712_v30 }
 0x479   : > { %v5928_v57 = vadd.f32 %v4203_v26, %v4202_v36  ;;  %v3188_v18 = vadd.f32 %v5926_v37, %v6002_v53 }
 0x47b   : > { %v918_v31 = vpop.permute.xlu1 %917  ;;  %v3191_v62 = vadd.f32 %v5928_v57, %v6002_v53  ;;  %v4456_v57 = vld [vmem:[%s6191_s5 + $0x68] sm:$0xff]  }
 0x47c   : > { %988 = vst.msk [vmem:[#allocation2 + $0x108] sm:$0x3f] %vm987_vm3, %v918_v31  ;;  %4234 = vmatprep.subr.bf16.mxu1 %v4456_v57 }
 0x47d   : > { %4235 = vmatpush3.bf16.msra.mxu1 %v4457_v23 }
 0x47f   : > { %v1124_v9 = vpop.permute.xlu1 %1123 }
 0x480   : > { %1194 = vst.msk [vmem:[#allocation2 + $0x108] sm:$0x3f] %vm1193_vm4, %v1124_v9 }
 0x4d6   : > { %v4205_v20 = vpop.f32.mrb[12].mxu1 }
 0x4d7   : > { %v4206_v6 = vpop.f32.mrb[13].mxu1 }
 0x4d8   : > { %v5993_v28 = vadd.f32 %v4206_v6, %v4205_v20  ;;  %v4208_v38 = vpop.f32.mrb[14].mxu1 }
 0x4d9   : > { %v4209_v25 = vpop.f32.mrb[15].mxu1 }
 0x4da   : > { %v5995_v39 = vadd.f32 %v4209_v25, %v4208_v38  ;;  %v3196_v19 = vadd.f32 %v5993_v28, %v6002_v53 }
 0x4dc   : > { %v3199_v42 = vadd.f32 %v5995_v39, %v6002_v53  ;;  %v4459_v39 = vld [vmem:[%s6191_s5 + $0x30] sm:$0xff]  }
 0x4ee   : > { %v4211_v44 = vpop.f32.mrb[16].mxu1 }
 0x4ef   : > { %v4212_v45 = vpop.f32.mrb[17].mxu1 }
 0x4f0   : > { %v5997_v46 = vadd.f32 %v4212_v45, %v4211_v44  ;;  %v4214_v47 = vpop.f32.mrb[18].mxu1 }
 0x4f1   : > { %v4215_v48 = vpop.f32.mrb[19].mxu1 }
 0x4f6   : > { %v3244_v32 = vpop.f32.mrb[20].mxu1 }
 0x4f7   : > { %v4370_v49 = vpop.f32.mrb[21].mxu1  ;;  %v4458_v32 = vld [vmem:[%s6191_s5 + $0x70] sm:$0xff]  }
 0x4f8   : > { %v3247_v4 = vpop.f32.mrb[22].mxu1  ;;  %4236 = vmatprep.subr.bf16.mxu1 %v4458_v32 }
 0x4f9   : > { %v3248_v52 = vadd.f32 %v3247_v4, %v3175_v27  ;;  %v4371_v21 = vpop.f32.mrb[23].mxu1  ;;  %v3204_v27 = vadd.f32 %v5997_v46, %v6002_v53  ;;  %4237 = vmatpush3.bf16.msra.mxu1 %v4459_v39  ;;  %v4460_v46 = vld [vmem:[%s6191_s5 + $0x78] sm:$0xff]   ;;  %v3430_v39 = vld [vmem:[#allocation7 + $0x1f] sm:$0x3f] }
 0x4fa   : > { %v4461_v53 = vld [vmem:[%s6191_s5 + $0x38] sm:$0xff]   ;;  %4238 = vmatprep.subr.bf16.mxu1 %v4460_v46 }
 0x4fb   : > { %v3284_v55 = vmax.f32 %v3248_v52, 0.0 }
 0x4fd   : > { %3294 = vst.msk [vmem:[#allocation6 + $0x8] sm:$0xff] %vm293_vm11, %v3284_v55  ;;  %4239 = vmatpush3.bf16.msra.mxu1 %v4461_v53 }
 0x4fe   : > { %v3252_v7 = vpop.f32.mrb[24].mxu1  ;;  %4252 = vmatprep.subr.bf16.mxu1 %v4462_v24  ;;  %v4469_v24 = vld [vmem:[%s6191_s5 + $0xd8] sm:$0xff]  }
 0x4ff   : > { %v3253_v54 = vadd.f32 %v3252_v7, %v3180_v0  ;;  %v4374_v29 = vpop.f32.mrb[25].mxu1 }
 0x500   : > { %v3255_v35 = vpop.f32.mrb[26].mxu1 }
 0x501   : > { %v3285_v34 = vmax.f32 %v3253_v54, 0.0  ;;  %v3256_v36 = vadd.f32 %v3255_v35, %v3183_v22  ;;  %v4375_v26 = vpop.f32.mrb[27].mxu1  ;;  %v1227_v54 = vld [vmem:[%s4554_s29 + $0x111] sm:$0xff] }
 0x502   : > { %v1433_v26 = vld [vmem:[%s4554_s29 + $0x11e] sm:$0xff] }
 0x503   : > { %3295 = vst.msk [vmem:[#allocation6 + $0x10] sm:$0xff] %vm293_vm11, %v3285_v34  ;;  %v3286_v15 = vmax.f32 %v3256_v36, 0.0 }
 0x504   : > { %v3304_v59 = vld [vmem:[#allocation6 + $0x9] ss:$2 sm:$0x7]  ;;  %v3306_v33 = vld [vmem:[#allocation6 + $0xa] ss:$2 sm:$0x7] }
 0x505   : > { %3296 = vst.msk [vmem:[#allocation6 + $0x18] sm:$0xff] %vm293_vm11, %v3286_v15  ;;  %v3311_v14 = vmax.f32 %v3304_v59, %v3306_v33 }
 0x506   : > { %v3260_v58 = vpop.f32.mrb[28].mxu1 }
 0x507   : > { %v3261_v60 = vadd.f32 %v3260_v58, %v3188_v18  ;;  %v4378_v61 = vpop.f32.mrb[29].mxu1 }
 0x508   : > { %v3263_v8 = vpop.f32.mrb[30].mxu1  ;;  %v1228_v61 = vld [vmem:[%s4554_s29 + $0x119] sm:$0x3f] }
 0x509   : > { %v3287_v12 = vmax.f32 %v3261_v60, 0.0  ;;  %v3264_v50 = vadd.f32 %v3263_v8, %v3191_v62  ;;  %v4379_v13 = vpop.f32.mrb[31].mxu1 }
 0x50a   : > { %v3308_v37 = vld [vmem:[#allocation6 + $0x11] ss:$2 sm:$0x7]  ;;  %v3310_v10 = vld [vmem:[#allocation6 + $0x12] ss:$2 sm:$0x7] }
 0x50b   : > { %v3312_v16 = vmax.f32 %v3308_v37, %v3310_v10  ;;  %3297 = vst.msk [vmem:[#allocation6 + $0x20] sm:$0xff] %vm293_vm11, %v3287_v12  ;;  %v3288_v11 = vmax.f32 %v3264_v50, 0.0  ;;  %v4466_v50 = vld [vmem:[%s6191_s5 + $0x118] sm:$0xff]   ;;  %v1434_v13 = vld [vmem:[%s4554_s29 + $0x126] sm:$0x3f] }
 0x50c   : > { %v3317_v41 = vld [vmem:[#allocation6 + $0x19] ss:$2 sm:$0x7]  ;;  %v3319_v20 = vld [vmem:[#allocation6 + $0x1a] ss:$2 sm:$0x7]  ;;  %4394 = vmatprep.subr.bf16.mxu0 %v4466_v50 }
 0x50d   : > { %v3313_v17 = vmax.f32 %v3311_v14, %v3312_v16  ;;  %3298 = vst.msk [vmem:[#allocation6 + $0x28] sm:$0xff] %vm293_vm11, %v3288_v11  ;;  %v3324_v45 = vmax.f32 %v3317_v41, %v3319_v20  ;;  %4395 = vmatpush3.bf16.msra.mxu0 %v4466_v50 }
 0x50e   : > { %v3268_v5 = vpop.f32.mrb[32].mxu1 }
 0x50f   : > { %v3269_v3 = vadd.f32 %v3268_v5, %v3196_v19  ;;  %v4382_v2 = vpop.f32.mrb[33].mxu1  ;;  %3315 = vst.msk [vmem:[#allocation7 + $0xc] sm:$0x7] %vm3314_vm5, %v3313_v17 }
 0x510   : > { %v3271_v1 = vpop.f32.mrb[34].mxu1 }
 0x511   : > { %v3289_v6 = vmax.f32 %v3269_v3, 0.0  ;;  %v3272_v38 = vadd.f32 %v3271_v1, %v3199_v42  ;;  %v4383_v28 = vpop.f32.mrb[35].mxu1  ;;  %v1639_v1 = vld [vmem:[%s4554_s29 + $0x11f] sm:$0xff] }
 0x512   : > { %v3321_v25 = vld [vmem:[#allocation6 + $0x21] ss:$2 sm:$0x7]  ;;  %v3323_v44 = vld [vmem:[#allocation6 + $0x22] ss:$2 sm:$0x7] }
 0x513   : > { %v3325_v47 = vmax.f32 %v3321_v25, %v3323_v44  ;;  %3299 = vst.msk [vmem:[#allocation6 + $0x30] sm:$0xff] %vm293_vm11, %v3289_v6  ;;  %v3290_v48 = vmax.f32 %v3272_v38, 0.0  ;;  %v3454_v38 = vld [vmem:[#allocation7 + $0x22] sm:$0x3f]  ;;  %v1845_v28 = vld [vmem:[%s4554_s29 + $0x120] sm:$0xff] }
 0x514   : > { %v3329_v51 = vld [vmem:[#allocation6 + $0x29] ss:$2 sm:$0x7]  ;;  %v3331_v0 = vld [vmem:[#allocation6 + $0x2a] ss:$2 sm:$0x7] }
 0x515   : > { %v3326_v49 = vmax.f32 %v3324_v45, %v3325_v47  ;;  %3300 = vst.msk [vmem:[#allocation6 + $0x38] sm:$0xff] %vm293_vm11, %v3290_v48  ;;  %v3336_v34 = vmax.f32 %v3329_v51, %v3331_v0  ;;  %v1640_v25 = vld [vmem:[%s4554_s29 + $0x127] sm:$0x3f] }
 0x516   : > { %v3276_v4 = vpop.f32.mrb[36].mxu1  ;;  %v3395_v52 = vld [vmem:[#allocation7 + $0x5] sm:$0xff]  ;;  %3458 = vst.msk [vmem:[#allocation8 + $0x90] sm:$0x3f] %vm3359_vm12, %v3454_v38  ;;  %v3422_v44 = vld [vmem:[#allocation7 + $0x1e] sm:$0x3f] }
 0x517   : > { %v3362_v21 = vld [vmem:[#allocation7 + $0x9] sm:$0xff]  ;;  %v3277_v55 = vadd.f32 %v3276_v4, %v3204_v27  ;;  %3403 = vrot.lane.b32.xlu0 %v3395_v52, %s4498_s26  ;;  %3327 = vst.msk [vmem:[#allocation7 + $0x11] sm:$0x7] %vm3314_vm5, %v3326_v49  ;;  %v4386_v56 = vpop.f32.mrb[37].mxu1  ;;  %v1846_v45 = vld [vmem:[%s4554_s29 + $0x128] sm:$0x3f] }
 0x518   : > { %3371 = vrot.lane.b32.xlu1 %v3362_v21, %s4498_s26  ;;  %v3353_v40 = vld [vmem:[#allocation7 + $0x8] sm:$0xff]  ;;  %v3279_v7 = vpop.f32.mrb[38].mxu1  ;;  %3426 = vst.msk [vmem:[#allocation8 + $0x88] sm:$0x3f] %vm3359_vm12, %v3422_v44 }
 0x519   : > { %3357 = vst.msk [vmem:[#allocation8 + $0x28] sm:$0xff] %vm293_vm11, %v3353_v40  ;;  %v3419_v29 = vld [vmem:[#allocation7 + $0x6] sm:$0xff]  ;;  %v3291_v22 = vmax.f32 %v3277_v55, 0.0  ;;  %v4387_v43 = vpop.f32.mrb[39].mxu1 }
 0x51a   : > { %3423 = vst.msk [vmem:[#allocation8 + $0x10] sm:$0xff] %vm293_vm11, %v3419_v29  ;;  %v3333_v35 = vld [vmem:[#allocation6 + $0x31] ss:$2 sm:$0x7]  ;;  %v3427_v42 = vld [vmem:[#allocation7 + $0x7] sm:$0xff]  ;;  %v4463_v29 = vld [vmem:[%s6191_s5 + $0x80] sm:$0xff]  }
 0x51b   : > { %v3335_v30 = vld [vmem:[#allocation6 + $0x32] ss:$2 sm:$0x7]  ;;  %3301 = vst.msk [vmem:[#allocation6 + $0x40] sm:$0xff] %vm293_vm11, %v3291_v22  ;;  %1327 = vrot.lane.b32.xlu0 %v1227_v54, %s4494_s11  ;;  %v3491_v54 = vld [vmem:[#allocation8] sm:$0xff] }
 0x51c   : > { %v3337_v36 = vmax.f32 %v3333_v35, %v3335_v30  ;;  %v3341_v58 = vld [vmem:[#allocation6 + $0x39] ss:$2 sm:$0x7]  ;;  %v3343_v60 = vld [vmem:[#allocation6 + $0x3a] ss:$2 sm:$0x7] }
 0x51d   : > { %v3348_v9 = vmax.f32 %v3341_v58, %v3343_v60  ;;  %v3462_v48 = vld [vmem:[#allocation7 + $0x23] sm:$0x3f]  ;;  %v4470_v58 = vld [vmem:[%s6191_s5 + $0x98] sm:$0xff]  }
 0x51e   : > { %v3338_v15 = vmax.f32 %v3336_v34, %v3337_v36  ;;  %v3396_v31 = vld [vmem:[#allocation7 + $0xd] sm:$0xff]  ;;  %v4464_v43 = vld [vmem:[%s6191_s5 + $0xc8] sm:$0xff]  }
 0x51f   : > { %v3388_v18 = vld [vmem:[#allocation7 + $0xa] sm:$0xff]  ;;  %1533 = vrot.lane.b32.xlu0 %v1433_v26, %s4495_s16  ;;  %3405 = vrot.lane.b32.xlu1 %v3396_v31, %s4498_s26  ;;  %v4465_v30 = vld [vmem:[%s6191_s5 + $0x88] sm:$0xff]  }
 0x520   : > { %3339 = vst.msk [vmem:[#allocation7 + $0x16] sm:$0x7] %vm3314_vm5, %v3338_v15  ;;  %v3420_v59 = vld [vmem:[#allocation7 + $0xe] sm:$0xff] }
 0x521   : > { %3392 = vst.msk [vmem:[#allocation8 + $0x30] sm:$0xff] %vm293_vm11, %v3388_v18  ;;  %3455 = vst.msk [vmem:[#allocation8 + $0x18] sm:$0xff] %vm293_vm11, %v3388_v18  ;;  %v3483_v62 = vld [vmem:[#allocation7 + $0xc] sm:$0xff] }
 0x522   : > { %3424 = vst.msk [vmem:[#allocation8 + $0x38] sm:$0xff] %vm293_vm11, %v3420_v59  ;;  %v3459_v63 = vld [vmem:[#allocation7 + $0xb] sm:$0xff]  ;;  %3487 = vst.msk [vmem:[#allocation8 + $0x20] sm:$0xff] %vm293_vm11, %v3483_v62  ;;  %v4471_v59 = vld [vmem:[%s6191_s5 + $0xe0] sm:$0xff]  }
 0x523   : > { %v3345_v33 = vld [vmem:[#allocation6 + $0x41] ss:$2 sm:$0x7]  ;;  %v3347_v8 = vld [vmem:[#allocation6 + $0x42] ss:$2 sm:$0x7]  ;;  %3467 = vrot.lane.b32.xlu0 %v3459_v63, %s4498_s26  ;;  %1329 = vrot.lane.b32.xlu1 %v1228_v61, %s4494_s11 }
 0x524   : > { %v3349_v12 = vmax.f32 %v3345_v33, %v3347_v8  ;;  %v4467_v34 = vld [vmem:[%s6191_s5 + $0xd0] sm:$0xff]   ;;  %v4472_v62 = vld [vmem:[%s6191_s5 + $0xa0] sm:$0xff]   ;;  %v4473_v63 = vld [vmem:[%s6191_s5 + $0xe8] sm:$0xff]  }
 0x525   : > { %v4468_v15 = vld [vmem:[%s6191_s5 + $0x90] sm:$0xff]  }
 0x526   : > { %v3350_v37 = vmax.f32 %v3348_v9, %v3349_v12 }
 0x527   : > { %v3363_v10 = vld [vmem:[#allocation7 + $0x11] sm:$0xff]  ;;  %1535 = vrot.lane.b32.xlu1 %v1434_v13, %s4495_s16  ;;  %v4474_v13 = vld [vmem:[%s6191_s5 + $0xa8] sm:$0xff]  }
 0x528   : > { %3351 = vst.msk [vmem:[#allocation7 + $0x1b] sm:$0x7] %vm3314_vm5, %v3350_v37  ;;  %3373 = vrot.lane.b32.xlu0 %v3363_v10, %s4498_s26  ;;  %v3354_v14 = vld [vmem:[#allocation7 + $0x10] sm:$0xff]  ;;  %v4475_v37 = vld [vmem:[%s6191_s5 + $0xf0] sm:$0xff]  }
 0x529   : > { %v3452_v16 = vld [vmem:[#allocation7 + $0x12] sm:$0xff]  ;;  %3358 = vst.msk [vmem:[#allocation8 + $0x50] sm:$0xff] %vm293_vm11, %v3354_v14 }
 0x52a   : > { %3456 = vst.msk [vmem:[#allocation8 + $0x40] sm:$0xff] %vm293_vm11, %v3452_v16  ;;  %3393 = vst.msk [vmem:[#allocation8 + $0x58] sm:$0xff] %vm293_vm11, %v3452_v16  ;;  %v3460_v11 = vld [vmem:[#allocation7 + $0x13] sm:$0xff] }
 0x52b   : > { %3469 = vrot.lane.b32.xlu1 %v3460_v11, %s4498_s26  ;;  %v3428_v57 = vld [vmem:[#allocation7 + $0xf] sm:$0xff] }
 0x52f   : > { %v3397_v17 = vld [vmem:[#allocation7 + $0x15] sm:$0xff]  ;;  %3437 = vrot.lane.b32.xlu1 %v3428_v57, %s4498_s26  ;;  %v3398_v2 = vld [vmem:[#allocation7 + $0x1d] sm:$0x3f] }
 0x530   : > { %3407 = vrot.lane.b32.xlu0 %v3397_v17, %s4498_s26  ;;  %v3390_v19 = vld [vmem:[#allocation7 + $0x1a] sm:$0x3f] }
 0x531   : > { %3394 = vst.msk [vmem:[#allocation8 + $0x80] sm:$0x3f] %vm3359_vm12, %v3390_v19  ;;  %v3355_v5 = vld [vmem:[#allocation7 + $0x18] sm:$0x3f]  ;;  %v4476_v19 = vld [vmem:[%s6191_s5 + $0xb0] sm:$0xff]  }
 0x532   : > { %3360 = vst.msk [vmem:[#allocation8 + $0x78] sm:$0x3f] %vm3359_vm12, %v3355_v5  ;;  %v3453_v23 = vld [vmem:[#allocation7 + $0x1a] sm:$0xff] }
 0x533   : > { %v3421_v41 = vld [vmem:[#allocation7 + $0x16] sm:$0xff]  ;;  %3457 = vst.msk [vmem:[#allocation8 + $0x68] sm:$0xff] %vm293_vm11, %v3453_v23  ;;  %3409 = vrot.lane.b32.xlu1 %v3398_v2, %s4498_s26 }
 0x534   : > { %v3484_v3 = vld [vmem:[#allocation7 + $0x14] sm:$0xff]  ;;  %3425 = vst.msk [vmem:[#allocation8 + $0x60] sm:$0xff] %vm293_vm11, %v3421_v41  ;;  %v3485_v20 = vld [vmem:[#allocation7 + $0x1c] sm:$0xff]  ;;  %3435 = vrot.lane.b32.xlu0 %v3427_v42, %s4498_s26 }
 0x535   : > { %3488 = vst.msk [vmem:[#allocation8 + $0x48] sm:$0xff] %vm293_vm11, %v3484_v3  ;;  %3489 = vst.msk [vmem:[#allocation8 + $0x70] sm:$0xff] %vm293_vm11, %v3485_v20  ;;  %v3364_v6 = vld [vmem:[#allocation7 + $0x19] sm:$0x3f]  ;;  %v4477_v41 = vld [vmem:[%s6191_s5 + $0xf8] sm:$0xff]  }
 0x536   : > { %v3461_v47 = vld [vmem:[#allocation7 + $0x1b] sm:$0xff]  ;;  %v4478_v42 = vld [vmem:[%s6191_s5 + $0xb8] sm:$0xff]  }
 0x537   : > { %3375 = vrot.lane.b32.xlu1 %v3364_v6, %s4498_s26  ;;  %v3429_v32 = vld [vmem:[#allocation7 + $0x17] sm:$0xff] }
 0x538   : > { %1739 = vrot.lane.b32.xlu0 %v1639_v1, %s4496_s19 }
 0x53b   : > { %1741 = vrot.lane.b32.xlu1 %v1640_v25, %s4496_s19 }
 0x53c   : > { %1945 = vrot.lane.b32.xlu0 %v1845_v28, %s4498_s26  ;;  %v3500_v6 = vld [vmem:[#allocation8 + $0x48] sm:$0xff] }
 0x53f   : > { %1947 = vrot.lane.b32.xlu1 %v1846_v45, %s4498_s26  ;;  %v3495_v45 = vld [vmem:[#allocation8 + $0x20] sm:$0xff] }
 0x540   : > { %3471 = vrot.lane.b32.xlu0 %v3461_v47, %s4498_s26 }
 0x543   : > { %3473 = vrot.lane.b32.xlu1 %v3462_v48, %s4498_s26  ;;  %v3515_v48 = vpack.c.bf16 %v3500_v6, %v3495_v45 }
 0x544   : > { %3439 = vrot.lane.b32.xlu0 %v3429_v32, %s4498_s26 }
 0x547   : > { %3441 = vrot.lane.b32.xlu1 %v3430_v39, %s4498_s26 }
 0x589   : > { %v3404_v49 = vpop.permute.xlu0 %3403 }
 0x58a   : > { %v3372_v27 = vpop.permute.xlu1 %3371  ;;  %3415 = vst.msk [vmem:[#allocation8 + $0x8] sm:$0xff] %vm3381_vm0, %v3404_v49 }
 0x58b   : > { %3383 = vst.msk [vmem:[#allocation8 + $0x28] sm:$0xff] %vm3381_vm0, %v3372_v27  ;;  %v3505_v27 = vld [vmem:[#allocation8 + $0x70] sm:$0xff] }
 0x58d   : > { %v1328_v51 = vpop.permute.xlu0 %1327 }
 0x58e   : > { %1398 = vst.msk [vmem:[#allocation2 + $0x100] sm:$0xff] %vm1365_vm7, %v1328_v51  ;;  %vm3385_vm7 = vcmask 1046016   ;;  %v3510_v51 = vld [vmem:[#allocation8 + $0x98] sm:$0x3f] }
 0x591   : > { %v1534_v4 = vpop.permute.xlu0 %1533  ;;  %v3406_v52 = vpop.permute.xlu1 %3405  ;;  %v3492_v53 = vld [vmem:[#allocation8 + $0x8] sm:$0xff] }
 0x592   : > { %1604 = vst.msk [vmem:[#allocation2 + $0x100] sm:$0xff] %vm1571_vm8, %v1534_v4  ;;  %v3496_v56 = vld [vmem:[#allocation8 + $0x28] sm:$0xff]  ;;  %vm1811_vm8 = vcmask 521664  }
 0x593   : > { %3416 = vst.msk [vmem:[#allocation8 + $0x30] sm:$0xff] %vm3381_vm0, %v3406_v52  ;;  %v3511_v22 = vpack.c.bf16 %v3496_v56, %v3491_v54 }
 0x595   : > { %v3468_v21 = vpop.permute.xlu0 %3467  ;;  %v1330_v55 = vpop.permute.xlu1 %1329 }
 0x596   : > { %3479 = vst.msk [vmem:[#allocation8 + $0x18] sm:$0xff] %vm3381_vm0, %v3468_v21 }
 0x597   : > { %1400 = vst.msk [vmem:[#allocation2 + $0x108] sm:$0x3f] %vm1399_vm6, %v1330_v55  ;;  %v3520_v55 = vpack.c.bf16 %v3510_v51, %v3505_v27 }
 0x599   : > { %v1536_v40 = vpop.permute.xlu1 %1535 }
 0x59a   : > { %v3374_v46 = vpop.permute.xlu0 %3373  ;;  %v3497_v0 = vld [vmem:[#allocation8 + $0x30] sm:$0xff]  ;;  %1606 = vst.msk [vmem:[#allocation2 + $0x108] sm:$0x3f] %vm1605_vm2, %v1536_v40 }
 0x59b   : > { %3384 = vst.msk [vmem:[#allocation8 + $0x50] sm:$0xff] %vm3381_vm0, %v3374_v46  ;;  %v3512_v7 = vpack.c.bf16 %v3497_v0, %v3492_v53 }
 0x59d   : > { %3854 = vmatprep.mubr.bf16.mxu1 %v3512_v7  ;;  %v3470_v35 = vpop.permute.xlu1 %3469  ;;  %v3494_v5 = vld [vmem:[#allocation8 + $0x18] sm:$0xff] }
 0x59e   : > { %3855 = vmatmul.mubr.bf16.vlgmr.msra.gmra.mrb[40].mxu1 %v3511_v22  ;;  %3480 = vst.msk [vmem:[#allocation8 + $0x40] sm:$0xff] %vm3381_vm0, %v3470_v35 }
 0x59f   : > { %4253 = vmatpush3.bf16.msra.mxu1 %v4463_v29 }
 0x5a0   : > { %4254 = vmatprep.subr.bf16.mxu1 %v4464_v43 }
 0x5a1   : > { %v3438_v36 = vpop.permute.xlu1 %3437 }
 0x5a2   : > { %v3408_v26 = vpop.permute.xlu0 %3407  ;;  %3448 = vst.msk [vmem:[#allocation8 + $0x38] sm:$0xff] %vm3381_vm0, %v3438_v36  ;;  %v3501_v11 = vld [vmem:[#allocation8 + $0x50] sm:$0xff] }
 0x5a3   : > { %4255 = vmatpush3.bf16.msra.mxu1 %v4465_v30  ;;  %3417 = vst.msk [vmem:[#allocation8 + $0x58] sm:$0xff] %vm3381_vm0, %v3408_v26  ;;  %v4108_v30 = vld [vmem:[%s6192_s6] ss:$0 sm:$0xff] }
 0x5a4   : > { %4256 = vmatprep.subr.bf16.mxu1 %v4467_v34 }
 0x5a5   : > { %v3410_v31 = vpop.permute.xlu1 %3409  ;;  %v3499_v10 = vld [vmem:[#allocation8 + $0x40] sm:$0xff] }
 0x5a6   : > { %v3436_v18 = vpop.permute.xlu0 %3435  ;;  %3418 = vst.msk [vmem:[#allocation8 + $0x80] sm:$0x3f] %vm3385_vm7, %v3410_v31  ;;  %v3514_v23 = vpack.c.bf16 %v3499_v10, %v3494_v5 }
 0x5a7   : > { %4257 = vmatpush3.bf16.msra.mxu1 %v4468_v15  ;;  %3447 = vst.msk [vmem:[#allocation8 + $0x10] sm:$0xff] %vm3381_vm0, %v3436_v18 }
 0x5a8   : > { %4258 = vmatprep.subr.bf16.mxu1 %v4469_v24 }
 0x5a9   : > { %v3376_v61 = vpop.permute.xlu1 %3375  ;;  %v3498_v44 = vld [vmem:[#allocation8 + $0x38] sm:$0xff] }
 0x5aa   : > { %v1740_v60 = vpop.permute.xlu0 %1739  ;;  %3386 = vst.msk [vmem:[#allocation8 + $0x78] sm:$0x3f] %vm3385_vm7, %v3376_v61  ;;  %v3502_v9 = vld [vmem:[#allocation8 + $0x58] sm:$0xff] }
 0x5ab   : > { %4259 = vmatpush3.bf16.msra.mxu1 %v4470_v58  ;;  %1810 = vst.msk [vmem:[#allocation2 + $0x100] sm:$0xff] %vm1777_vm9, %v1740_v60  ;;  %vm2017_vm9 = vcmask 587264  }
 0x5ac   : > { %4260 = vmatprep.subr.bf16.mxu1 %v4471_v59 }
 0x5ad   : > { %v1742_v8 = vpop.permute.xlu1 %1741  ;;  %v3507_v12 = vld [vmem:[#allocation8 + $0x80] sm:$0x3f] }
 0x5ae   : > { %v1946_v33 = vpop.permute.xlu0 %1945  ;;  %1812 = vst.msk [vmem:[#allocation2 + $0x108] sm:$0x3f] %vm1811_vm8, %v1742_v8  ;;  %v3517_v50 = vpack.c.bf16 %v3507_v12, %v3502_v9  ;;  %v3493_v1 = vld [vmem:[#allocation8 + $0x10] sm:$0xff] }
 0x5af   : > { %4261 = vmatpush3.bf16.msra.mxu1 %v4472_v62  ;;  %2016 = vst.msk [vmem:[#allocation2 + $0x100] sm:$0xff] %vm1983_vm10, %v1946_v33  ;;  %v3513_v47 = vpack.c.bf16 %v3498_v44, %v3493_v1  ;;  %vm6195_vm10 = vcmask 588800  }
 0x5b0   : > { %4262 = vmatprep.subr.bf16.mxu1 %v4473_v63  ;;  %3862 = vmatprep.mubr.bf16.mxu1 %v3517_v50 }
 0x5b1   : > { %v1948_v16 = vpop.permute.xlu1 %1947  ;;  %v3506_v57 = vld [vmem:[#allocation8 + $0x78] sm:$0x3f] }
 0x5b2   : > { %v3472_v14 = vpop.permute.xlu0 %3471  ;;  %2018 = vst.msk [vmem:[#allocation2 + $0x108] sm:$0x3f] %vm2017_vm9, %v1948_v16  ;;  %v3516_v17 = vpack.c.bf16 %v3506_v57, %v3501_v11 }
 0x5b3   : > { %4263 = vmatpush3.bf16.msra.mxu1 %v4474_v13  ;;  %3481 = vst.msk [vmem:[#allocation8 + $0x68] sm:$0xff] %vm3381_vm0, %v3472_v14 }
 0x5b4   : > { %4264 = vmatprep.subr.bf16.mxu1 %v4475_v37  ;;  %3863 = vmatmul.mubr.bf16.gmra.mrb[44].mxu1 %v3516_v17 }
 0x5b5   : > { %v3474_v2 = vpop.permute.xlu1 %3473  ;;  %3903 = vmatprep.mubr.bf16.mxu1 %v3514_v23 }
 0x5b6   : > { %v3440_v3 = vpop.permute.xlu0 %3439  ;;  %3482 = vst.msk [vmem:[#allocation8 + $0x90] sm:$0x3f] %vm3385_vm7, %v3474_v2  ;;  %v2051_v20 = vld [vmem:[#allocation2 + $0x100] sm:$0xff] }
 0x5b7   : > { %4265 = vmatpush3.bf16.msra.mxu1 %v4476_v19  ;;  %3449 = vst.msk [vmem:[#allocation8 + $0x60] sm:$0xff] %vm3381_vm0, %v3440_v3 }
 0x5b8   : > { %4266 = vmatprep.subr.bf16.mxu1 %v4477_v41 }
 0x5b9   : > { %v3442_v38 = vpop.permute.xlu1 %3441  ;;  %v2052_v28 = vld [vmem:[#allocation2 + $0x108] sm:$0x3f] }
 0x5ba   : > { %3450 = vst.msk [vmem:[#allocation8 + $0x88] sm:$0x3f] %vm3385_vm7, %v3442_v38  ;;  %v2069_v25 = vpack.c.bf16 %v2052_v28, %v2051_v20  ;;  %v3504_v32 = vld [vmem:[#allocation8 + $0x68] sm:$0xff] }
 0x5bb   : > { %4267 = vmatpush3.bf16.msra.mxu1 %v4478_v42 }
 0x5bc   : > { %4361 = vmatmul.mubr.msk.bf16.gmra.mrb[64].mxu0 %vm6195_vm10, %v2069_v25 }
 0x5bd   : > { %4396 = vmatprep.mubr.msk.bf16.mxu0 %vm293_vm11, %v3515_v48  ;;  %v3509_v39 = vld [vmem:[#allocation8 + $0x90] sm:$0x3f] }
 0x5be   : > { %3904 = vmatmul.mubr.bf16.vlgmr.msra.gmra.mrb[48].mxu1 %v3513_v47  ;;  %v3519_v49 = vpack.c.bf16 %v3509_v39, %v3504_v32  ;;  %v3503_v4 = vld [vmem:[#allocation8 + $0x60] sm:$0xff] }
 0x5c0   : > { %3911 = vmatprep.mubr.bf16.mxu1 %v3519_v49 }
 0x5c1   : > { %v3508_v52 = vld [vmem:[#allocation8 + $0x88] sm:$0x3f] }
 0x5c2   : > { %v3518_v21 = vpack.c.bf16 %v3508_v52, %v3503_v4 }
 0x5c4   : > { %4397 = vmatmul.mubr.msk.bf16.vlgmr.msra.gmra.mrb[68].mxu0 %vm293_vm11, %v3520_v55 }
 0x5c6   : > { %3912 = vmatmul.mubr.bf16.gmra.mrb[52].mxu1 %v3518_v21 }
 0x671   : > { %v4240_v56 = vpop.f32.mrb[40].mxu1 }
 0x672   : > { %v4241_v40 = vpop.f32.mrb[41].mxu1 }
 0x673   : > { %v4242_v46 = vadd.f32 %v4241_v40, %v4240_v56  ;;  %v4243_v53 = vpop.f32.mrb[42].mxu1 }
 0x674   : > { %v4244_v0 = vpop.f32.mrb[43].mxu1 }
 0x675   : > { %v4245_v7 = vadd.f32 %v4244_v0, %v4243_v53  ;;  %v3857_v31 = vadd.f32 %v4242_v46, %v4108_v30 }
 0x677   : > { %v3860_v61 = vadd.f32 %v4245_v7, %v4108_v30 }
 0x687   : > { %v4246_v54 = vpop.f32.mrb[44].mxu1 }
 0x688   : > { %v4247_v29 = vpop.f32.mrb[45].mxu1 }
 0x689   : > { %v4248_v22 = vadd.f32 %v4247_v29, %v4246_v54  ;;  %v4249_v43 = vpop.f32.mrb[46].mxu1 }
 0x68a   : > { %v4250_v35 = vpop.f32.mrb[47].mxu1 }
 0x68b   : > { %v3865_v10 = vadd.f32 %v4248_v22, %v4108_v30 }
 0x68f   : > { %v2331_v34 = vpop.f32.mrb[64].mxu0 }
 0x690   : > { %v4362_v26 = vpop.f32.mrb[65].mxu0 }
 0x691   : > { %v4268_v36 = vpop.f32.mrb[48].mxu1  ;;  %v2334_v24 = vpop.f32.mrb[66].mxu0 }
 0x692   : > { %v4269_v15 = vpop.f32.mrb[49].mxu1  ;;  %v4363_v59 = vpop.f32.mrb[67].mxu0 }
 0x693   : > { %v4270_v18 = vadd.f32 %v4269_v15, %v4268_v36  ;;  %v4271_v58 = vpop.f32.mrb[50].mxu1 }
 0x694   : > { %v4272_v60 = vpop.f32.mrb[51].mxu1 }
 0x695   : > { %v4273_v62 = vadd.f32 %v4272_v60, %v4271_v58  ;;  %v3906_v63 = vadd.f32 %v4270_v18, %v3857_v31 }
 0x697   : > { %v3909_v33 = vadd.f32 %v4273_v62, %v3860_v61  ;;  %v4398_v8 = vpop.f32.mrb[68].mxu0 }
 0x698   : > { %v3954_v12 = vpop.f32.mrb[69].mxu0 }
 0x699   : > { %v4274_v9 = vpop.f32.mrb[52].mxu1  ;;  %v3955_v13 = vadd.f32 %v3954_v12, %v3906_v63  ;;  %v4399_v37 = vpop.f32.mrb[70].mxu0 }
 0x69a   : > { %v4275_v50 = vpop.f32.mrb[53].mxu1  ;;  %v3957_v11 = vpop.f32.mrb[71].mxu0 }
 0x69b   : > { %v4276_v14 = vadd.f32 %v4275_v50, %v4274_v9  ;;  %v4277_v16 = vpop.f32.mrb[54].mxu1  ;;  %v3969_v57 = vmax.f32 %v3955_v13, 0.0  ;;  %v3958_v19 = vadd.f32 %v3957_v11, %v3909_v33 }
 0x69c   : > { %v4278_v17 = vpop.f32.mrb[55].mxu1 }
 0x69d   : > { %v3914_v5 = vadd.f32 %v4276_v14, %v3865_v10  ;;  %3973 = vst [vmem:[#allocation9] sm:$0xff] %v3969_v57  ;;  %v3970_v23 = vmax.f32 %v3958_v19, 0.0 }
 0x69f   : > { %v3963_v41 = vadd.f32 %v4398_v8, %v3914_v5  ;;  %3974 = vst [vmem:[#allocation9 + $0x8] sm:$0xff] %v3970_v23 }
 0x6a1   : > { %v3971_v3 = vmax.f32 %v3963_v41, 0.0 }
 0x6a3   : > { %3975 = vst [vmem:[#allocation9 + $0x10] sm:$0xff] %v3971_v3 }
 0x6a4   : > { %v3978_v2 = vld [vmem:[#allocation9 + $0x6] ss:$2 sm:$0x1]  ;;  %v3980_v42 = vld [vmem:[#allocation9 + $0x7] ss:$2 sm:$0x1] }
 0x6a5   : > { %v3985_v6 = vmax.f32 %v3978_v2, %v3980_v42 }
 0x6a6   : > { %v3982_v20 = vld [vmem:[#allocation9 + $0xb] ss:$2 sm:$0x1]  ;;  %v3984_v1 = vld [vmem:[#allocation9 + $0xc] ss:$2 sm:$0x1] }
 0x6a7   : > { %v3986_v38 = vmax.f32 %v3982_v20, %v3984_v1 }
 0x6a9   : > { %v3987_v44 = vmax.f32 %v3985_v6, %v3986_v38 }
 0x6aa   : > { %v3990_v28 = vld [vmem:[#allocation9 + $0x10] ss:$2 sm:$0x1]  ;;  %v3992_v25 = vld [vmem:[#allocation9 + $0x11] ss:$2 sm:$0x1] }
 0x6ab   : > { %v3994_v45 = vld [vmem:[#allocation9 + $0x15] ss:$2 sm:$0x1]  ;;  %v3996_v47 = vld [vmem:[#allocation9 + $0x16] ss:$2 sm:$0x1]  ;;  %v3997_v48 = vmax.f32 %v3990_v28, %v3992_v25 }
 0x6ac   : > { %v3998_v32 = vmax.f32 %v3994_v45, %v3996_v47  ;;  %3988 = vst [vmem:[%s276_s10] sm:$0x1] %v3987_v44 }
 0x6ae   : > { %v3999_v39 = vmax.f32 %v3997_v48, %v3998_v32 }
 0x6b0   : > { %4000 = vst [vmem:[%s276_s10 + $0x1] sm:$0x1] %v3999_v39 }
 0x6b1 PF: > { %s17_s24 = sadd.s32 1, %s4487_s24  }
 0x6b2   : > { %p14_p4 = scmp.ge.s32.totalorder %s17_s24, 4  }
 0x6b4   :  { %16 = sbr.rel (!%p14_p4) target bundleno = 1 (0x1), region = 134 }

</bundles_post_ra>
